<compile_context>
chip_gen: v6e
topology: v6e:2x2x1
jax: 0.10.0
libtpu: 0.0.40
codegen_flags: <defaults>
</compile_context>

<pallas_src>
import functools

import jax
import jax.numpy as jnp
from jax import lax
from jax.experimental import pallas as pl
from jax.experimental.pallas import tpu as pltpu

# ----- hyper-params implied by the module (small, synthetic) -----
IMG_CH = 4
C1 = 48              # conv1 output channels
D_MODEL = 32         # conv2 output channels
IMG_HW = 32          # input spatial size -> 8x8 after conv1, 2x2 after conv2
BN_EPS = 1e-5
_INV_SQRT2 = 0.7071067811865476

K1 = 7 * 7 * IMG_CH  # 196  im2col feature size for conv1, order (ki, kj, c)
K1P = 256            # conv1 K padded to two full 128-lane tiles
C1P = 128            # conv1 channels zero-padded to a full lane width
NP2 = 128            # conv2 output channels zero-padded to a full lane width
H1 = W1 = 8          # conv1 output spatial
H2 = W2 = 2          # conv2 output spatial

# Per-image padded-grid layout inside the kernel:
#   padded spatial coord (pi, pj), pi,pj in [0,11)  ->  scratch row  pi*PITCH + pj + OFS
# OFS chosen so the 8-row scatter slabs land at 8-aligned sublane offsets.
PITCH = 16
OFS = 5              # scatter slab for spatial row i starts at 16*i + 56 (multiple of 8)
IMG_ROWS = 176       # rows per image in the scratch (multiple of 16); max read row = 175


# --------------------------- fused Pallas kernel ------------------------------------
def _img_head_kernel(bb, x1_ref, w1_ref, shift_ref, w2_ref, b2_ref, o_ref, y1pad_ref):
    # x1_ref:    (bb*64, 256)   im2col'd patches for this batch block (K zero-padded)
    # w1_ref:    (256, 128)     conv1 weight, BN scale folded in, zero-padded rows/cols
    # shift_ref: (1, 128)       folded bias+BN shift, zero-padded
    # w2_ref:    (49*128, 128)  conv2 weight, tap-major rows, N zero-padded to 128
    # b2_ref:    (1, 128)       conv2 bias, zero-padded
    # o_ref:     (bb*4, 128)    per-image 2x2 output positions (row-major), lane-dense
    # y1pad_ref: VMEM (bb*176, 128) per-image zero-padded spatial grids of conv1 output

    # ---- conv1: ONE (bb*64, 256) x (256, 128) matmul + folded BN/bias + exact GELU ----
    a = jnp.dot(x1_ref[...], w1_ref[...], preferred_element_type=jnp.float32)
    a = a + shift_ref[...]
    y1 = 0.5 * a * (1.0 + lax.erf(a * _INV_SQRT2))      # (bb*64, 128); padded lanes stay 0

    # ---- build the per-image padded grids in VMEM ----
    z56 = jnp.zeros((56, C1P), jnp.float32)
    z8 = jnp.zeros((8, C1P), jnp.float32)
    for m in range(bb):
        base = m * IMG_ROWS
        # zero ONLY the halo rows conv2 reads but the scatter never writes
        # (data rows are fully overwritten every step; no program_id gating -> safe
        #  under dimension_semantics=("parallel",) on v7x megacore).
        y1pad_ref[base:base + 56, :] = z56                     # pi = 0..2 read region
        for pi in range(3, 11):                                # pj = 0..2 strips (8-aligned)
            y1pad_ref[base + 16 * pi:base + 16 * pi + 8, :] = z8
        # scatter the 8x8 conv1 map; every slab starts at an 8-aligned sublane offset
        for i in range(H1):
            dst = base + 16 * i + 56
            y1pad_ref[dst:dst + 8, :] = y1[m * 64 + i * 8:m * 64 + (i + 1) * 8, :]

    # ---- conv2: 49 taps, stride 4, pad 3 -> 2x2 outputs; ONE merged dot per tap ----
    acc = jnp.zeros((bb * 4, NP2), jnp.float32) + b2_ref[...]
    for ki in range(7):
        for kj in range(7):
            t = ki * 7 + kj
            w_t = w2_ref[t * C1P:(t + 1) * C1P, :]             # (128, 128), static slice
            q0 = ki * PITCH + kj + OFS
            pieces = []
            for m in range(bb):
                b0 = m * IMG_ROWS + q0
                pieces.append(y1pad_ref[pl.ds(b0, 2, stride=4), :])               # oh = 0
                pieces.append(y1pad_ref[pl.ds(b0 + 4 * PITCH, 2, stride=4), :])   # oh = 1
            lhs = jnp.concatenate(pieces, axis=0)              # (bb*4, 128)
            acc = acc + jnp.dot(lhs, w_t, preferred_element_type=jnp.float32)
    o_ref[...] = acc                                           # unmasked lane-dense store


# ------------------------------- glue (plain JAX) ----------------------------------
def _im2col_nhwc(x, k, stride, pad):
    """x: (B,H,W,C) -> (B,Ho,Wo,k*k*C), feature order (ki, kj, c)."""
    B, H, W, C = x.shape
    xp = jnp.pad(x, ((0, 0), (pad, pad), (pad, pad), (0, 0)))
    Ho = (H + 2 * pad - k) // stride + 1
    Wo = (W + 2 * pad - k) // stride + 1
    cols = []
    for i in range(k):
        for j in range(k):
            cols.append(xp[:, i:i + stride * Ho:stride, j:j + stride * Wo:stride, :])
    return jnp.concatenate(cols, axis=-1), Ho, Wo


def _pick_batch_block(B):
    """Largest BB <= 8 dividing B while keeping >= 2 grid steps (v7x has 2 TensorCores)."""
    if B <= 1:
        return 1
    best = 1
    for bb in range(1, min(8, B // 2) + 1):
        if B % bb == 0:
            best = bb
    return best


def init_params(key):
    ks = jax.random.split(key, 8)
    p = {}
    p["w1"] = jax.random.normal(ks[0], (C1, IMG_CH, 7, 7), jnp.float32) * 0.05
    p["b1"] = jax.random.normal(ks[1], (C1,), jnp.float32) * 0.05
    p["bn_gamma"] = 1.0 + 0.1 * jax.random.normal(ks[2], (C1,), jnp.float32)
    p["bn_beta"] = 0.1 * jax.random.normal(ks[3], (C1,), jnp.float32)
    p["bn_mean"] = 0.1 * jax.random.normal(ks[4], (C1,), jnp.float32)
    p["bn_var"] = jnp.abs(jax.random.normal(ks[5], (C1,), jnp.float32)) + 0.5
    p["w2"] = jax.random.normal(ks[6], (D_MODEL, C1, 7, 7), jnp.float32) * 0.02
    p["b2"] = jax.random.normal(ks[7], (D_MODEL,), jnp.float32) * 0.05
    return p


def img_head_forward(img, p):
    B, Cin, H, W = img.shape
    assert (Cin, H, W) == (IMG_CH, IMG_HW, IMG_HW), "kernel geometry assumes 32x32 input"
    bb = _pick_batch_block(B)
    assert B % bb == 0
    G = B // bb

    # ---- one-time host-side folds (tiny ops) ----
    scale = p["bn_gamma"] / jnp.sqrt(p["bn_var"] + BN_EPS)                   # eval-mode BN
    shift = p["b1"] * scale + (p["bn_beta"] - p["bn_mean"] * scale)
    w1_mat = p["w1"].transpose(2, 3, 1, 0).reshape(K1, C1) * scale[None, :]  # (ki,kj,c) rows
    w1_pad = jnp.zeros((K1P, C1P), jnp.float32).at[:K1, :C1].set(w1_mat)
    shift_pad = jnp.zeros((1, C1P), jnp.float32).at[0, :C1].set(shift)
    w2_tap = p["w2"].transpose(2, 3, 1, 0).reshape(49, C1, D_MODEL)          # tap = ki*7+kj
    w2_pad = jnp.zeros((49, C1P, NP2), jnp.float32).at[:, :C1, :D_MODEL].set(w2_tap)
    w2_pad = w2_pad.reshape(49 * C1P, NP2)                                   # lane-dense 2D
    b2_pad = jnp.zeros((1, NP2), jnp.float32).at[0, :D_MODEL].set(p["b2"])

    # ---- im2col of the input image (only remaining XLA glue), K zero-padded to 256 ----
    x1col, h1, w1_ = _im2col_nhwc(img.transpose(0, 2, 3, 1), k=7, stride=4, pad=3)
    assert (h1, w1_) == (H1, W1)
    x1col = x1col.reshape(B * H1 * W1, K1)
    x1col = jnp.pad(x1col, ((0, 0), (0, K1P - K1)))

    flops = int(2 * B * H1 * W1 * K1P * C1P + 2 * 49 * B * 4 * C1P * NP2)
    transcend = int(B * H1 * W1 * C1P)
    bytes_acc = int(4 * (B * H1 * W1 * K1P + K1P * C1P + C1P
                         + 49 * C1P * NP2 + NP2 + B * 4 * NP2))

    out = pl.pallas_call(
        functools.partial(_img_head_kernel, bb),
        out_shape=jax.ShapeDtypeStruct((G, bb * 4, NP2), jnp.float32),
        grid=(G,),
        in_specs=[
            pl.BlockSpec((bb * H1 * W1, K1P), lambda g: (g, 0)),   # patches, per batch block
            pl.BlockSpec((K1P, C1P), lambda g: (0, 0)),            # folded conv1 weight
            pl.BlockSpec((1, C1P), lambda g: (0, 0)),              # folded shift
            pl.BlockSpec((49 * C1P, NP2), lambda g: (0, 0)),       # conv2 taps, lane-dense
            pl.BlockSpec((1, NP2), lambda g: (0, 0)),              # conv2 bias
        ],
        out_specs=pl.BlockSpec((None, bb * H2 * W2, NP2), lambda g: (g, 0, 0)),
        scratch_shapes=[pltpu.VMEM((bb * IMG_ROWS, C1P), jnp.float32)],
        compiler_params=pltpu.CompilerParams(
            dimension_semantics=("parallel",),
            vmem_limit_bytes=32 * 1024 * 1024),
        cost_estimate=pl.CostEstimate(flops=flops, transcendentals=transcend,
                                      bytes_accessed=bytes_acc),
    )(x1col, w1_pad, shift_pad, w2_pad, b2_pad)

    # rows are (global image)*4 + position; slice away the lane padding in the glue
    out = out.reshape(B * H2 * W2, NP2)[:, :D_MODEL].reshape(B, H2 * W2, D_MODEL)
    return out  # already (B, H*W, C) channel-last == permute(0,2,3,1).reshape(B,-1,C)


# ------------------------------- pure-JAX reference ---------------------------------
def img_head_ref(img, p):
    dn = ("NCHW", "OIHW", "NCHW")
    y = lax.conv_general_dilated(img, p["w1"], (4, 4), [(3, 3), (3, 3)],
                                 dimension_numbers=dn) + p["b1"][None, :, None, None]
    y = ((y - p["bn_mean"][None, :, None, None])
         / jnp.sqrt(p["bn_var"] + BN_EPS)[None, :, None, None]
         * p["bn_gamma"][None, :, None, None] + p["bn_beta"][None, :, None, None])
    y = 0.5 * y * (1.0 + lax.erf(y * _INV_SQRT2))
    y = lax.conv_general_dilated(y, p["w2"], (4, 4), [(3, 3), (3, 3)],
                                 dimension_numbers=dn) + p["b2"][None, :, None, None]
    y = y.transpose(0, 2, 3, 1)
    B, H, W, C = y.shape
    return y.reshape(B, H * W, C)


if __name__ == "__main__":
    key = jax.random.PRNGKey(0)
    kp, kx = jax.random.split(key)
    params = init_params(kp)
    img = jax.random.normal(kx, (2, IMG_CH, IMG_HW, IMG_HW), jnp.float32)

    fwd = jax.jit(img_head_forward)
    out = jax.block_until_ready(fwd(img, params))
    ref = jax.block_until_ready(img_head_ref(img, params))

    assert out.shape == (2, H2 * W2, D_MODEL), out.shape
    assert jnp.allclose(out, ref, atol=1e-4, rtol=1e-4), float(jnp.abs(out - ref).max())
    print("KERNEL_OK")
</pallas_src>

<mosaic_0001>
module attributes {stable_mosaic.version = 11 : i64} {
  func.func @_img_head_kernel(%arg0: i32, %arg1: memref<64x256xf32, #tpu.memory_space<vmem>>, %arg2: memref<256x128xf32, #tpu.memory_space<vmem>>, %arg3: memref<1x128xf32, #tpu.memory_space<vmem>>, %arg4: memref<6272x128xf32, #tpu.memory_space<vmem>>, %arg5: memref<1x128xf32, #tpu.memory_space<vmem>>, %arg6: memref<1x4x128xf32, #tpu.memory_space<vmem>>, %arg7: memref<176x128xf32, #tpu.memory_space<vmem>>) attributes {dimension_semantics = [#tpu.dimension_semantics<parallel>], iteration_bounds = array<i64: 2>, scalar_prefetch = 0 : i64, scratch_operands = 1 : i64, tpu.core_type = #tpu.core_type<tc>, window_params = [{transform_indices = @transform_0, window_bounds = array<i64: 64, 256>}, {pipeline_mode = #tpu.pipeline_mode<synchronous>, transform_indices = @transform_1, window_bounds = array<i64: 256, 128>}, {pipeline_mode = #tpu.pipeline_mode<synchronous>, transform_indices = @transform_2, window_bounds = array<i64: 1, 128>}, {pipeline_mode = #tpu.pipeline_mode<synchronous>, transform_indices = @transform_3, window_bounds = array<i64: 6272, 128>}, {pipeline_mode = #tpu.pipeline_mode<synchronous>, transform_indices = @transform_4, window_bounds = array<i64: 1, 128>}, {transform_indices = @transform_5, window_bounds = array<i64: 1, 4, 128>}]} {
    %c0 = arith.constant 0 : index
    %c0_0 = arith.constant 0 : index
    %0 = vector.load %arg1[%c0, %c0_0] : memref<64x256xf32, #tpu.memory_space<vmem>>, vector<64x256xf32>
    %c0_1 = arith.constant 0 : index
    %c0_2 = arith.constant 0 : index
    %1 = vector.load %arg2[%c0_1, %c0_2] : memref<256x128xf32, #tpu.memory_space<vmem>>, vector<256x128xf32>
    %cst = arith.constant dense<0.000000e+00> : vector<64x128xf32>
    %2 = tpu.matmul %0, %1, %cst {dimension_numbers = #tpu.dot_dimension_numbers<[1], [0], [0], [1], [0, 0, 1, 1], [], []>} : vector<64x256xf32>, vector<256x128xf32>, vector<64x128xf32> -> vector<64x128xf32>
    %c0_3 = arith.constant 0 : index
    %c0_4 = arith.constant 0 : index
    %3 = vector.load %arg3[%c0_3, %c0_4] : memref<1x128xf32, #tpu.memory_space<vmem>>, vector<1x128xf32>
    %4 = vector.broadcast %3 : vector<1x128xf32> to vector<64x128xf32>
    %5 = arith.addf %2, %4 : vector<64x128xf32>
    %cst_5 = arith.constant 5.000000e-01 : f32
    %6 = vector.broadcast %cst_5 : f32 to vector<64x128xf32>
    %7 = arith.mulf %6, %5 : vector<64x128xf32>
    %cst_6 = arith.constant 0.707106769 : f32
    %8 = vector.broadcast %cst_6 : f32 to vector<64x128xf32>
    %9 = arith.mulf %5, %8 : vector<64x128xf32>
    %10 = math.erf %9 : vector<64x128xf32>
    %cst_7 = arith.constant 1.000000e+00 : f32
    %11 = vector.broadcast %cst_7 : f32 to vector<64x128xf32>
    %12 = arith.addf %11, %10 : vector<64x128xf32>
    %13 = arith.mulf %7, %12 : vector<64x128xf32>
    %cst_8 = arith.constant 0.000000e+00 : f32
    %14 = vector.broadcast %cst_8 : f32 to vector<56x128xf32>
    %cst_9 = arith.constant 0.000000e+00 : f32
    %15 = vector.broadcast %cst_9 : f32 to vector<8x128xf32>
    %c0_10 = arith.constant 0 : index
    %c0_11 = arith.constant 0 : index
    %16 = vector.load %arg7[%c0_10, %c0_11] : memref<176x128xf32, #tpu.memory_space<vmem>>, vector<56x128xf32>
    tpu.vector_store %arg7[%c0_10, %c0_11], %14 {strides = array<i32>} : memref<176x128xf32, #tpu.memory_space<vmem>>, vector<56x128xf32>,
    %c48 = arith.constant 48 : index
    %c0_12 = arith.constant 0 : index
    %17 = vector.load %arg7[%c48, %c0_12] : memref<176x128xf32, #tpu.memory_space<vmem>>, vector<8x128xf32>
    tpu.vector_store %arg7[%c48, %c0_12], %15 {strides = array<i32>} : memref<176x128xf32, #tpu.memory_space<vmem>>, vector<8x128xf32>,
    %c64 = arith.constant 64 : index
    %c0_13 = arith.constant 0 : index
    %18 = vector.load %arg7[%c64, %c0_13] : memref<176x128xf32, #tpu.memory_space<vmem>>, vector<8x128xf32>
    tpu.vector_store %arg7[%c64, %c0_13], %15 {strides = array<i32>} : memref<176x128xf32, #tpu.memory_space<vmem>>, vector<8x128xf32>,
    %c80 = arith.constant 80 : index
    %c0_14 = arith.constant 0 : index
    %19 = vector.load %arg7[%c80, %c0_14] : memref<176x128xf32, #tpu.memory_space<vmem>>, vector<8x128xf32>
    tpu.vector_store %arg7[%c80, %c0_14], %15 {strides = array<i32>} : memref<176x128xf32, #tpu.memory_space<vmem>>, vector<8x128xf32>,
    %c96 = arith.constant 96 : index
    %c0_15 = arith.constant 0 : index
    %20 = vector.load %arg7[%c96, %c0_15] : memref<176x128xf32, #tpu.memory_space<vmem>>, vector<8x128xf32>
    tpu.vector_store %arg7[%c96, %c0_15], %15 {strides = array<i32>} : memref<176x128xf32, #tpu.memory_space<vmem>>, vector<8x128xf32>,
    %c112 = arith.constant 112 : index
    %c0_16 = arith.constant 0 : index
    %21 = vector.load %arg7[%c112, %c0_16] : memref<176x128xf32, #tpu.memory_space<vmem>>, vector<8x128xf32>
    tpu.vector_store %arg7[%c112, %c0_16], %15 {strides = array<i32>} : memref<176x128xf32, #tpu.memory_space<vmem>>, vector<8x128xf32>,
    %c128 = arith.constant 128 : index
    %c0_17 = arith.constant 0 : index
    %22 = vector.load %arg7[%c128, %c0_17] : memref<176x128xf32, #tpu.memory_space<vmem>>, vector<8x128xf32>
    tpu.vector_store %arg7[%c128, %c0_17], %15 {strides = array<i32>} : memref<176x128xf32, #tpu.memory_space<vmem>>, vector<8x128xf32>,
    %c144 = arith.constant 144 : index
    %c0_18 = arith.constant 0 : index
    %23 = vector.load %arg7[%c144, %c0_18] : memref<176x128xf32, #tpu.memory_space<vmem>>, vector<8x128xf32>
    tpu.vector_store %arg7[%c144, %c0_18], %15 {strides = array<i32>} : memref<176x128xf32, #tpu.memory_space<vmem>>, vector<8x128xf32>,
    %c160 = arith.constant 160 : index
    %c0_19 = arith.constant 0 : index
    %24 = vector.load %arg7[%c160, %c0_19] : memref<176x128xf32, #tpu.memory_space<vmem>>, vector<8x128xf32>
    tpu.vector_store %arg7[%c160, %c0_19], %15 {strides = array<i32>} : memref<176x128xf32, #tpu.memory_space<vmem>>, vector<8x128xf32>,
    %25 = vector.extract_strided_slice %13 {offsets = [0, 0], sizes = [8, 128], strides = [1, 1]} : vector<64x128xf32> to vector<8x128xf32>
    %c56 = arith.constant 56 : index
    %c0_20 = arith.constant 0 : index
    %26 = vector.load %arg7[%c56, %c0_20] : memref<176x128xf32, #tpu.memory_space<vmem>>, vector<8x128xf32>
    tpu.vector_store %arg7[%c56, %c0_20], %25 {strides = array<i32>} : memref<176x128xf32, #tpu.memory_space<vmem>>, vector<8x128xf32>,
    %27 = vector.extract_strided_slice %13 {offsets = [8, 0], sizes = [8, 128], strides = [1, 1]} : vector<64x128xf32> to vector<8x128xf32>
    %c72 = arith.constant 72 : index
    %c0_21 = arith.constant 0 : index
    %28 = vector.load %arg7[%c72, %c0_21] : memref<176x128xf32, #tpu.memory_space<vmem>>, vector<8x128xf32>
    tpu.vector_store %arg7[%c72, %c0_21], %27 {strides = array<i32>} : memref<176x128xf32, #tpu.memory_space<vmem>>, vector<8x128xf32>,
    %29 = vector.extract_strided_slice %13 {offsets = [16, 0], sizes = [8, 128], strides = [1, 1]} : vector<64x128xf32> to vector<8x128xf32>
    %c88 = arith.constant 88 : index
    %c0_22 = arith.constant 0 : index
    %30 = vector.load %arg7[%c88, %c0_22] : memref<176x128xf32, #tpu.memory_space<vmem>>, vector<8x128xf32>
    tpu.vector_store %arg7[%c88, %c0_22], %29 {strides = array<i32>} : memref<176x128xf32, #tpu.memory_space<vmem>>, vector<8x128xf32>,
    %31 = vector.extract_strided_slice %13 {offsets = [24, 0], sizes = [8, 128], strides = [1, 1]} : vector<64x128xf32> to vector<8x128xf32>
    %c104 = arith.constant 104 : index
    %c0_23 = arith.constant 0 : index
    %32 = vector.load %arg7[%c104, %c0_23] : memref<176x128xf32, #tpu.memory_space<vmem>>, vector<8x128xf32>
    tpu.vector_store %arg7[%c104, %c0_23], %31 {strides = array<i32>} : memref<176x128xf32, #tpu.memory_space<vmem>>, vector<8x128xf32>,
    %33 = vector.extract_strided_slice %13 {offsets = [32, 0], sizes = [8, 128], strides = [1, 1]} : vector<64x128xf32> to vector<8x128xf32>
    %c120 = arith.constant 120 : index
    %c0_24 = arith.constant 0 : index
    %34 = vector.load %arg7[%c120, %c0_24] : memref<176x128xf32, #tpu.memory_space<vmem>>, vector<8x128xf32>
    tpu.vector_store %arg7[%c120, %c0_24], %33 {strides = array<i32>} : memref<176x128xf32, #tpu.memory_space<vmem>>, vector<8x128xf32>,
    %35 = vector.extract_strided_slice %13 {offsets = [40, 0], sizes = [8, 128], strides = [1, 1]} : vector<64x128xf32> to vector<8x128xf32>
    %c136 = arith.constant 136 : index
    %c0_25 = arith.constant 0 : index
    %36 = vector.load %arg7[%c136, %c0_25] : memref<176x128xf32, #tpu.memory_space<vmem>>, vector<8x128xf32>
    tpu.vector_store %arg7[%c136, %c0_25], %35 {strides = array<i32>} : memref<176x128xf32, #tpu.memory_space<vmem>>, vector<8x128xf32>,
    %37 = vector.extract_strided_slice %13 {offsets = [48, 0], sizes = [8, 128], strides = [1, 1]} : vector<64x128xf32> to vector<8x128xf32>
    %c152 = arith.constant 152 : index
    %c0_26 = arith.constant 0 : index
    %38 = vector.load %arg7[%c152, %c0_26] : memref<176x128xf32, #tpu.memory_space<vmem>>, vector<8x128xf32>
    tpu.vector_store %arg7[%c152, %c0_26], %37 {strides = array<i32>} : memref<176x128xf32, #tpu.memory_space<vmem>>, vector<8x128xf32>,
    %39 = vector.extract_strided_slice %13 {offsets = [56, 0], sizes = [8, 128], strides = [1, 1]} : vector<64x128xf32> to vector<8x128xf32>
    %c168 = arith.constant 168 : index
    %c0_27 = arith.constant 0 : index
    %40 = vector.load %arg7[%c168, %c0_27] : memref<176x128xf32, #tpu.memory_space<vmem>>, vector<8x128xf32>
    tpu.vector_store %arg7[%c168, %c0_27], %39 {strides = array<i32>} : memref<176x128xf32, #tpu.memory_space<vmem>>, vector<8x128xf32>,
    %cst_28 = arith.constant 0.000000e+00 : f32
    %41 = vector.broadcast %cst_28 : f32 to vector<4x128xf32>
    %c0_29 = arith.constant 0 : index
    %c0_30 = arith.constant 0 : index
    %42 = vector.load %arg5[%c0_29, %c0_30] : memref<1x128xf32, #tpu.memory_space<vmem>>, vector<1x128xf32>
    %43 = vector.broadcast %42 : vector<1x128xf32> to vector<4x128xf32>
    %44 = arith.addf %41, %43 : vector<4x128xf32>
    %c0_31 = arith.constant 0 : index
    %c0_32 = arith.constant 0 : index
    %45 = vector.load %arg4[%c0_31, %c0_32] : memref<6272x128xf32, #tpu.memory_space<vmem>>, vector<128x128xf32>
    %c5 = arith.constant 5 : index
    %c0_33 = arith.constant 0 : index
    %46 = tpu.strided_load %arg7[%c5, %c0_33] {strides = array<i32: 4, 1>} : memref<176x128xf32, #tpu.memory_space<vmem>>, vector<2x128xf32>
    %c69 = arith.constant 69 : index
    %c0_34 = arith.constant 0 : index
    %47 = tpu.strided_load %arg7[%c69, %c0_34] {strides = array<i32: 4, 1>} : memref<176x128xf32, #tpu.memory_space<vmem>>, vector<2x128xf32>
    %48 = tpu.concatenate %46, %47 in 0 : vector<2x128xf32>, vector<2x128xf32> -> vector<4x128xf32>
    %cst_35 = arith.constant dense<0.000000e+00> : vector<4x128xf32>
    %49 = tpu.matmul %48, %45, %cst_35 {dimension_numbers = #tpu.dot_dimension_numbers<[1], [0], [0], [1], [0, 0, 1, 1], [], []>} : vector<4x128xf32>, vector<128x128xf32>, vector<4x128xf32> -> vector<4x128xf32>
    %50 = arith.addf %44, %49 : vector<4x128xf32>
    %c128_36 = arith.constant 128 : index
    %c0_37 = arith.constant 0 : index
    %51 = vector.load %arg4[%c128_36, %c0_37] : memref<6272x128xf32, #tpu.memory_space<vmem>>, vector<128x128xf32>
    %c6 = arith.constant 6 : index
    %c0_38 = arith.constant 0 : index
    %52 = tpu.strided_load %arg7[%c6, %c0_38] {strides = array<i32: 4, 1>} : memref<176x128xf32, #tpu.memory_space<vmem>>, vector<2x128xf32>
    %c70 = arith.constant 70 : index
    %c0_39 = arith.constant 0 : index
    %53 = tpu.strided_load %arg7[%c70, %c0_39] {strides = array<i32: 4, 1>} : memref<176x128xf32, #tpu.memory_space<vmem>>, vector<2x128xf32>
    %54 = tpu.concatenate %52, %53 in 0 : vector<2x128xf32>, vector<2x128xf32> -> vector<4x128xf32>
    %cst_40 = arith.constant dense<0.000000e+00> : vector<4x128xf32>
    %55 = tpu.matmul %54, %51, %cst_40 {dimension_numbers = #tpu.dot_dimension_numbers<[1], [0], [0], [1], [0, 0, 1, 1], [], []>} : vector<4x128xf32>, vector<128x128xf32>, vector<4x128xf32> -> vector<4x128xf32>
    %56 = arith.addf %50, %55 : vector<4x128xf32>
    %c256 = arith.constant 256 : index
    %c0_41 = arith.constant 0 : index
    %57 = vector.load %arg4[%c256, %c0_41] : memref<6272x128xf32, #tpu.memory_space<vmem>>, vector<128x128xf32>
    %c7 = arith.constant 7 : index
    %c0_42 = arith.constant 0 : index
    %58 = tpu.strided_load %arg7[%c7, %c0_42] {strides = array<i32: 4, 1>} : memref<176x128xf32, #tpu.memory_space<vmem>>, vector<2x128xf32>
    %c71 = arith.constant 71 : index
    %c0_43 = arith.constant 0 : index
    %59 = tpu.strided_load %arg7[%c71, %c0_43] {strides = array<i32: 4, 1>} : memref<176x128xf32, #tpu.memory_space<vmem>>, vector<2x128xf32>
    %60 = tpu.concatenate %58, %59 in 0 : vector<2x128xf32>, vector<2x128xf32> -> vector<4x128xf32>
    %cst_44 = arith.constant dense<0.000000e+00> : vector<4x128xf32>
    %61 = tpu.matmul %60, %57, %cst_44 {dimension_numbers = #tpu.dot_dimension_numbers<[1], [0], [0], [1], [0, 0, 1, 1], [], []>} : vector<4x128xf32>, vector<128x128xf32>, vector<4x128xf32> -> vector<4x128xf32>
    %62 = arith.addf %56, %61 : vector<4x128xf32>
    %c384 = arith.constant 384 : index
    %c0_45 = arith.constant 0 : index
    %63 = vector.load %arg4[%c384, %c0_45] : memref<6272x128xf32, #tpu.memory_space<vmem>>, vector<128x128xf32>
    %c8 = arith.constant 8 : index
    %c0_46 = arith.constant 0 : index
    %64 = tpu.strided_load %arg7[%c8, %c0_46] {strides = array<i32: 4, 1>} : memref<176x128xf32, #tpu.memory_space<vmem>>, vector<2x128xf32>
    %c72_47 = arith.constant 72 : index
    %c0_48 = arith.constant 0 : index
    %65 = tpu.strided_load %arg7[%c72_47, %c0_48] {strides = array<i32: 4, 1>} : memref<176x128xf32, #tpu.memory_space<vmem>>, vector<2x128xf32>
    %66 = tpu.concatenate %64, %65 in 0 : vector<2x128xf32>, vector<2x128xf32> -> vector<4x128xf32>
    %cst_49 = arith.constant dense<0.000000e+00> : vector<4x128xf32>
    %67 = tpu.matmul %66, %63, %cst_49 {dimension_numbers = #tpu.dot_dimension_numbers<[1], [0], [0], [1], [0, 0, 1, 1], [], []>} : vector<4x128xf32>, vector<128x128xf32>, vector<4x128xf32> -> vector<4x128xf32>
    %68 = arith.addf %62, %67 : vector<4x128xf32>
    %c512 = arith.constant 512 : index
    %c0_50 = arith.constant 0 : index
    %69 = vector.load %arg4[%c512, %c0_50] : memref<6272x128xf32, #tpu.memory_space<vmem>>, vector<128x128xf32>
    %c9 = arith.constant 9 : index
    %c0_51 = arith.constant 0 : index
    %70 = tpu.strided_load %arg7[%c9, %c0_51] {strides = array<i32: 4, 1>} : memref<176x128xf32, #tpu.memory_space<vmem>>, vector<2x128xf32>
    %c73 = arith.constant 73 : index
    %c0_52 = arith.constant 0 : index
    %71 = tpu.strided_load %arg7[%c73, %c0_52] {strides = array<i32: 4, 1>} : memref<176x128xf32, #tpu.memory_space<vmem>>, vector<2x128xf32>
    %72 = tpu.concatenate %70, %71 in 0 : vector<2x128xf32>, vector<2x128xf32> -> vector<4x128xf32>
    %cst_53 = arith.constant dense<0.000000e+00> : vector<4x128xf32>
    %73 = tpu.matmul %72, %69, %cst_53 {dimension_numbers = #tpu.dot_dimension_numbers<[1], [0], [0], [1], [0, 0, 1, 1], [], []>} : vector<4x128xf32>, vector<128x128xf32>, vector<4x128xf32> -> vector<4x128xf32>
    %74 = arith.addf %68, %73 : vector<4x128xf32>
    %c640 = arith.constant 640 : index
    %c0_54 = arith.constant 0 : index
    %75 = vector.load %arg4[%c640, %c0_54] : memref<6272x128xf32, #tpu.memory_space<vmem>>, vector<128x128xf32>
    %c10 = arith.constant 10 : index
    %c0_55 = arith.constant 0 : index
    %76 = tpu.strided_load %arg7[%c10, %c0_55] {strides = array<i32: 4, 1>} : memref<176x128xf32, #tpu.memory_space<vmem>>, vector<2x128xf32>
    %c74 = arith.constant 74 : index
    %c0_56 = arith.constant 0 : index
    %77 = tpu.strided_load %arg7[%c74, %c0_56] {strides = array<i32: 4, 1>} : memref<176x128xf32, #tpu.memory_space<vmem>>, vector<2x128xf32>
    %78 = tpu.concatenate %76, %77 in 0 : vector<2x128xf32>, vector<2x128xf32> -> vector<4x128xf32>
    %cst_57 = arith.constant dense<0.000000e+00> : vector<4x128xf32>
    %79 = tpu.matmul %78, %75, %cst_57 {dimension_numbers = #tpu.dot_dimension_numbers<[1], [0], [0], [1], [0, 0, 1, 1], [], []>} : vector<4x128xf32>, vector<128x128xf32>, vector<4x128xf32> -> vector<4x128xf32>
    %80 = arith.addf %74, %79 : vector<4x128xf32>
    %c768 = arith.constant 768 : index
    %c0_58 = arith.constant 0 : index
    %81 = vector.load %arg4[%c768, %c0_58] : memref<6272x128xf32, #tpu.memory_space<vmem>>, vector<128x128xf32>
    %c11 = arith.constant 11 : index
    %c0_59 = arith.constant 0 : index
    %82 = tpu.strided_load %arg7[%c11, %c0_59] {strides = array<i32: 4, 1>} : memref<176x128xf32, #tpu.memory_space<vmem>>, vector<2x128xf32>
    %c75 = arith.constant 75 : index
    %c0_60 = arith.constant 0 : index
    %83 = tpu.strided_load %arg7[%c75, %c0_60] {strides = array<i32: 4, 1>} : memref<176x128xf32, #tpu.memory_space<vmem>>, vector<2x128xf32>
    %84 = tpu.concatenate %82, %83 in 0 : vector<2x128xf32>, vector<2x128xf32> -> vector<4x128xf32>
    %cst_61 = arith.constant dense<0.000000e+00> : vector<4x128xf32>
    %85 = tpu.matmul %84, %81, %cst_61 {dimension_numbers = #tpu.dot_dimension_numbers<[1], [0], [0], [1], [0, 0, 1, 1], [], []>} : vector<4x128xf32>, vector<128x128xf32>, vector<4x128xf32> -> vector<4x128xf32>
    %86 = arith.addf %80, %85 : vector<4x128xf32>
    %c896 = arith.constant 896 : index
    %c0_62 = arith.constant 0 : index
    %87 = vector.load %arg4[%c896, %c0_62] : memref<6272x128xf32, #tpu.memory_space<vmem>>, vector<128x128xf32>
    %c21 = arith.constant 21 : index
    %c0_63 = arith.constant 0 : index
    %88 = tpu.strided_load %arg7[%c21, %c0_63] {strides = array<i32: 4, 1>} : memref<176x128xf32, #tpu.memory_space<vmem>>, vector<2x128xf32>
    %c85 = arith.constant 85 : index
    %c0_64 = arith.constant 0 : index
    %89 = tpu.strided_load %arg7[%c85, %c0_64] {strides = array<i32: 4, 1>} : memref<176x128xf32, #tpu.memory_space<vmem>>, vector<2x128xf32>
    %90 = tpu.concatenate %88, %89 in 0 : vector<2x128xf32>, vector<2x128xf32> -> vector<4x128xf32>
    %cst_65 = arith.constant dense<0.000000e+00> : vector<4x128xf32>
    %91 = tpu.matmul %90, %87, %cst_65 {dimension_numbers = #tpu.dot_dimension_numbers<[1], [0], [0], [1], [0, 0, 1, 1], [], []>} : vector<4x128xf32>, vector<128x128xf32>, vector<4x128xf32> -> vector<4x128xf32>
    %92 = arith.addf %86, %91 : vector<4x128xf32>
    %c1024 = arith.constant 1024 : index
    %c0_66 = arith.constant 0 : index
    %93 = vector.load %arg4[%c1024, %c0_66] : memref<6272x128xf32, #tpu.memory_space<vmem>>, vector<128x128xf32>
    %c22 = arith.constant 22 : index
    %c0_67 = arith.constant 0 : index
    %94 = tpu.strided_load %arg7[%c22, %c0_67] {strides = array<i32: 4, 1>} : memref<176x128xf32, #tpu.memory_space<vmem>>, vector<2x128xf32>
    %c86 = arith.constant 86 : index
    %c0_68 = arith.constant 0 : index
    %95 = tpu.strided_load %arg7[%c86, %c0_68] {strides = array<i32: 4, 1>} : memref<176x128xf32, #tpu.memory_space<vmem>>, vector<2x128xf32>
    %96 = tpu.concatenate %94, %95 in 0 : vector<2x128xf32>, vector<2x128xf32> -> vector<4x128xf32>
    %cst_69 = arith.constant dense<0.000000e+00> : vector<4x128xf32>
    %97 = tpu.matmul %96, %93, %cst_69 {dimension_numbers = #tpu.dot_dimension_numbers<[1], [0], [0], [1], [0, 0, 1, 1], [], []>} : vector<4x128xf32>, vector<128x128xf32>, vector<4x128xf32> -> vector<4x128xf32>
    %98 = arith.addf %92, %97 : vector<4x128xf32>
    %c1152 = arith.constant 1152 : index
    %c0_70 = arith.constant 0 : index
    %99 = vector.load %arg4[%c1152, %c0_70] : memref<6272x128xf32, #tpu.memory_space<vmem>>, vector<128x128xf32>
    %c23 = arith.constant 23 : index
    %c0_71 = arith.constant 0 : index
    %100 = tpu.strided_load %arg7[%c23, %c0_71] {strides = array<i32: 4, 1>} : memref<176x128xf32, #tpu.memory_space<vmem>>, vector<2x128xf32>
    %c87 = arith.constant 87 : index
    %c0_72 = arith.constant 0 : index
    %101 = tpu.strided_load %arg7[%c87, %c0_72] {strides = array<i32: 4, 1>} : memref<176x128xf32, #tpu.memory_space<vmem>>, vector<2x128xf32>
    %102 = tpu.concatenate %100, %101 in 0 : vector<2x128xf32>, vector<2x128xf32> -> vector<4x128xf32>
    %cst_73 = arith.constant dense<0.000000e+00> : vector<4x128xf32>
    %103 = tpu.matmul %102, %99, %cst_73 {dimension_numbers = #tpu.dot_dimension_numbers<[1], [0], [0], [1], [0, 0, 1, 1], [], []>} : vector<4x128xf32>, vector<128x128xf32>, vector<4x128xf32> -> vector<4x128xf32>
    %104 = arith.addf %98, %103 : vector<4x128xf32>
    %c1280 = arith.constant 1280 : index
    %c0_74 = arith.constant 0 : index
    %105 = vector.load %arg4[%c1280, %c0_74] : memref<6272x128xf32, #tpu.memory_space<vmem>>, vector<128x128xf32>
    %c24 = arith.constant 24 : index
    %c0_75 = arith.constant 0 : index
    %106 = tpu.strided_load %arg7[%c24, %c0_75] {strides = array<i32: 4, 1>} : memref<176x128xf32, #tpu.memory_space<vmem>>, vector<2x128xf32>
    %c88_76 = arith.constant 88 : index
    %c0_77 = arith.constant 0 : index
    %107 = tpu.strided_load %arg7[%c88_76, %c0_77] {strides = array<i32: 4, 1>} : memref<176x128xf32, #tpu.memory_space<vmem>>, vector<2x128xf32>
    %108 = tpu.concatenate %106, %107 in 0 : vector<2x128xf32>, vector<2x128xf32> -> vector<4x128xf32>
    %cst_78 = arith.constant dense<0.000000e+00> : vector<4x128xf32>
    %109 = tpu.matmul %108, %105, %cst_78 {dimension_numbers = #tpu.dot_dimension_numbers<[1], [0], [0], [1], [0, 0, 1, 1], [], []>} : vector<4x128xf32>, vector<128x128xf32>, vector<4x128xf32> -> vector<4x128xf32>
    %110 = arith.addf %104, %109 : vector<4x128xf32>
    %c1408 = arith.constant 1408 : index
    %c0_79 = arith.constant 0 : index
    %111 = vector.load %arg4[%c1408, %c0_79] : memref<6272x128xf32, #tpu.memory_space<vmem>>, vector<128x128xf32>
    %c25 = arith.constant 25 : index
    %c0_80 = arith.constant 0 : index
    %112 = tpu.strided_load %arg7[%c25, %c0_80] {strides = array<i32: 4, 1>} : memref<176x128xf32, #tpu.memory_space<vmem>>, vector<2x128xf32>
    %c89 = arith.constant 89 : index
    %c0_81 = arith.constant 0 : index
    %113 = tpu.strided_load %arg7[%c89, %c0_81] {strides = array<i32: 4, 1>} : memref<176x128xf32, #tpu.memory_space<vmem>>, vector<2x128xf32>
    %114 = tpu.concatenate %112, %113 in 0 : vector<2x128xf32>, vector<2x128xf32> -> vector<4x128xf32>
    %cst_82 = arith.constant dense<0.000000e+00> : vector<4x128xf32>
    %115 = tpu.matmul %114, %111, %cst_82 {dimension_numbers = #tpu.dot_dimension_numbers<[1], [0], [0], [1], [0, 0, 1, 1], [], []>} : vector<4x128xf32>, vector<128x128xf32>, vector<4x128xf32> -> vector<4x128xf32>
    %116 = arith.addf %110, %115 : vector<4x128xf32>
    %c1536 = arith.constant 1536 : index
    %c0_83 = arith.constant 0 : index
    %117 = vector.load %arg4[%c1536, %c0_83] : memref<6272x128xf32, #tpu.memory_space<vmem>>, vector<128x128xf32>
    %c26 = arith.constant 26 : index
    %c0_84 = arith.constant 0 : index
    %118 = tpu.strided_load %arg7[%c26, %c0_84] {strides = array<i32: 4, 1>} : memref<176x128xf32, #tpu.memory_space<vmem>>, vector<2x128xf32>
    %c90 = arith.constant 90 : index
    %c0_85 = arith.constant 0 : index
    %119 = tpu.strided_load %arg7[%c90, %c0_85] {strides = array<i32: 4, 1>} : memref<176x128xf32, #tpu.memory_space<vmem>>, vector<2x128xf32>
    %120 = tpu.concatenate %118, %119 in 0 : vector<2x128xf32>, vector<2x128xf32> -> vector<4x128xf32>
    %cst_86 = arith.constant dense<0.000000e+00> : vector<4x128xf32>
    %121 = tpu.matmul %120, %117, %cst_86 {dimension_numbers = #tpu.dot_dimension_numbers<[1], [0], [0], [1], [0, 0, 1, 1], [], []>} : vector<4x128xf32>, vector<128x128xf32>, vector<4x128xf32> -> vector<4x128xf32>
    %122 = arith.addf %116, %121 : vector<4x128xf32>
    %c1664 = arith.constant 1664 : index
    %c0_87 = arith.constant 0 : index
    %123 = vector.load %arg4[%c1664, %c0_87] : memref<6272x128xf32, #tpu.memory_space<vmem>>, vector<128x128xf32>
    %c27 = arith.constant 27 : index
    %c0_88 = arith.constant 0 : index
    %124 = tpu.strided_load %arg7[%c27, %c0_88] {strides = array<i32: 4, 1>} : memref<176x128xf32, #tpu.memory_space<vmem>>, vector<2x128xf32>
    %c91 = arith.constant 91 : index
    %c0_89 = arith.constant 0 : index
    %125 = tpu.strided_load %arg7[%c91, %c0_89] {strides = array<i32: 4, 1>} : memref<176x128xf32, #tpu.memory_space<vmem>>, vector<2x128xf32>
    %126 = tpu.concatenate %124, %125 in 0 : vector<2x128xf32>, vector<2x128xf32> -> vector<4x128xf32>
    %cst_90 = arith.constant dense<0.000000e+00> : vector<4x128xf32>
    %127 = tpu.matmul %126, %123, %cst_90 {dimension_numbers = #tpu.dot_dimension_numbers<[1], [0], [0], [1], [0, 0, 1, 1], [], []>} : vector<4x128xf32>, vector<128x128xf32>, vector<4x128xf32> -> vector<4x128xf32>
    %128 = arith.addf %122, %127 : vector<4x128xf32>
    %c1792 = arith.constant 1792 : index
    %c0_91 = arith.constant 0 : index
    %129 = vector.load %arg4[%c1792, %c0_91] : memref<6272x128xf32, #tpu.memory_space<vmem>>, vector<128x128xf32>
    %c37 = arith.constant 37 : index
    %c0_92 = arith.constant 0 : index
    %130 = tpu.strided_load %arg7[%c37, %c0_92] {strides = array<i32: 4, 1>} : memref<176x128xf32, #tpu.memory_space<vmem>>, vector<2x128xf32>
    %c101 = arith.constant 101 : index
    %c0_93 = arith.constant 0 : index
    %131 = tpu.strided_load %arg7[%c101, %c0_93] {strides = array<i32: 4, 1>} : memref<176x128xf32, #tpu.memory_space<vmem>>, vector<2x128xf32>
    %132 = tpu.concatenate %130, %131 in 0 : vector<2x128xf32>, vector<2x128xf32> -> vector<4x128xf32>
    %cst_94 = arith.constant dense<0.000000e+00> : vector<4x128xf32>
    %133 = tpu.matmul %132, %129, %cst_94 {dimension_numbers = #tpu.dot_dimension_numbers<[1], [0], [0], [1], [0, 0, 1, 1], [], []>} : vector<4x128xf32>, vector<128x128xf32>, vector<4x128xf32> -> vector<4x128xf32>
    %134 = arith.addf %128, %133 : vector<4x128xf32>
    %c1920 = arith.constant 1920 : index
    %c0_95 = arith.constant 0 : index
    %135 = vector.load %arg4[%c1920, %c0_95] : memref<6272x128xf32, #tpu.memory_space<vmem>>, vector<128x128xf32>
    %c38 = arith.constant 38 : index
    %c0_96 = arith.constant 0 : index
    %136 = tpu.strided_load %arg7[%c38, %c0_96] {strides = array<i32: 4, 1>} : memref<176x128xf32, #tpu.memory_space<vmem>>, vector<2x128xf32>
    %c102 = arith.constant 102 : index
    %c0_97 = arith.constant 0 : index
    %137 = tpu.strided_load %arg7[%c102, %c0_97] {strides = array<i32: 4, 1>} : memref<176x128xf32, #tpu.memory_space<vmem>>, vector<2x128xf32>
    %138 = tpu.concatenate %136, %137 in 0 : vector<2x128xf32>, vector<2x128xf32> -> vector<4x128xf32>
    %cst_98 = arith.constant dense<0.000000e+00> : vector<4x128xf32>
    %139 = tpu.matmul %138, %135, %cst_98 {dimension_numbers = #tpu.dot_dimension_numbers<[1], [0], [0], [1], [0, 0, 1, 1], [], []>} : vector<4x128xf32>, vector<128x128xf32>, vector<4x128xf32> -> vector<4x128xf32>
    %140 = arith.addf %134, %139 : vector<4x128xf32>
    %c2048 = arith.constant 2048 : index
    %c0_99 = arith.constant 0 : index
    %141 = vector.load %arg4[%c2048, %c0_99] : memref<6272x128xf32, #tpu.memory_space<vmem>>, vector<128x128xf32>
    %c39 = arith.constant 39 : index
    %c0_100 = arith.constant 0 : index
    %142 = tpu.strided_load %arg7[%c39, %c0_100] {strides = array<i32: 4, 1>} : memref<176x128xf32, #tpu.memory_space<vmem>>, vector<2x128xf32>
    %c103 = arith.constant 103 : index
    %c0_101 = arith.constant 0 : index
    %143 = tpu.strided_load %arg7[%c103, %c0_101] {strides = array<i32: 4, 1>} : memref<176x128xf32, #tpu.memory_space<vmem>>, vector<2x128xf32>
    %144 = tpu.concatenate %142, %143 in 0 : vector<2x128xf32>, vector<2x128xf32> -> vector<4x128xf32>
    %cst_102 = arith.constant dense<0.000000e+00> : vector<4x128xf32>
    %145 = tpu.matmul %144, %141, %cst_102 {dimension_numbers = #tpu.dot_dimension_numbers<[1], [0], [0], [1], [0, 0, 1, 1], [], []>} : vector<4x128xf32>, vector<128x128xf32>, vector<4x128xf32> -> vector<4x128xf32>
    %146 = arith.addf %140, %145 : vector<4x128xf32>
    %c2176 = arith.constant 2176 : index
    %c0_103 = arith.constant 0 : index
    %147 = vector.load %arg4[%c2176, %c0_103] : memref<6272x128xf32, #tpu.memory_space<vmem>>, vector<128x128xf32>
    %c40 = arith.constant 40 : index
    %c0_104 = arith.constant 0 : index
    %148 = tpu.strided_load %arg7[%c40, %c0_104] {strides = array<i32: 4, 1>} : memref<176x128xf32, #tpu.memory_space<vmem>>, vector<2x128xf32>
    %c104_105 = arith.constant 104 : index
    %c0_106 = arith.constant 0 : index
    %149 = tpu.strided_load %arg7[%c104_105, %c0_106] {strides = array<i32: 4, 1>} : memref<176x128xf32, #tpu.memory_space<vmem>>, vector<2x128xf32>
    %150 = tpu.concatenate %148, %149 in 0 : vector<2x128xf32>, vector<2x128xf32> -> vector<4x128xf32>
    %cst_107 = arith.constant dense<0.000000e+00> : vector<4x128xf32>
    %151 = tpu.matmul %150, %147, %cst_107 {dimension_numbers = #tpu.dot_dimension_numbers<[1], [0], [0], [1], [0, 0, 1, 1], [], []>} : vector<4x128xf32>, vector<128x128xf32>, vector<4x128xf32> -> vector<4x128xf32>
    %152 = arith.addf %146, %151 : vector<4x128xf32>
    %c2304 = arith.constant 2304 : index
    %c0_108 = arith.constant 0 : index
    %153 = vector.load %arg4[%c2304, %c0_108] : memref<6272x128xf32, #tpu.memory_space<vmem>>, vector<128x128xf32>
    %c41 = arith.constant 41 : index
    %c0_109 = arith.constant 0 : index
    %154 = tpu.strided_load %arg7[%c41, %c0_109] {strides = array<i32: 4, 1>} : memref<176x128xf32, #tpu.memory_space<vmem>>, vector<2x128xf32>
    %c105 = arith.constant 105 : index
    %c0_110 = arith.constant 0 : index
    %155 = tpu.strided_load %arg7[%c105, %c0_110] {strides = array<i32: 4, 1>} : memref<176x128xf32, #tpu.memory_space<vmem>>, vector<2x128xf32>
    %156 = tpu.concatenate %154, %155 in 0 : vector<2x128xf32>, vector<2x128xf32> -> vector<4x128xf32>
    %cst_111 = arith.constant dense<0.000000e+00> : vector<4x128xf32>
    %157 = tpu.matmul %156, %153, %cst_111 {dimension_numbers = #tpu.dot_dimension_numbers<[1], [0], [0], [1], [0, 0, 1, 1], [], []>} : vector<4x128xf32>, vector<128x128xf32>, vector<4x128xf32> -> vector<4x128xf32>
    %158 = arith.addf %152, %157 : vector<4x128xf32>
    %c2432 = arith.constant 2432 : index
    %c0_112 = arith.constant 0 : index
    %159 = vector.load %arg4[%c2432, %c0_112] : memref<6272x128xf32, #tpu.memory_space<vmem>>, vector<128x128xf32>
    %c42 = arith.constant 42 : index
    %c0_113 = arith.constant 0 : index
    %160 = tpu.strided_load %arg7[%c42, %c0_113] {strides = array<i32: 4, 1>} : memref<176x128xf32, #tpu.memory_space<vmem>>, vector<2x128xf32>
    %c106 = arith.constant 106 : index
    %c0_114 = arith.constant 0 : index
    %161 = tpu.strided_load %arg7[%c106, %c0_114] {strides = array<i32: 4, 1>} : memref<176x128xf32, #tpu.memory_space<vmem>>, vector<2x128xf32>
    %162 = tpu.concatenate %160, %161 in 0 : vector<2x128xf32>, vector<2x128xf32> -> vector<4x128xf32>
    %cst_115 = arith.constant dense<0.000000e+00> : vector<4x128xf32>
    %163 = tpu.matmul %162, %159, %cst_115 {dimension_numbers = #tpu.dot_dimension_numbers<[1], [0], [0], [1], [0, 0, 1, 1], [], []>} : vector<4x128xf32>, vector<128x128xf32>, vector<4x128xf32> -> vector<4x128xf32>
    %164 = arith.addf %158, %163 : vector<4x128xf32>
    %c2560 = arith.constant 2560 : index
    %c0_116 = arith.constant 0 : index
    %165 = vector.load %arg4[%c2560, %c0_116] : memref<6272x128xf32, #tpu.memory_space<vmem>>, vector<128x128xf32>
    %c43 = arith.constant 43 : index
    %c0_117 = arith.constant 0 : index
    %166 = tpu.strided_load %arg7[%c43, %c0_117] {strides = array<i32: 4, 1>} : memref<176x128xf32, #tpu.memory_space<vmem>>, vector<2x128xf32>
    %c107 = arith.constant 107 : index
    %c0_118 = arith.constant 0 : index
    %167 = tpu.strided_load %arg7[%c107, %c0_118] {strides = array<i32: 4, 1>} : memref<176x128xf32, #tpu.memory_space<vmem>>, vector<2x128xf32>
    %168 = tpu.concatenate %166, %167 in 0 : vector<2x128xf32>, vector<2x128xf32> -> vector<4x128xf32>
    %cst_119 = arith.constant dense<0.000000e+00> : vector<4x128xf32>
    %169 = tpu.matmul %168, %165, %cst_119 {dimension_numbers = #tpu.dot_dimension_numbers<[1], [0], [0], [1], [0, 0, 1, 1], [], []>} : vector<4x128xf32>, vector<128x128xf32>, vector<4x128xf32> -> vector<4x128xf32>
    %170 = arith.addf %164, %169 : vector<4x128xf32>
    %c2688 = arith.constant 2688 : index
    %c0_120 = arith.constant 0 : index
    %171 = vector.load %arg4[%c2688, %c0_120] : memref<6272x128xf32, #tpu.memory_space<vmem>>, vector<128x128xf32>
    %c53 = arith.constant 53 : index
    %c0_121 = arith.constant 0 : index
    %172 = tpu.strided_load %arg7[%c53, %c0_121] {strides = array<i32: 4, 1>} : memref<176x128xf32, #tpu.memory_space<vmem>>, vector<2x128xf32>
    %c117 = arith.constant 117 : index
    %c0_122 = arith.constant 0 : index
    %173 = tpu.strided_load %arg7[%c117, %c0_122] {strides = array<i32: 4, 1>} : memref<176x128xf32, #tpu.memory_space<vmem>>, vector<2x128xf32>
    %174 = tpu.concatenate %172, %173 in 0 : vector<2x128xf32>, vector<2x128xf32> -> vector<4x128xf32>
    %cst_123 = arith.constant dense<0.000000e+00> : vector<4x128xf32>
    %175 = tpu.matmul %174, %171, %cst_123 {dimension_numbers = #tpu.dot_dimension_numbers<[1], [0], [0], [1], [0, 0, 1, 1], [], []>} : vector<4x128xf32>, vector<128x128xf32>, vector<4x128xf32> -> vector<4x128xf32>
    %176 = arith.addf %170, %175 : vector<4x128xf32>
    %c2816 = arith.constant 2816 : index
    %c0_124 = arith.constant 0 : index
    %177 = vector.load %arg4[%c2816, %c0_124] : memref<6272x128xf32, #tpu.memory_space<vmem>>, vector<128x128xf32>
    %c54 = arith.constant 54 : index
    %c0_125 = arith.constant 0 : index
    %178 = tpu.strided_load %arg7[%c54, %c0_125] {strides = array<i32: 4, 1>} : memref<176x128xf32, #tpu.memory_space<vmem>>, vector<2x128xf32>
    %c118 = arith.constant 118 : index
    %c0_126 = arith.constant 0 : index
    %179 = tpu.strided_load %arg7[%c118, %c0_126] {strides = array<i32: 4, 1>} : memref<176x128xf32, #tpu.memory_space<vmem>>, vector<2x128xf32>
    %180 = tpu.concatenate %178, %179 in 0 : vector<2x128xf32>, vector<2x128xf32> -> vector<4x128xf32>
    %cst_127 = arith.constant dense<0.000000e+00> : vector<4x128xf32>
    %181 = tpu.matmul %180, %177, %cst_127 {dimension_numbers = #tpu.dot_dimension_numbers<[1], [0], [0], [1], [0, 0, 1, 1], [], []>} : vector<4x128xf32>, vector<128x128xf32>, vector<4x128xf32> -> vector<4x128xf32>
    %182 = arith.addf %176, %181 : vector<4x128xf32>
    %c2944 = arith.constant 2944 : index
    %c0_128 = arith.constant 0 : index
    %183 = vector.load %arg4[%c2944, %c0_128] : memref<6272x128xf32, #tpu.memory_space<vmem>>, vector<128x128xf32>
    %c55 = arith.constant 55 : index
    %c0_129 = arith.constant 0 : index
    %184 = tpu.strided_load %arg7[%c55, %c0_129] {strides = array<i32: 4, 1>} : memref<176x128xf32, #tpu.memory_space<vmem>>, vector<2x128xf32>
    %c119 = arith.constant 119 : index
    %c0_130 = arith.constant 0 : index
    %185 = tpu.strided_load %arg7[%c119, %c0_130] {strides = array<i32: 4, 1>} : memref<176x128xf32, #tpu.memory_space<vmem>>, vector<2x128xf32>
    %186 = tpu.concatenate %184, %185 in 0 : vector<2x128xf32>, vector<2x128xf32> -> vector<4x128xf32>
    %cst_131 = arith.constant dense<0.000000e+00> : vector<4x128xf32>
    %187 = tpu.matmul %186, %183, %cst_131 {dimension_numbers = #tpu.dot_dimension_numbers<[1], [0], [0], [1], [0, 0, 1, 1], [], []>} : vector<4x128xf32>, vector<128x128xf32>, vector<4x128xf32> -> vector<4x128xf32>
    %188 = arith.addf %182, %187 : vector<4x128xf32>
    %c3072 = arith.constant 3072 : index
    %c0_132 = arith.constant 0 : index
    %189 = vector.load %arg4[%c3072, %c0_132] : memref<6272x128xf32, #tpu.memory_space<vmem>>, vector<128x128xf32>
    %c56_133 = arith.constant 56 : index
    %c0_134 = arith.constant 0 : index
    %190 = tpu.strided_load %arg7[%c56_133, %c0_134] {strides = array<i32: 4, 1>} : memref<176x128xf32, #tpu.memory_space<vmem>>, vector<2x128xf32>
    %c120_135 = arith.constant 120 : index
    %c0_136 = arith.constant 0 : index
    %191 = tpu.strided_load %arg7[%c120_135, %c0_136] {strides = array<i32: 4, 1>} : memref<176x128xf32, #tpu.memory_space<vmem>>, vector<2x128xf32>
    %192 = tpu.concatenate %190, %191 in 0 : vector<2x128xf32>, vector<2x128xf32> -> vector<4x128xf32>
    %cst_137 = arith.constant dense<0.000000e+00> : vector<4x128xf32>
    %193 = tpu.matmul %192, %189, %cst_137 {dimension_numbers = #tpu.dot_dimension_numbers<[1], [0], [0], [1], [0, 0, 1, 1], [], []>} : vector<4x128xf32>, vector<128x128xf32>, vector<4x128xf32> -> vector<4x128xf32>
    %194 = arith.addf %188, %193 : vector<4x128xf32>
    %c3200 = arith.constant 3200 : index
    %c0_138 = arith.constant 0 : index
    %195 = vector.load %arg4[%c3200, %c0_138] : memref<6272x128xf32, #tpu.memory_space<vmem>>, vector<128x128xf32>
    %c57 = arith.constant 57 : index
    %c0_139 = arith.constant 0 : index
    %196 = tpu.strided_load %arg7[%c57, %c0_139] {strides = array<i32: 4, 1>} : memref<176x128xf32, #tpu.memory_space<vmem>>, vector<2x128xf32>
    %c121 = arith.constant 121 : index
    %c0_140 = arith.constant 0 : index
    %197 = tpu.strided_load %arg7[%c121, %c0_140] {strides = array<i32: 4, 1>} : memref<176x128xf32, #tpu.memory_space<vmem>>, vector<2x128xf32>
    %198 = tpu.concatenate %196, %197 in 0 : vector<2x128xf32>, vector<2x128xf32> -> vector<4x128xf32>
    %cst_141 = arith.constant dense<0.000000e+00> : vector<4x128xf32>
    %199 = tpu.matmul %198, %195, %cst_141 {dimension_numbers = #tpu.dot_dimension_numbers<[1], [0], [0], [1], [0, 0, 1, 1], [], []>} : vector<4x128xf32>, vector<128x128xf32>, vector<4x128xf32> -> vector<4x128xf32>
    %200 = arith.addf %194, %199 : vector<4x128xf32>
    %c3328 = arith.constant 3328 : index
    %c0_142 = arith.constant 0 : index
    %201 = vector.load %arg4[%c3328, %c0_142] : memref<6272x128xf32, #tpu.memory_space<vmem>>, vector<128x128xf32>
    %c58 = arith.constant 58 : index
    %c0_143 = arith.constant 0 : index
    %202 = tpu.strided_load %arg7[%c58, %c0_143] {strides = array<i32: 4, 1>} : memref<176x128xf32, #tpu.memory_space<vmem>>, vector<2x128xf32>
    %c122 = arith.constant 122 : index
    %c0_144 = arith.constant 0 : index
    %203 = tpu.strided_load %arg7[%c122, %c0_144] {strides = array<i32: 4, 1>} : memref<176x128xf32, #tpu.memory_space<vmem>>, vector<2x128xf32>
    %204 = tpu.concatenate %202, %203 in 0 : vector<2x128xf32>, vector<2x128xf32> -> vector<4x128xf32>
    %cst_145 = arith.constant dense<0.000000e+00> : vector<4x128xf32>
    %205 = tpu.matmul %204, %201, %cst_145 {dimension_numbers = #tpu.dot_dimension_numbers<[1], [0], [0], [1], [0, 0, 1, 1], [], []>} : vector<4x128xf32>, vector<128x128xf32>, vector<4x128xf32> -> vector<4x128xf32>
    %206 = arith.addf %200, %205 : vector<4x128xf32>
    %c3456 = arith.constant 3456 : index
    %c0_146 = arith.constant 0 : index
    %207 = vector.load %arg4[%c3456, %c0_146] : memref<6272x128xf32, #tpu.memory_space<vmem>>, vector<128x128xf32>
    %c59 = arith.constant 59 : index
    %c0_147 = arith.constant 0 : index
    %208 = tpu.strided_load %arg7[%c59, %c0_147] {strides = array<i32: 4, 1>} : memref<176x128xf32, #tpu.memory_space<vmem>>, vector<2x128xf32>
    %c123 = arith.constant 123 : index
    %c0_148 = arith.constant 0 : index
    %209 = tpu.strided_load %arg7[%c123, %c0_148] {strides = array<i32: 4, 1>} : memref<176x128xf32, #tpu.memory_space<vmem>>, vector<2x128xf32>
    %210 = tpu.concatenate %208, %209 in 0 : vector<2x128xf32>, vector<2x128xf32> -> vector<4x128xf32>
    %cst_149 = arith.constant dense<0.000000e+00> : vector<4x128xf32>
    %211 = tpu.matmul %210, %207, %cst_149 {dimension_numbers = #tpu.dot_dimension_numbers<[1], [0], [0], [1], [0, 0, 1, 1], [], []>} : vector<4x128xf32>, vector<128x128xf32>, vector<4x128xf32> -> vector<4x128xf32>
    %212 = arith.addf %206, %211 : vector<4x128xf32>
    %c3584 = arith.constant 3584 : index
    %c0_150 = arith.constant 0 : index
    %213 = vector.load %arg4[%c3584, %c0_150] : memref<6272x128xf32, #tpu.memory_space<vmem>>, vector<128x128xf32>
    %c69_151 = arith.constant 69 : index
    %c0_152 = arith.constant 0 : index
    %214 = tpu.strided_load %arg7[%c69_151, %c0_152] {strides = array<i32: 4, 1>} : memref<176x128xf32, #tpu.memory_space<vmem>>, vector<2x128xf32>
    %c133 = arith.constant 133 : index
    %c0_153 = arith.constant 0 : index
    %215 = tpu.strided_load %arg7[%c133, %c0_153] {strides = array<i32: 4, 1>} : memref<176x128xf32, #tpu.memory_space<vmem>>, vector<2x128xf32>
    %216 = tpu.concatenate %214, %215 in 0 : vector<2x128xf32>, vector<2x128xf32> -> vector<4x128xf32>
    %cst_154 = arith.constant dense<0.000000e+00> : vector<4x128xf32>
    %217 = tpu.matmul %216, %213, %cst_154 {dimension_numbers = #tpu.dot_dimension_numbers<[1], [0], [0], [1], [0, 0, 1, 1], [], []>} : vector<4x128xf32>, vector<128x128xf32>, vector<4x128xf32> -> vector<4x128xf32>
    %218 = arith.addf %212, %217 : vector<4x128xf32>
    %c3712 = arith.constant 3712 : index
    %c0_155 = arith.constant 0 : index
    %219 = vector.load %arg4[%c3712, %c0_155] : memref<6272x128xf32, #tpu.memory_space<vmem>>, vector<128x128xf32>
    %c70_156 = arith.constant 70 : index
    %c0_157 = arith.constant 0 : index
    %220 = tpu.strided_load %arg7[%c70_156, %c0_157] {strides = array<i32: 4, 1>} : memref<176x128xf32, #tpu.memory_space<vmem>>, vector<2x128xf32>
    %c134 = arith.constant 134 : index
    %c0_158 = arith.constant 0 : index
    %221 = tpu.strided_load %arg7[%c134, %c0_158] {strides = array<i32: 4, 1>} : memref<176x128xf32, #tpu.memory_space<vmem>>, vector<2x128xf32>
    %222 = tpu.concatenate %220, %221 in 0 : vector<2x128xf32>, vector<2x128xf32> -> vector<4x128xf32>
    %cst_159 = arith.constant dense<0.000000e+00> : vector<4x128xf32>
    %223 = tpu.matmul %222, %219, %cst_159 {dimension_numbers = #tpu.dot_dimension_numbers<[1], [0], [0], [1], [0, 0, 1, 1], [], []>} : vector<4x128xf32>, vector<128x128xf32>, vector<4x128xf32> -> vector<4x128xf32>
    %224 = arith.addf %218, %223 : vector<4x128xf32>
    %c3840 = arith.constant 3840 : index
    %c0_160 = arith.constant 0 : index
    %225 = vector.load %arg4[%c3840, %c0_160] : memref<6272x128xf32, #tpu.memory_space<vmem>>, vector<128x128xf32>
    %c71_161 = arith.constant 71 : index
    %c0_162 = arith.constant 0 : index
    %226 = tpu.strided_load %arg7[%c71_161, %c0_162] {strides = array<i32: 4, 1>} : memref<176x128xf32, #tpu.memory_space<vmem>>, vector<2x128xf32>
    %c135 = arith.constant 135 : index
    %c0_163 = arith.constant 0 : index
    %227 = tpu.strided_load %arg7[%c135, %c0_163] {strides = array<i32: 4, 1>} : memref<176x128xf32, #tpu.memory_space<vmem>>, vector<2x128xf32>
    %228 = tpu.concatenate %226, %227 in 0 : vector<2x128xf32>, vector<2x128xf32> -> vector<4x128xf32>
    %cst_164 = arith.constant dense<0.000000e+00> : vector<4x128xf32>
    %229 = tpu.matmul %228, %225, %cst_164 {dimension_numbers = #tpu.dot_dimension_numbers<[1], [0], [0], [1], [0, 0, 1, 1], [], []>} : vector<4x128xf32>, vector<128x128xf32>, vector<4x128xf32> -> vector<4x128xf32>
    %230 = arith.addf %224, %229 : vector<4x128xf32>
    %c3968 = arith.constant 3968 : index
    %c0_165 = arith.constant 0 : index
    %231 = vector.load %arg4[%c3968, %c0_165] : memref<6272x128xf32, #tpu.memory_space<vmem>>, vector<128x128xf32>
    %c72_166 = arith.constant 72 : index
    %c0_167 = arith.constant 0 : index
    %232 = tpu.strided_load %arg7[%c72_166, %c0_167] {strides = array<i32: 4, 1>} : memref<176x128xf32, #tpu.memory_space<vmem>>, vector<2x128xf32>
    %c136_168 = arith.constant 136 : index
    %c0_169 = arith.constant 0 : index
    %233 = tpu.strided_load %arg7[%c136_168, %c0_169] {strides = array<i32: 4, 1>} : memref<176x128xf32, #tpu.memory_space<vmem>>, vector<2x128xf32>
    %234 = tpu.concatenate %232, %233 in 0 : vector<2x128xf32>, vector<2x128xf32> -> vector<4x128xf32>
    %cst_170 = arith.constant dense<0.000000e+00> : vector<4x128xf32>
    %235 = tpu.matmul %234, %231, %cst_170 {dimension_numbers = #tpu.dot_dimension_numbers<[1], [0], [0], [1], [0, 0, 1, 1], [], []>} : vector<4x128xf32>, vector<128x128xf32>, vector<4x128xf32> -> vector<4x128xf32>
    %236 = arith.addf %230, %235 : vector<4x128xf32>
    %c4096 = arith.constant 4096 : index
    %c0_171 = arith.constant 0 : index
    %237 = vector.load %arg4[%c4096, %c0_171] : memref<6272x128xf32, #tpu.memory_space<vmem>>, vector<128x128xf32>
    %c73_172 = arith.constant 73 : index
    %c0_173 = arith.constant 0 : index
    %238 = tpu.strided_load %arg7[%c73_172, %c0_173] {strides = array<i32: 4, 1>} : memref<176x128xf32, #tpu.memory_space<vmem>>, vector<2x128xf32>
    %c137 = arith.constant 137 : index
    %c0_174 = arith.constant 0 : index
    %239 = tpu.strided_load %arg7[%c137, %c0_174] {strides = array<i32: 4, 1>} : memref<176x128xf32, #tpu.memory_space<vmem>>, vector<2x128xf32>
    %240 = tpu.concatenate %238, %239 in 0 : vector<2x128xf32>, vector<2x128xf32> -> vector<4x128xf32>
    %cst_175 = arith.constant dense<0.000000e+00> : vector<4x128xf32>
    %241 = tpu.matmul %240, %237, %cst_175 {dimension_numbers = #tpu.dot_dimension_numbers<[1], [0], [0], [1], [0, 0, 1, 1], [], []>} : vector<4x128xf32>, vector<128x128xf32>, vector<4x128xf32> -> vector<4x128xf32>
    %242 = arith.addf %236, %241 : vector<4x128xf32>
    %c4224 = arith.constant 4224 : index
    %c0_176 = arith.constant 0 : index
    %243 = vector.load %arg4[%c4224, %c0_176] : memref<6272x128xf32, #tpu.memory_space<vmem>>, vector<128x128xf32>
    %c74_177 = arith.constant 74 : index
    %c0_178 = arith.constant 0 : index
    %244 = tpu.strided_load %arg7[%c74_177, %c0_178] {strides = array<i32: 4, 1>} : memref<176x128xf32, #tpu.memory_space<vmem>>, vector<2x128xf32>
    %c138 = arith.constant 138 : index
    %c0_179 = arith.constant 0 : index
    %245 = tpu.strided_load %arg7[%c138, %c0_179] {strides = array<i32: 4, 1>} : memref<176x128xf32, #tpu.memory_space<vmem>>, vector<2x128xf32>
    %246 = tpu.concatenate %244, %245 in 0 : vector<2x128xf32>, vector<2x128xf32> -> vector<4x128xf32>
    %cst_180 = arith.constant dense<0.000000e+00> : vector<4x128xf32>
    %247 = tpu.matmul %246, %243, %cst_180 {dimension_numbers = #tpu.dot_dimension_numbers<[1], [0], [0], [1], [0, 0, 1, 1], [], []>} : vector<4x128xf32>, vector<128x128xf32>, vector<4x128xf32> -> vector<4x128xf32>
    %248 = arith.addf %242, %247 : vector<4x128xf32>
    %c4352 = arith.constant 4352 : index
    %c0_181 = arith.constant 0 : index
    %249 = vector.load %arg4[%c4352, %c0_181] : memref<6272x128xf32, #tpu.memory_space<vmem>>, vector<128x128xf32>
    %c75_182 = arith.constant 75 : index
    %c0_183 = arith.constant 0 : index
    %250 = tpu.strided_load %arg7[%c75_182, %c0_183] {strides = array<i32: 4, 1>} : memref<176x128xf32, #tpu.memory_space<vmem>>, vector<2x128xf32>
    %c139 = arith.constant 139 : index
    %c0_184 = arith.constant 0 : index
    %251 = tpu.strided_load %arg7[%c139, %c0_184] {strides = array<i32: 4, 1>} : memref<176x128xf32, #tpu.memory_space<vmem>>, vector<2x128xf32>
    %252 = tpu.concatenate %250, %251 in 0 : vector<2x128xf32>, vector<2x128xf32> -> vector<4x128xf32>
    %cst_185 = arith.constant dense<0.000000e+00> : vector<4x128xf32>
    %253 = tpu.matmul %252, %249, %cst_185 {dimension_numbers = #tpu.dot_dimension_numbers<[1], [0], [0], [1], [0, 0, 1, 1], [], []>} : vector<4x128xf32>, vector<128x128xf32>, vector<4x128xf32> -> vector<4x128xf32>
    %254 = arith.addf %248, %253 : vector<4x128xf32>
    %c4480 = arith.constant 4480 : index
    %c0_186 = arith.constant 0 : index
    %255 = vector.load %arg4[%c4480, %c0_186] : memref<6272x128xf32, #tpu.memory_space<vmem>>, vector<128x128xf32>
    %c85_187 = arith.constant 85 : index
    %c0_188 = arith.constant 0 : index
    %256 = tpu.strided_load %arg7[%c85_187, %c0_188] {strides = array<i32: 4, 1>} : memref<176x128xf32, #tpu.memory_space<vmem>>, vector<2x128xf32>
    %c149 = arith.constant 149 : index
    %c0_189 = arith.constant 0 : index
    %257 = tpu.strided_load %arg7[%c149, %c0_189] {strides = array<i32: 4, 1>} : memref<176x128xf32, #tpu.memory_space<vmem>>, vector<2x128xf32>
    %258 = tpu.concatenate %256, %257 in 0 : vector<2x128xf32>, vector<2x128xf32> -> vector<4x128xf32>
    %cst_190 = arith.constant dense<0.000000e+00> : vector<4x128xf32>
    %259 = tpu.matmul %258, %255, %cst_190 {dimension_numbers = #tpu.dot_dimension_numbers<[1], [0], [0], [1], [0, 0, 1, 1], [], []>} : vector<4x128xf32>, vector<128x128xf32>, vector<4x128xf32> -> vector<4x128xf32>
    %260 = arith.addf %254, %259 : vector<4x128xf32>
    %c4608 = arith.constant 4608 : index
    %c0_191 = arith.constant 0 : index
    %261 = vector.load %arg4[%c4608, %c0_191] : memref<6272x128xf32, #tpu.memory_space<vmem>>, vector<128x128xf32>
    %c86_192 = arith.constant 86 : index
    %c0_193 = arith.constant 0 : index
    %262 = tpu.strided_load %arg7[%c86_192, %c0_193] {strides = array<i32: 4, 1>} : memref<176x128xf32, #tpu.memory_space<vmem>>, vector<2x128xf32>
    %c150 = arith.constant 150 : index
    %c0_194 = arith.constant 0 : index
    %263 = tpu.strided_load %arg7[%c150, %c0_194] {strides = array<i32: 4, 1>} : memref<176x128xf32, #tpu.memory_space<vmem>>, vector<2x128xf32>
    %264 = tpu.concatenate %262, %263 in 0 : vector<2x128xf32>, vector<2x128xf32> -> vector<4x128xf32>
    %cst_195 = arith.constant dense<0.000000e+00> : vector<4x128xf32>
    %265 = tpu.matmul %264, %261, %cst_195 {dimension_numbers = #tpu.dot_dimension_numbers<[1], [0], [0], [1], [0, 0, 1, 1], [], []>} : vector<4x128xf32>, vector<128x128xf32>, vector<4x128xf32> -> vector<4x128xf32>
    %266 = arith.addf %260, %265 : vector<4x128xf32>
    %c4736 = arith.constant 4736 : index
    %c0_196 = arith.constant 0 : index
    %267 = vector.load %arg4[%c4736, %c0_196] : memref<6272x128xf32, #tpu.memory_space<vmem>>, vector<128x128xf32>
    %c87_197 = arith.constant 87 : index
    %c0_198 = arith.constant 0 : index
    %268 = tpu.strided_load %arg7[%c87_197, %c0_198] {strides = array<i32: 4, 1>} : memref<176x128xf32, #tpu.memory_space<vmem>>, vector<2x128xf32>
    %c151 = arith.constant 151 : index
    %c0_199 = arith.constant 0 : index
    %269 = tpu.strided_load %arg7[%c151, %c0_199] {strides = array<i32: 4, 1>} : memref<176x128xf32, #tpu.memory_space<vmem>>, vector<2x128xf32>
    %270 = tpu.concatenate %268, %269 in 0 : vector<2x128xf32>, vector<2x128xf32> -> vector<4x128xf32>
    %cst_200 = arith.constant dense<0.000000e+00> : vector<4x128xf32>
    %271 = tpu.matmul %270, %267, %cst_200 {dimension_numbers = #tpu.dot_dimension_numbers<[1], [0], [0], [1], [0, 0, 1, 1], [], []>} : vector<4x128xf32>, vector<128x128xf32>, vector<4x128xf32> -> vector<4x128xf32>
    %272 = arith.addf %266, %271 : vector<4x128xf32>
    %c4864 = arith.constant 4864 : index
    %c0_201 = arith.constant 0 : index
    %273 = vector.load %arg4[%c4864, %c0_201] : memref<6272x128xf32, #tpu.memory_space<vmem>>, vector<128x128xf32>
    %c88_202 = arith.constant 88 : index
    %c0_203 = arith.constant 0 : index
    %274 = tpu.strided_load %arg7[%c88_202, %c0_203] {strides = array<i32: 4, 1>} : memref<176x128xf32, #tpu.memory_space<vmem>>, vector<2x128xf32>
    %c152_204 = arith.constant 152 : index
    %c0_205 = arith.constant 0 : index
    %275 = tpu.strided_load %arg7[%c152_204, %c0_205] {strides = array<i32: 4, 1>} : memref<176x128xf32, #tpu.memory_space<vmem>>, vector<2x128xf32>
    %276 = tpu.concatenate %274, %275 in 0 : vector<2x128xf32>, vector<2x128xf32> -> vector<4x128xf32>
    %cst_206 = arith.constant dense<0.000000e+00> : vector<4x128xf32>
    %277 = tpu.matmul %276, %273, %cst_206 {dimension_numbers = #tpu.dot_dimension_numbers<[1], [0], [0], [1], [0, 0, 1, 1], [], []>} : vector<4x128xf32>, vector<128x128xf32>, vector<4x128xf32> -> vector<4x128xf32>
    %278 = arith.addf %272, %277 : vector<4x128xf32>
    %c4992 = arith.constant 4992 : index
    %c0_207 = arith.constant 0 : index
    %279 = vector.load %arg4[%c4992, %c0_207] : memref<6272x128xf32, #tpu.memory_space<vmem>>, vector<128x128xf32>
    %c89_208 = arith.constant 89 : index
    %c0_209 = arith.constant 0 : index
    %280 = tpu.strided_load %arg7[%c89_208, %c0_209] {strides = array<i32: 4, 1>} : memref<176x128xf32, #tpu.memory_space<vmem>>, vector<2x128xf32>
    %c153 = arith.constant 153 : index
    %c0_210 = arith.constant 0 : index
    %281 = tpu.strided_load %arg7[%c153, %c0_210] {strides = array<i32: 4, 1>} : memref<176x128xf32, #tpu.memory_space<vmem>>, vector<2x128xf32>
    %282 = tpu.concatenate %280, %281 in 0 : vector<2x128xf32>, vector<2x128xf32> -> vector<4x128xf32>
    %cst_211 = arith.constant dense<0.000000e+00> : vector<4x128xf32>
    %283 = tpu.matmul %282, %279, %cst_211 {dimension_numbers = #tpu.dot_dimension_numbers<[1], [0], [0], [1], [0, 0, 1, 1], [], []>} : vector<4x128xf32>, vector<128x128xf32>, vector<4x128xf32> -> vector<4x128xf32>
    %284 = arith.addf %278, %283 : vector<4x128xf32>
    %c5120 = arith.constant 5120 : index
    %c0_212 = arith.constant 0 : index
    %285 = vector.load %arg4[%c5120, %c0_212] : memref<6272x128xf32, #tpu.memory_space<vmem>>, vector<128x128xf32>
    %c90_213 = arith.constant 90 : index
    %c0_214 = arith.constant 0 : index
    %286 = tpu.strided_load %arg7[%c90_213, %c0_214] {strides = array<i32: 4, 1>} : memref<176x128xf32, #tpu.memory_space<vmem>>, vector<2x128xf32>
    %c154 = arith.constant 154 : index
    %c0_215 = arith.constant 0 : index
    %287 = tpu.strided_load %arg7[%c154, %c0_215] {strides = array<i32: 4, 1>} : memref<176x128xf32, #tpu.memory_space<vmem>>, vector<2x128xf32>
    %288 = tpu.concatenate %286, %287 in 0 : vector<2x128xf32>, vector<2x128xf32> -> vector<4x128xf32>
    %cst_216 = arith.constant dense<0.000000e+00> : vector<4x128xf32>
    %289 = tpu.matmul %288, %285, %cst_216 {dimension_numbers = #tpu.dot_dimension_numbers<[1], [0], [0], [1], [0, 0, 1, 1], [], []>} : vector<4x128xf32>, vector<128x128xf32>, vector<4x128xf32> -> vector<4x128xf32>
    %290 = arith.addf %284, %289 : vector<4x128xf32>
    %c5248 = arith.constant 5248 : index
    %c0_217 = arith.constant 0 : index
    %291 = vector.load %arg4[%c5248, %c0_217] : memref<6272x128xf32, #tpu.memory_space<vmem>>, vector<128x128xf32>
    %c91_218 = arith.constant 91 : index
    %c0_219 = arith.constant 0 : index
    %292 = tpu.strided_load %arg7[%c91_218, %c0_219] {strides = array<i32: 4, 1>} : memref<176x128xf32, #tpu.memory_space<vmem>>, vector<2x128xf32>
    %c155 = arith.constant 155 : index
    %c0_220 = arith.constant 0 : index
    %293 = tpu.strided_load %arg7[%c155, %c0_220] {strides = array<i32: 4, 1>} : memref<176x128xf32, #tpu.memory_space<vmem>>, vector<2x128xf32>
    %294 = tpu.concatenate %292, %293 in 0 : vector<2x128xf32>, vector<2x128xf32> -> vector<4x128xf32>
    %cst_221 = arith.constant dense<0.000000e+00> : vector<4x128xf32>
    %295 = tpu.matmul %294, %291, %cst_221 {dimension_numbers = #tpu.dot_dimension_numbers<[1], [0], [0], [1], [0, 0, 1, 1], [], []>} : vector<4x128xf32>, vector<128x128xf32>, vector<4x128xf32> -> vector<4x128xf32>
    %296 = arith.addf %290, %295 : vector<4x128xf32>
    %c5376 = arith.constant 5376 : index
    %c0_222 = arith.constant 0 : index
    %297 = vector.load %arg4[%c5376, %c0_222] : memref<6272x128xf32, #tpu.memory_space<vmem>>, vector<128x128xf32>
    %c101_223 = arith.constant 101 : index
    %c0_224 = arith.constant 0 : index
    %298 = tpu.strided_load %arg7[%c101_223, %c0_224] {strides = array<i32: 4, 1>} : memref<176x128xf32, #tpu.memory_space<vmem>>, vector<2x128xf32>
    %c165 = arith.constant 165 : index
    %c0_225 = arith.constant 0 : index
    %299 = tpu.strided_load %arg7[%c165, %c0_225] {strides = array<i32: 4, 1>} : memref<176x128xf32, #tpu.memory_space<vmem>>, vector<2x128xf32>
    %300 = tpu.concatenate %298, %299 in 0 : vector<2x128xf32>, vector<2x128xf32> -> vector<4x128xf32>
    %cst_226 = arith.constant dense<0.000000e+00> : vector<4x128xf32>
    %301 = tpu.matmul %300, %297, %cst_226 {dimension_numbers = #tpu.dot_dimension_numbers<[1], [0], [0], [1], [0, 0, 1, 1], [], []>} : vector<4x128xf32>, vector<128x128xf32>, vector<4x128xf32> -> vector<4x128xf32>
    %302 = arith.addf %296, %301 : vector<4x128xf32>
    %c5504 = arith.constant 5504 : index
    %c0_227 = arith.constant 0 : index
    %303 = vector.load %arg4[%c5504, %c0_227] : memref<6272x128xf32, #tpu.memory_space<vmem>>, vector<128x128xf32>
    %c102_228 = arith.constant 102 : index
    %c0_229 = arith.constant 0 : index
    %304 = tpu.strided_load %arg7[%c102_228, %c0_229] {strides = array<i32: 4, 1>} : memref<176x128xf32, #tpu.memory_space<vmem>>, vector<2x128xf32>
    %c166 = arith.constant 166 : index
    %c0_230 = arith.constant 0 : index
    %305 = tpu.strided_load %arg7[%c166, %c0_230] {strides = array<i32: 4, 1>} : memref<176x128xf32, #tpu.memory_space<vmem>>, vector<2x128xf32>
    %306 = tpu.concatenate %304, %305 in 0 : vector<2x128xf32>, vector<2x128xf32> -> vector<4x128xf32>
    %cst_231 = arith.constant dense<0.000000e+00> : vector<4x128xf32>
    %307 = tpu.matmul %306, %303, %cst_231 {dimension_numbers = #tpu.dot_dimension_numbers<[1], [0], [0], [1], [0, 0, 1, 1], [], []>} : vector<4x128xf32>, vector<128x128xf32>, vector<4x128xf32> -> vector<4x128xf32>
    %308 = arith.addf %302, %307 : vector<4x128xf32>
    %c5632 = arith.constant 5632 : index
    %c0_232 = arith.constant 0 : index
    %309 = vector.load %arg4[%c5632, %c0_232] : memref<6272x128xf32, #tpu.memory_space<vmem>>, vector<128x128xf32>
    %c103_233 = arith.constant 103 : index
    %c0_234 = arith.constant 0 : index
    %310 = tpu.strided_load %arg7[%c103_233, %c0_234] {strides = array<i32: 4, 1>} : memref<176x128xf32, #tpu.memory_space<vmem>>, vector<2x128xf32>
    %c167 = arith.constant 167 : index
    %c0_235 = arith.constant 0 : index
    %311 = tpu.strided_load %arg7[%c167, %c0_235] {strides = array<i32: 4, 1>} : memref<176x128xf32, #tpu.memory_space<vmem>>, vector<2x128xf32>
    %312 = tpu.concatenate %310, %311 in 0 : vector<2x128xf32>, vector<2x128xf32> -> vector<4x128xf32>
    %cst_236 = arith.constant dense<0.000000e+00> : vector<4x128xf32>
    %313 = tpu.matmul %312, %309, %cst_236 {dimension_numbers = #tpu.dot_dimension_numbers<[1], [0], [0], [1], [0, 0, 1, 1], [], []>} : vector<4x128xf32>, vector<128x128xf32>, vector<4x128xf32> -> vector<4x128xf32>
    %314 = arith.addf %308, %313 : vector<4x128xf32>
    %c5760 = arith.constant 5760 : index
    %c0_237 = arith.constant 0 : index
    %315 = vector.load %arg4[%c5760, %c0_237] : memref<6272x128xf32, #tpu.memory_space<vmem>>, vector<128x128xf32>
    %c104_238 = arith.constant 104 : index
    %c0_239 = arith.constant 0 : index
    %316 = tpu.strided_load %arg7[%c104_238, %c0_239] {strides = array<i32: 4, 1>} : memref<176x128xf32, #tpu.memory_space<vmem>>, vector<2x128xf32>
    %c168_240 = arith.constant 168 : index
    %c0_241 = arith.constant 0 : index
    %317 = tpu.strided_load %arg7[%c168_240, %c0_241] {strides = array<i32: 4, 1>} : memref<176x128xf32, #tpu.memory_space<vmem>>, vector<2x128xf32>
    %318 = tpu.concatenate %316, %317 in 0 : vector<2x128xf32>, vector<2x128xf32> -> vector<4x128xf32>
    %cst_242 = arith.constant dense<0.000000e+00> : vector<4x128xf32>
    %319 = tpu.matmul %318, %315, %cst_242 {dimension_numbers = #tpu.dot_dimension_numbers<[1], [0], [0], [1], [0, 0, 1, 1], [], []>} : vector<4x128xf32>, vector<128x128xf32>, vector<4x128xf32> -> vector<4x128xf32>
    %320 = arith.addf %314, %319 : vector<4x128xf32>
    %c5888 = arith.constant 5888 : index
    %c0_243 = arith.constant 0 : index
    %321 = vector.load %arg4[%c5888, %c0_243] : memref<6272x128xf32, #tpu.memory_space<vmem>>, vector<128x128xf32>
    %c105_244 = arith.constant 105 : index
    %c0_245 = arith.constant 0 : index
    %322 = tpu.strided_load %arg7[%c105_244, %c0_245] {strides = array<i32: 4, 1>} : memref<176x128xf32, #tpu.memory_space<vmem>>, vector<2x128xf32>
    %c169 = arith.constant 169 : index
    %c0_246 = arith.constant 0 : index
    %323 = tpu.strided_load %arg7[%c169, %c0_246] {strides = array<i32: 4, 1>} : memref<176x128xf32, #tpu.memory_space<vmem>>, vector<2x128xf32>
    %324 = tpu.concatenate %322, %323 in 0 : vector<2x128xf32>, vector<2x128xf32> -> vector<4x128xf32>
    %cst_247 = arith.constant dense<0.000000e+00> : vector<4x128xf32>
    %325 = tpu.matmul %324, %321, %cst_247 {dimension_numbers = #tpu.dot_dimension_numbers<[1], [0], [0], [1], [0, 0, 1, 1], [], []>} : vector<4x128xf32>, vector<128x128xf32>, vector<4x128xf32> -> vector<4x128xf32>
    %326 = arith.addf %320, %325 : vector<4x128xf32>
    %c6016 = arith.constant 6016 : index
    %c0_248 = arith.constant 0 : index
    %327 = vector.load %arg4[%c6016, %c0_248] : memref<6272x128xf32, #tpu.memory_space<vmem>>, vector<128x128xf32>
    %c106_249 = arith.constant 106 : index
    %c0_250 = arith.constant 0 : index
    %328 = tpu.strided_load %arg7[%c106_249, %c0_250] {strides = array<i32: 4, 1>} : memref<176x128xf32, #tpu.memory_space<vmem>>, vector<2x128xf32>
    %c170 = arith.constant 170 : index
    %c0_251 = arith.constant 0 : index
    %329 = tpu.strided_load %arg7[%c170, %c0_251] {strides = array<i32: 4, 1>} : memref<176x128xf32, #tpu.memory_space<vmem>>, vector<2x128xf32>
    %330 = tpu.concatenate %328, %329 in 0 : vector<2x128xf32>, vector<2x128xf32> -> vector<4x128xf32>
    %cst_252 = arith.constant dense<0.000000e+00> : vector<4x128xf32>
    %331 = tpu.matmul %330, %327, %cst_252 {dimension_numbers = #tpu.dot_dimension_numbers<[1], [0], [0], [1], [0, 0, 1, 1], [], []>} : vector<4x128xf32>, vector<128x128xf32>, vector<4x128xf32> -> vector<4x128xf32>
    %332 = arith.addf %326, %331 : vector<4x128xf32>
    %c6144 = arith.constant 6144 : index
    %c0_253 = arith.constant 0 : index
    %333 = vector.load %arg4[%c6144, %c0_253] : memref<6272x128xf32, #tpu.memory_space<vmem>>, vector<128x128xf32>
    %c107_254 = arith.constant 107 : index
    %c0_255 = arith.constant 0 : index
    %334 = tpu.strided_load %arg7[%c107_254, %c0_255] {strides = array<i32: 4, 1>} : memref<176x128xf32, #tpu.memory_space<vmem>>, vector<2x128xf32>
    %c171 = arith.constant 171 : index
    %c0_256 = arith.constant 0 : index
    %335 = tpu.strided_load %arg7[%c171, %c0_256] {strides = array<i32: 4, 1>} : memref<176x128xf32, #tpu.memory_space<vmem>>, vector<2x128xf32>
    %336 = tpu.concatenate %334, %335 in 0 : vector<2x128xf32>, vector<2x128xf32> -> vector<4x128xf32>
    %cst_257 = arith.constant dense<0.000000e+00> : vector<4x128xf32>
    %337 = tpu.matmul %336, %333, %cst_257 {dimension_numbers = #tpu.dot_dimension_numbers<[1], [0], [0], [1], [0, 0, 1, 1], [], []>} : vector<4x128xf32>, vector<128x128xf32>, vector<4x128xf32> -> vector<4x128xf32>
    %338 = arith.addf %332, %337 : vector<4x128xf32>
    %c0_258 = arith.constant 0 : index
    %c0_259 = arith.constant 0 : index
    %c0_260 = arith.constant 0 : index
    %339 = vector.load %arg6[%c0_258, %c0_259, %c0_260] : memref<1x4x128xf32, #tpu.memory_space<vmem>>, vector<1x4x128xf32>
    %340 = vector.shape_cast %339 : vector<1x4x128xf32> to vector<4x128xf32>
    %341 = vector.shape_cast %338 : vector<4x128xf32> to vector<1x4x128xf32>
    tpu.vector_store %arg6[%c0_258, %c0_259, %c0_260], %341 {strides = array<i32>} : memref<1x4x128xf32, #tpu.memory_space<vmem>>, vector<1x4x128xf32>,
    return
  }
  func.func @transform_0(%arg0: i32) -> (i32, i32) {
    %c0_i32 = arith.constant 0 : i32
    %c0_i32_0 = arith.constant 0 : i32
    return %arg0, %c0_i32 : i32, i32
  }
  func.func @transform_1(%arg0: i32) -> (i32, i32) {
    %c0_i32 = arith.constant 0 : i32
    %c0_i32_0 = arith.constant 0 : i32
    %c0_i32_1 = arith.constant 0 : i32
    return %c0_i32, %c0_i32_0 : i32, i32
  }
  func.func @transform_2(%arg0: i32) -> (i32, i32) {
    %c0_i32 = arith.constant 0 : i32
    %c0_i32_0 = arith.constant 0 : i32
    %c0_i32_1 = arith.constant 0 : i32
    return %c0_i32, %c0_i32_0 : i32, i32
  }
  func.func @transform_3(%arg0: i32) -> (i32, i32) {
    %c0_i32 = arith.constant 0 : i32
    %c0_i32_0 = arith.constant 0 : i32
    %c0_i32_1 = arith.constant 0 : i32
    return %c0_i32, %c0_i32_0 : i32, i32
  }
  func.func @transform_4(%arg0: i32) -> (i32, i32) {
    %c0_i32 = arith.constant 0 : i32
    %c0_i32_0 = arith.constant 0 : i32
    %c0_i32_1 = arith.constant 0 : i32
    return %c0_i32, %c0_i32_0 : i32, i32
  }
  func.func @transform_5(%arg0: i32) -> (i32, i32, i32) {
    %c0_i32 = arith.constant 0 : i32
    %c0_i32_0 = arith.constant 0 : i32
    %c0_i32_1 = arith.constant 0 : i32
    return %arg0, %c0_i32, %c0_i32_0 : i32, i32, i32
  }
}

</mosaic_0001>

<bundles_post_ra>
// kernel: img_head_forward.1
= control target key start
LH: loop header
LB: loop body
LE: loop exit
PB: predicated region body
PF: predicated region fallthrough
CT: control target
= control target key end

     0   :  { %10 = vsyncpa [#allocation4], 0  ;;  %s11527_s0 = inlined_call_operand.vmem [shape: f32[128,256], index: 0, kind: input, shape index: {}]   ;;  %s11528_s1 = inlined_call_operand.vmem [shape: f32[256,128], index: 1, kind: input, shape index: {}]   ;;  %s11529_s2 = inlined_call_operand.vmem [shape: f32[1,128], index: 2, kind: input, shape index: {}]   ;;  %s11530_s3 = inlined_call_operand.vmem [shape: f32[6272,128], index: 3, kind: input, shape index: {}]   ;;  %s11531_s4 = inlined_call_operand.vmem [shape: f32[1,128], index: 4, kind: input, shape index: {}]   ;;  %s11532_s5 = inlined_call_operand.hbm [shape: f32[2,4,128], index: 5, kind: output, shape index: {}]  }
   0x1   :  { %12 = vsyncpa [#allocation4 + $0x1], 0  ;;  %s7944_s18 = smov 0   ;;  %s7946_s19 = smov 0  }
   0x2   :  { %s7948_s20 = smov 0   ;;  %s7950_s21 = smov 0  }
   0x3 LB: > { %s7965_s22 = sadd.s32 4294967295, %s7909_s21   ;;  %s5147_s23 = sadd.s32 4294967294, %s7909_s21   ;;  %s7909_s21 = sphi %s7950_s21, %s11538_s21   ;;  %s7905_s20 = sphi %s7948_s20, %s11537_s20   ;;  %s7901_s19 = sphi %s7946_s19, %s11536_s19   ;;  %s7897_s18 = sphi %s7944_s18, %s11535_s18  }
   0x4   : > { %s7969_s24 = sadd.s32 1, %s7909_s21   ;;  %s135_s25 = sadd.s32 1, %s7905_s20 }
   0x5   : > { %s132_s26 = ssub.s32 %s7909_s21, %s7969_s24  ;;  %p145_p0 = scmp.ne.s32.totalorder %s7905_s20, %s7901_s19 }
   0x6   : > { %p133_p1 = scmp.eq.s32.totalorder %s132_s26, 0  ;;  %p146_p2 = scmp.eq.s32.totalorder %s7965_s22, 1 }
   0x7   : > { %p151_p3 = scmp.ne.s32.totalorder %s7901_s19, %s7897_s18  ;;  %p152_p4 = scmp.eq.s32.totalorder %s5147_s23, 1 }
   0x8   : > { %s7980_s27 = scalar_select %p133_p1, %s7905_s20, %s135_s25  }
   0x9   : > { %p7982_p5 = por %p146_p2, %p145_p0  ;;  %p7986_p6 = por %p152_p4, %p151_p3 }
   0xa   : > { %p5150_p7 = scmp.ge.s32.totalorder %s7909_s21, 1  ;;  %p192_p8 = scmp.lt.s32.totalorder %s7909_s21, 3 }
   0xc   : > { %p193_p9 = pnand %p5150_p7, %p192_p8 }
   0xd   : > { %s5152_s11 = sshll.u32 (!%p193_p9), %s7965_s22, 3  ;;  %s5158_s25 = sshll.u32 (!%p193_p9), %s7965_s22, 6 }
   0xe   : > { %196 = sbr.rel (%p193_p9) target bundleno = 1308 (0x51c), region = 40  ;;  %p222_p10 = scmp.lt.s32.totalorder (!%p193_p9), %s5152_s11, 15 }
   0xf   : > { %s11492_s8 = scalar_lea.hbm (!%p193_p9), %s11532_s5, %s5158_s25  ;;  %s7913_s22 = smov (!%p193_p9), [#allocation3]  }
  0x10   : > { %s7853_s12 = sshll.u32 (!%p193_p9), %s7913_s22, 4  ;;  %s7854_s12 = int_to_ptr.vmem [resolvable:$false] %s7853_s12 }
  0x11   : > { %s7855_s13 = scalar_lea.vmem (!%p193_p9), %s7854_s12, 128 }
  0x13   : > { %v275_v0 = vld [vmem:[%s11528_s1 + $0xf8] sm:$0xff]  ;;  %v274_v2 = vld [vmem:[%s11528_s1 + $0xf0] sm:$0xff]  ;;  %v273_v4 = vld [vmem:[%s11528_s1 + $0xe8] sm:$0xff]  ;;  %s11540_s11 = smov (!%p222_p10, %s5152_s11), 15  ;;  %v7911_v46 = vmov 0.0   ;;  %vm7912_vm0 = vmmov 0  }
  0x14   : > { %v259_v1 = vld [vmem:[%s11528_s1 + $0x78] sm:$0xff]  ;;  %5162 = vmatprep.subr.mxu0 %v275_v0  ;;  %v258_v3 = vld [vmem:[%s11528_s1 + $0x70] sm:$0xff]  ;;  %v257_v5 = vld [vmem:[%s11528_s1 + $0x68] sm:$0xff]  ;;  %s5161_s6 = sshll.u32 %s11540_s11, 4  ;;  %6051 = vmatprep.subr.mxu1 %v7911_v46  ;;  %428 = vst [vmem:[#allocation2] sm:$0xff] %v7911_v46  ;;  %vm482_vm1 = vcmask 1041408  }
  0x15   : > { %5163 = vmatpush3.msra.mxu0 %v259_v1  ;;  %v272_v6 = vld [vmem:[%s11528_s1 + $0xe0] sm:$0xff]  ;;  %v271_v8 = vld [vmem:[%s11528_s1 + $0xd8] sm:$0xff]  ;;  %s8026_s14 = scalar_lea.vmem %s11527_s0, %s5161_s6  ;;  %v270_v10 = vld [vmem:[%s11528_s1 + $0xd0] sm:$0xff]  ;;  %429 = vst [vmem:[#allocation2 + $0x8] sm:$0xff] %v7911_v46  ;;  %6083 = vmatprep.mubr.msk.f32.mxu1 %vm7912_vm0, %v7911_v46 }
  0x16   : > { %5164 = vmatprep.subr.mxu0 %v274_v2  ;;  %v256_v7 = vld [vmem:[%s11528_s1 + $0x60] sm:$0xff]  ;;  %v255_v9 = vld [vmem:[%s11528_s1 + $0x58] sm:$0xff]  ;;  %v254_v11 = vld [vmem:[%s11528_s1 + $0x50] sm:$0xff]  ;;  %430 = vst [vmem:[#allocation2 + $0x10] sm:$0xff] %v7911_v46 }
  0x17   : > { %5165 = vmatpush3.msra.mxu0 %v258_v3  ;;  %v269_v12 = vld [vmem:[%s11528_s1 + $0xc8] sm:$0xff]  ;;  %v268_v15 = vld [vmem:[%s11528_s1 + $0xc0] sm:$0xff]  ;;  %v267_v17 = vld [vmem:[%s11528_s1 + $0xb8] sm:$0xff]  ;;  %431 = vst [vmem:[#allocation2 + $0x18] sm:$0xff] %v7911_v46 }
  0x18   : > { %5166 = vmatprep.subr.mxu0 %v273_v4  ;;  %v229_v13 = vld [vmem:[%s8026_s14 + $0x8] sm:$0xff]  ;;  %v252_v16 = vld [vmem:[%s11528_s1 + $0x40] sm:$0xff]  ;;  %v251_v18 = vld [vmem:[%s11528_s1 + $0x38] sm:$0xff]  ;;  %432 = vst [vmem:[#allocation2 + $0x20] sm:$0xff] %v7911_v46 }
  0x19   : > { %5167 = vmatpush3.msra.mxu0 %v257_v5  ;;  %v253_v14 = vld [vmem:[%s11528_s1 + $0x48] sm:$0xff]  ;;  %347 = vmatprep.mubr.f32.mxu0 %v229_v13  ;;  %v266_v19 = vld [vmem:[%s11528_s1 + $0xb0] sm:$0xff]  ;;  %v264_v23 = vld [vmem:[%s11528_s1 + $0xa0] sm:$0xff]  ;;  %433 = vst [vmem:[#allocation2 + $0x28] sm:$0xff] %v7911_v46 }
  0x1a   : > { %5168 = vmatprep.subr.mxu0 %v272_v6  ;;  %v250_v20 = vld [vmem:[%s11528_s1 + $0x30] sm:$0xff]  ;;  %v265_v21 = vld [vmem:[%s11528_s1 + $0xa8] sm:$0xff]  ;;  %v248_v24 = vld [vmem:[%s11528_s1 + $0x20] sm:$0xff]  ;;  %436 = vst [vmem:[#allocation2 + $0x40] sm:$0xff] %v7911_v46 }
  0x1b   : > { %5169 = vmatpush3.msra.mxu0 %v256_v7  ;;  %v249_v22 = vld [vmem:[%s11528_s1 + $0x28] sm:$0xff]  ;;  %v263_v25 = vld [vmem:[%s11528_s1 + $0x98] sm:$0xff]  ;;  %v262_v27 = vld [vmem:[%s11528_s1 + $0x90] sm:$0xff]  ;;  %437 = vst [vmem:[#allocation2 + $0x50] sm:$0xff] %v7911_v46 }
  0x1c   : > { %5170 = vmatprep.subr.mxu0 %v271_v8  ;;  %v247_v26 = vld [vmem:[%s11528_s1 + $0x18] sm:$0xff]  ;;  %v246_v28 = vld [vmem:[%s11528_s1 + $0x10] sm:$0xff]  ;;  %v261_v29 = vld [vmem:[%s11528_s1 + $0x88] sm:$0xff]  ;;  %438 = vst [vmem:[#allocation2 + $0x60] sm:$0xff] %v7911_v46 }
  0x1d   : > { %5171 = vmatpush3.msra.mxu0 %v255_v9  ;;  %v245_v30 = vld [vmem:[%s11528_s1 + $0x8] sm:$0xff]  ;;  %v260_v31 = vld [vmem:[%s11528_s1 + $0x80] sm:$0xff]  ;;  %v231_v34 = vld [vmem:[%s8026_s14 + $0x18] sm:$0xff]  ;;  %439 = vst [vmem:[#allocation2 + $0x70] sm:$0xff] %v7911_v46 }
  0x1e   : > { %5172 = vmatprep.subr.mxu0 %v270_v10  ;;  %v244_v32 = vld [vmem:[%s11528_s1] sm:$0xff]  ;;  %v230_v35 = vld [vmem:[%s8026_s14 + $0x10] sm:$0xff]  ;;  %v233_v36 = vld [vmem:[%s8026_s14 + $0x28] sm:$0xff]  ;;  %440 = vst [vmem:[#allocation2 + $0x80] sm:$0xff] %v7911_v46 }
  0x1f   : > { %5173 = vmatpush3.msra.mxu0 %v254_v11  ;;  %v228_v33 = vld [vmem:[%s8026_s14] sm:$0xff]  ;;  %v235_v38 = vld [vmem:[%s8026_s14 + $0x38] sm:$0xff]  ;;  %v234_v39 = vld [vmem:[%s8026_s14 + $0x30] sm:$0xff]  ;;  %441 = vst [vmem:[#allocation2 + $0x90] sm:$0xff] %v7911_v46 }
  0x20   : > { %5174 = vmatprep.subr.mxu0 %v269_v12  ;;  %v232_v37 = vld [vmem:[%s8026_s14 + $0x20] sm:$0xff]  ;;  %v237_v40 = vld [vmem:[%s8026_s14 + $0x48] sm:$0xff]  ;;  %v239_v42 = vld [vmem:[%s8026_s14 + $0x58] sm:$0xff]  ;;  %442 = vst [vmem:[#allocation2 + $0xa0] sm:$0xff] %v7911_v46 }
  0x21   : > { %5175 = vmatpush3.msra.mxu0 %v253_v14  ;;  %v236_v41 = vld [vmem:[%s8026_s14 + $0x40] sm:$0xff]  ;;  %v238_v43 = vld [vmem:[%s8026_s14 + $0x50] sm:$0xff]  ;;  %v241_v44 = vld [vmem:[%s8026_s14 + $0x68] sm:$0xff]  ;;  %435 = vst [vmem:[#allocation2 + $0x30] sm:$0xff] %v7911_v46 }
  0x22   : > { %5176 = vmatprep.subr.mxu0 %v268_v15  ;;  %v240_v45 = vld [vmem:[%s8026_s14 + $0x60] sm:$0xff]  ;;  %v474_v47 = vld [vmem:[%s11530_s3 + $0x78] sm:$0xff]  ;;  %v473_v49 = vld [vmem:[%s11530_s3 + $0x70] sm:$0xff] }
  0x23   : > { %5177 = vmatpush3.msra.mxu0 %v252_v16  ;;  %v570_v48 = vld [vmem:[%s11530_s3 + $0xf8] sm:$0xff]  ;;  %6052 = vmatpush3.msra.mxu1 %v474_v47  ;;  %v569_v50 = vld [vmem:[%s11530_s3 + $0xf0] sm:$0xff]  ;;  %v472_v51 = vld [vmem:[%s11530_s3 + $0x68] sm:$0xff] }
  0x24   : > { %5178 = vmatprep.subr.mxu0 %v267_v17  ;;  %6053 = vmatprep.subr.mxu1 %v7911_v46  ;;  %v568_v52 = vld [vmem:[%s11530_s3 + $0xe8] sm:$0xff]  ;;  %v243_v53 = vld [vmem:[%s8026_s14 + $0x78] sm:$0xff]  ;;  %v242_v54 = vld [vmem:[%s8026_s14 + $0x70] sm:$0xff]  ;;  %s218_s14 = sand.u32 1, %s7901_s19  }
  0x25   : > { %5179 = vmatpush3.msra.mxu0 %v251_v18  ;;  %6054 = vmatpush3.msra.mxu1 %v473_v49  ;;  %v471_v55 = vld [vmem:[%s11530_s3 + $0x60] sm:$0xff]  ;;  %v470_v57 = vld [vmem:[%s11530_s3 + $0x58] sm:$0xff]  ;;  %v469_v59 = vld [vmem:[%s11530_s3 + $0x50] sm:$0xff]  ;;  %s5151_s23 = sshll.u32 %s218_s14, 2  ;;  %s5075_s9 = scalar_lea.sflag [#allocation4], %s218_s14 }
  0x26   : > { %5180 = vmatprep.subr.mxu0 %v266_v19  ;;  %6055 = vmatprep.subr.mxu1 %v7911_v46  ;;  %v567_v56 = vld [vmem:[%s11530_s3 + $0xe0] sm:$0xff]  ;;  %v566_v58 = vld [vmem:[%s11530_s3 + $0xd8] sm:$0xff]  ;;  %v565_v60 = vld [vmem:[%s11530_s3 + $0xd0] sm:$0xff]  ;;  %s220_s26 = scalar_lea.vmem [#allocation3], %s5151_s23 }
  0x27   : > { %5181 = vmatpush3.msra.mxu0 %v250_v20  ;;  %6056 = vmatpush3.msra.mxu1 %v472_v51  ;;  %v468_v61 = vld [vmem:[%s11530_s3 + $0x48] sm:$0xff]  ;;  %v467_v63 = vld [vmem:[%s11530_s3 + $0x40] sm:$0xff]  ;;  %v466_v1 = vld [vmem:[%s11530_s3 + $0x38] sm:$0xff]  ;;  %s5088_s30 = sshll.u32 %s220_s26, 4  ;;  %s5089_s30 = int_to_ptr.vmem [resolvable:$true] %s5088_s30 }
  0x28   : > { %5182 = vmatprep.subr.mxu0 %v265_v21  ;;  %6057 = vmatprep.subr.mxu1 %v7911_v46  ;;  %v564_v62 = vld [vmem:[%s11530_s3 + $0xc8] sm:$0xff]  ;;  %v563_v0 = vld [vmem:[%s11530_s3 + $0xc0] sm:$0xff]  ;;  %v562_v2 = vld [vmem:[%s11530_s3 + $0xb8] sm:$0xff]  ;;  %s7849_s10 = scalar_lea.vmem %s5089_s30, 64  ;;  %p7856_p0 = scmp.lt.s32.totalorder %s5089_s30, %s7854_s12 }
  0x29   : > { %5183 = vmatpush3.msra.mxu0 %v249_v22  ;;  %6058 = vmatpush3.msra.mxu1 %v471_v55  ;;  %v465_v3 = vld [vmem:[%s11530_s3 + $0x30] sm:$0xff]  ;;  %v464_v5 = vld [vmem:[%s11530_s3 + $0x28] sm:$0xff]  ;;  %v463_v7 = vld [vmem:[%s11530_s3 + $0x20] sm:$0xff]  ;;  %p7850_p11 = scmp.ne.s32.totalorder %s5089_s30, %s7849_s10  ;;  %p7857_p1 = scmp.lt.s32.totalorder %s7855_s13, %s7849_s10 }
  0x2a   : > { %5184 = vmatprep.subr.mxu0 %v264_v23  ;;  %6059 = vmatprep.subr.mxu1 %v7911_v46  ;;  %v561_v4 = vld [vmem:[%s11530_s3 + $0xb0] sm:$0xff]  ;;  %v560_v6 = vld [vmem:[%s11530_s3 + $0xa8] sm:$0xff]  ;;  %v559_v8 = vld [vmem:[%s11530_s3 + $0xa0] sm:$0xff] }
  0x2b   : > { %5185 = vmatpush3.msra.mxu0 %v248_v24  ;;  %6060 = vmatpush3.msra.mxu1 %v470_v57  ;;  %v462_v9 = vld [vmem:[%s11530_s3 + $0x18] sm:$0xff]  ;;  %v461_v11 = vld [vmem:[%s11530_s3 + $0x10] sm:$0xff]  ;;  %v460_v13 = vld [vmem:[%s11530_s3 + $0x8] sm:$0xff]  ;;  %p7851_p12 = pnand %p7850_p11, %p7982_p5  ;;  %p7858_p2 = por %p7857_p1, %p7856_p0 }
  0x2c   : > { %5186 = vmatprep.subr.mxu0 %v263_v25  ;;  %6061 = vmatprep.subr.mxu1 %v7911_v46  ;;  %v558_v10 = vld [vmem:[%s11530_s3 + $0x98] sm:$0xff]  ;;  %v557_v12 = vld [vmem:[%s11530_s3 + $0x90] sm:$0xff]  ;;  %v556_v14 = vld [vmem:[%s11530_s3 + $0x88] sm:$0xff] }
  0x2d   : > { %5187 = vmatpush3.msra.mxu0 %v247_v26  ;;  %6062 = vmatpush3.msra.mxu1 %v469_v59  ;;  %v459_v15 = vld [vmem:[%s11530_s3] sm:$0xff]  ;;  %p7852_p13 = pneg %p7851_p12 }
  0x2e   : > { %5188 = vmatprep.subr.mxu0 %v262_v27  ;;  %6063 = vmatprep.subr.mxu1 %v7911_v46  ;;  %v555_v16 = vld [vmem:[%s11530_s3 + $0x80] sm:$0xff] }
  0x2f   : > { %5189 = vmatpush3.msra.mxu0 %v246_v28  ;;  %6064 = vmatpush3.msra.mxu1 %v468_v61  ;;  %v8261_v18 = vld [vmem:[%s11529_s2] ss:$0 sm:$0xff]  ;;  %p7859_p3 = pnand %p7858_p2, %p7852_p13 }
  0x30   : > { %5190 = vmatprep.subr.mxu0 %v261_v29  ;;  %6065 = vmatprep.subr.mxu1 %v7911_v46 }
  0x31   : > { %5191 = vmatpush3.msra.mxu0 %v245_v30  ;;  %6066 = vmatpush3.msra.mxu1 %v467_v63 }
  0x32   : > { %5192 = vmatprep.subr.mxu0 %v260_v31  ;;  %6067 = vmatprep.subr.mxu1 %v7911_v46 }
  0x33   : > { %5193 = vmatpush3.msra.mxu0 %v244_v32  ;;  %6068 = vmatpush3.msra.mxu1 %v466_v1 }
  0x34   : > { %348 = vmatmul.mubr.f32.vlgmr.msra.gmra.mxu0 %v228_v33  ;;  %6086 = vmatprep.subr.mxu0 %v7911_v46 }
  0x35   : > { %352 = vmatprep.mubr.f32.mxu0 %v231_v34  ;;  %6087 = vmatpush3.msra.mxu0 %v570_v48 }
  0x36   : > { %6088 = vmatprep.subr.mxu0 %v7911_v46  ;;  %6069 = vmatprep.subr.mxu1 %v7911_v46 }
  0x37   : > { %6089 = vmatpush3.msra.mxu0 %v569_v50  ;;  %6070 = vmatpush3.msra.mxu1 %v465_v3 }
  0x38   : > { %353 = vmatmul.mubr.f32.gmra.mxu0 %v230_v35  ;;  %6090 = vmatprep.subr.mxu0 %v7911_v46 }
  0x39   : > { %357 = vmatprep.mubr.f32.mxu0 %v233_v36  ;;  %6091 = vmatpush3.msra.mxu0 %v568_v52 }
  0x3a   : > { %6092 = vmatprep.subr.mxu0 %v7911_v46  ;;  %6071 = vmatprep.subr.mxu1 %v7911_v46 }
  0x3b   : > { %6093 = vmatpush3.msra.mxu0 %v567_v56  ;;  %6072 = vmatpush3.msra.mxu1 %v464_v5  ;;  %v476_v5 = vld [vmem:[#allocation2 + $0x5] ss:$4 sm:$0x3] }
  0x3c   : > { %358 = vmatmul.mubr.f32.gmra.mxu0 %v232_v37  ;;  %6094 = vmatprep.subr.mxu0 %v7911_v46 }
  0x3d   : > { %362 = vmatprep.mubr.f32.mxu0 %v235_v38  ;;  %6095 = vmatpush3.msra.mxu0 %v566_v58 }
  0x3e   : > { %6096 = vmatprep.subr.mxu0 %v7911_v46  ;;  %6073 = vmatprep.subr.mxu1 %v7911_v46 }
  0x3f   : > { %6097 = vmatpush3.msra.mxu0 %v565_v60  ;;  %6074 = vmatpush3.msra.mxu1 %v463_v7 }
  0x40   : > { %363 = vmatmul.mubr.f32.gmra.mxu0 %v234_v39  ;;  %6098 = vmatprep.subr.mxu0 %v7911_v46 }
  0x41   : > { %367 = vmatprep.mubr.f32.mxu0 %v237_v40  ;;  %6099 = vmatpush3.msra.mxu0 %v564_v62 }
  0x42   : > { %6100 = vmatprep.subr.mxu0 %v7911_v46  ;;  %6075 = vmatprep.subr.mxu1 %v7911_v46 }
  0x43   : > { %6101 = vmatpush3.msra.mxu0 %v563_v0  ;;  %6076 = vmatpush3.msra.mxu1 %v462_v9 }
  0x44   : > { %368 = vmatmul.mubr.f32.gmra.mxu0 %v236_v41  ;;  %6102 = vmatprep.subr.mxu0 %v7911_v46 }
  0x45   : > { %372 = vmatprep.mubr.f32.mxu0 %v239_v42  ;;  %6103 = vmatpush3.msra.mxu0 %v562_v2 }
  0x46   : > { %6104 = vmatprep.subr.mxu0 %v7911_v46  ;;  %6077 = vmatprep.subr.mxu1 %v7911_v46 }
  0x47   : > { %6105 = vmatpush3.msra.mxu0 %v561_v4  ;;  %6078 = vmatpush3.msra.mxu1 %v461_v11 }
  0x48   : > { %373 = vmatmul.mubr.f32.gmra.mxu0 %v238_v43  ;;  %6106 = vmatprep.subr.mxu0 %v7911_v46 }
  0x49   : > { %377 = vmatprep.mubr.f32.mxu0 %v241_v44  ;;  %6107 = vmatpush3.msra.mxu0 %v560_v6 }
  0x4a   : > { %6108 = vmatprep.subr.mxu0 %v7911_v46  ;;  %6079 = vmatprep.subr.mxu1 %v7911_v46 }
  0x4b   : > { %6109 = vmatpush3.msra.mxu0 %v559_v8  ;;  %6080 = vmatpush3.msra.mxu1 %v460_v13  ;;  %v572_v8 = vld [vmem:[#allocation2 + $0x6] ss:$4 sm:$0x3] }
  0x4c   : > { %378 = vmatmul.mubr.f32.gmra.mxu0 %v240_v45  ;;  %6110 = vmatprep.subr.mxu0 %v7911_v46 }
  0x4d   : > { %382 = vmatprep.mubr.f32.mxu0 %v243_v53  ;;  %6111 = vmatpush3.msra.mxu0 %v558_v10 }
  0x4e   : > { %6112 = vmatprep.subr.mxu0 %v7911_v46  ;;  %6081 = vmatprep.subr.mxu1 %v7911_v46 }
  0x4f   : > { %6113 = vmatpush3.msra.mxu0 %v557_v12  ;;  %6082 = vmatpush3.msra.mxu1 %v459_v15  ;;  %v665_v15 = vld [vmem:[%s11530_s3 + $0x178] sm:$0xff] }
  0x50   : > { %383 = vmatmul.mubr.f32.gmra.mxu0 %v242_v54  ;;  %6114 = vmatprep.subr.mxu0 %v7911_v46 }
  0x51   : > { %6115 = vmatpush3.msra.mxu0 %v556_v14  ;;  %6118 = vmatprep.mubr.msk.f32.mxu0 %vm7912_vm0, %v7911_v46 }
  0x52   : > { %6116 = vmatprep.subr.mxu0 %v7911_v46  ;;  %6121 = vmatprep.subr.mxu1 %v7911_v46 }
  0x53   : > { %6117 = vmatpush3.msra.mxu0 %v555_v16  ;;  %v760_v16 = vld [vmem:[%s11530_s3 + $0x1f8] sm:$0xff] }
  0x54   : > { %6156 = vmatprep.subr.mxu0 %v7911_v46 }
  0xf4   : > { %v5194_v17 = vpop.f32.mrf.mxu0 }
  0xf6   : > { %v5195_v19 = vpop.f32.mrf.mxu0 }
  0xf7   : > { %v5196_v20 = vadd.f32 %v5195_v19, %v5194_v17 }
  0xf8   : > { %v5197_v21 = vpop.f32.mrf.mxu0 }
  0xf9   : > { %v350_v22 = vadd.f32 %v5196_v20, %v8261_v18 }
  0xfa   : > { %v5198_v23 = vpop.f32.mrf.mxu0 }
  0xfb   : > { %v396_v24 = vmul.f32 0.70710677, %v350_v22  ;;  %v5199_v25 = vadd.f32 %v5198_v23, %v5197_v21  ;;  %v388_v45 = vmul.f32 0.5, %v350_v22  ;;  %v664_v23 = vld [vmem:[%s11530_s3 + $0x170] sm:$0xff] }
  0xfc   : > { %v5200_v26 = vpop.f32.mrf.mxu0 }
  0xfd   : > { %7807 = verf.f32 %v396_v24  ;;  %v355_v27 = vadd.f32 %v5199_v25, %v8261_v18  ;;  %v759_v24 = vld [vmem:[%s11530_s3 + $0x1f0] sm:$0xff] }
  0xfe   : > { %v5201_v28 = vpop.f32.mrf.mxu0 }
  0xff   : > { %v397_v29 = vmul.f32 0.70710677, %v355_v27  ;;  %v5202_v30 = vadd.f32 %v5201_v28, %v5200_v26  ;;  %v389_v55 = vmul.f32 0.5, %v355_v27  ;;  %v663_v26 = vld [vmem:[%s11530_s3 + $0x168] sm:$0xff] }
 0x100   : > { %v5203_v31 = vpop.f32.mrf.mxu0  ;;  %v758_v27 = vld [vmem:[%s11530_s3 + $0x1e8] sm:$0xff] }
 0x101   : > { %7809 = verf.f32 %v397_v29  ;;  %v360_v32 = vadd.f32 %v5202_v30, %v8261_v18 }
 0x102   : > { %v5204_v33 = vpop.f32.mrf.mxu0 }
 0x103   : > { %v398_v34 = vmul.f32 0.70710677, %v360_v32  ;;  %v5205_v35 = vadd.f32 %v5204_v33, %v5203_v31  ;;  %v390_v60 = vmul.f32 0.5, %v360_v32  ;;  %v662_v31 = vld [vmem:[%s11530_s3 + $0x160] sm:$0xff] }
 0x104   : > { %v5206_v36 = vpop.f32.mrf.mxu0  ;;  %v757_v32 = vld [vmem:[%s11530_s3 + $0x1e0] sm:$0xff] }
 0x105   : > { %7811 = verf.f32 %v398_v34  ;;  %v365_v37 = vadd.f32 %v5205_v35, %v8261_v18  ;;  %v661_v34 = vld [vmem:[%s11530_s3 + $0x158] sm:$0xff] }
 0x106   : > { %v5207_v38 = vpop.f32.mrf.mxu0  ;;  %v756_v35 = vld [vmem:[%s11530_s3 + $0x1d8] sm:$0xff] }
 0x107   : > { %v399_v39 = vmul.f32 0.70710677, %v365_v37  ;;  %v5208_v40 = vadd.f32 %v5207_v38, %v5206_v36  ;;  %v391_v2 = vmul.f32 0.5, %v365_v37  ;;  %v660_v37 = vld [vmem:[%s11530_s3 + $0x150] sm:$0xff] }
 0x108   : > { %v5209_v41 = vpop.f32.mrf.mxu0  ;;  %v755_v38 = vld [vmem:[%s11530_s3 + $0x1d0] sm:$0xff] }
 0x109   : > { %7813 = verf.f32 %v399_v39  ;;  %v370_v42 = vadd.f32 %v5208_v40, %v8261_v18  ;;  %v659_v39 = vld [vmem:[%s11530_s3 + $0x148] sm:$0xff] }
 0x10a   : > { %v7808_v43 = vpop.eup %7807  ;;  %v5210_v44 = vpop.f32.mrf.mxu0  ;;  %v754_v40 = vld [vmem:[%s11530_s3 + $0x1c8] sm:$0xff] }
 0x10b   : > { %v412_v47 = vadd.f32 1.0, %v7808_v43  ;;  %v400_v48 = vmul.f32 0.70710677, %v370_v42  ;;  %v5211_v49 = vadd.f32 %v5210_v44, %v5209_v41  ;;  %v392_v7 = vmul.f32 0.5, %v370_v42  ;;  %v658_v41 = vld [vmem:[%s11530_s3 + $0x140] sm:$0xff]  ;;  %v657_v43 = vld [vmem:[%s11530_s3 + $0x138] sm:$0xff] }
 0x10c   : > { %v5212_v50 = vpop.f32.mrf.mxu0  ;;  %v753_v42 = vld [vmem:[%s11530_s3 + $0x1c0] sm:$0xff]  ;;  %v752_v44 = vld [vmem:[%s11530_s3 + $0x1b8] sm:$0xff] }
 0x10d   : > { %v420_v51 = vmul.f32 %v412_v47, %v388_v45  ;;  %7815 = verf.f32 %v400_v48  ;;  %v375_v52 = vadd.f32 %v5211_v49, %v8261_v18  ;;  %v656_v45 = vld [vmem:[%s11530_s3 + $0x130] sm:$0xff]  ;;  %v655_v48 = vld [vmem:[%s11530_s3 + $0x128] sm:$0xff] }
 0x10e   : > { %v7810_v53 = vpop.eup %7809  ;;  %v5213_v54 = vpop.f32.mrf.mxu0  ;;  %v751_v47 = vld [vmem:[%s11530_s3 + $0x1b0] sm:$0xff]  ;;  %v750_v49 = vld [vmem:[%s11530_s3 + $0x1a8] sm:$0xff] }
 0x10f   : > { %443 = vst [vmem:[#allocation2 + $0x38] sm:$0xff] %v420_v51  ;;  %v413_v56 = vadd.f32 1.0, %v7810_v53  ;;  %v401_v57 = vmul.f32 0.70710677, %v375_v52  ;;  %v5214_v58 = vadd.f32 %v5213_v54, %v5212_v50  ;;  %v393_v19 = vmul.f32 0.5, %v375_v52  ;;  %v654_v50 = vld [vmem:[%s11530_s3 + $0x120] sm:$0xff] }
 0x110   : > { %v749_v51 = vld [vmem:[%s11530_s3 + $0x1a0] sm:$0xff]  ;;  %v653_v52 = vld [vmem:[%s11530_s3 + $0x118] sm:$0xff]  ;;  %v652_v54 = vld [vmem:[%s11530_s3 + $0x110] sm:$0xff] }
 0x111   : > { %v421_v59 = vmul.f32 %v413_v56, %v389_v55  ;;  %7817 = verf.f32 %v401_v57  ;;  %v380_v61 = vadd.f32 %v5214_v58, %v8261_v18  ;;  %v748_v53 = vld [vmem:[%s11530_s3 + $0x198] sm:$0xff]  ;;  %v747_v55 = vld [vmem:[%s11530_s3 + $0x190] sm:$0xff]  ;;  %v651_v58 = vld [vmem:[%s11530_s3 + $0x108] sm:$0xff] }
 0x112   : > { %v7812_v62 = vpop.eup %7811 }
 0x113   : > { %444 = vst [vmem:[#allocation2 + $0x48] sm:$0xff] %v421_v59  ;;  %v414_v63 = vadd.f32 1.0, %v7812_v62  ;;  %v402_v0 = vmul.f32 0.70710677, %v380_v61  ;;  %v394_v29 = vmul.f32 0.5, %v380_v61  ;;  %v746_v59 = vld [vmem:[%s11530_s3 + $0x188] sm:$0xff] }
 0x114   : > { %v667_v61 = vld [vmem:[#allocation2 + $0x7] ss:$4 sm:$0x3] }
 0x115   : > { %v422_v1 = vmul.f32 %v414_v63, %v390_v60  ;;  %7819 = verf.f32 %v402_v0  ;;  %v650_v60 = vld [vmem:[%s11530_s3 + $0x100] sm:$0xff] }
 0x116   : > { %v7814_v3 = vpop.eup %7813  ;;  %v745_v0 = vld [vmem:[%s11530_s3 + $0x180] sm:$0xff] }
 0x117   : > { %445 = vst [vmem:[#allocation2 + $0x58] sm:$0xff] %v422_v1  ;;  %v415_v4 = vadd.f32 1.0, %v7814_v3  ;;  %v762_v1 = vld [vmem:[#allocation2 + $0x8] ss:$4 sm:$0x3] }
 0x119   : > { %v423_v6 = vmul.f32 %v415_v4, %v391_v2  ;;  %v855_v4 = vld [vmem:[%s11530_s3 + $0x278] sm:$0xff] }
 0x11a   : > { %v7816_v9 = vpop.eup %7815  ;;  %v478_v10 = vld [vmem:[#allocation2 + $0x45] ss:$4 sm:$0x3]  ;;  %v574_v11 = vld [vmem:[#allocation2 + $0x46] ss:$4 sm:$0x3] }
 0x11b   : > { %446 = vst [vmem:[#allocation2 + $0x68] sm:$0xff] %v423_v6  ;;  %v416_v12 = vadd.f32 1.0, %v7816_v9  ;;  %v480_v13 = vrot.slane %v478_v10, 6  ;;  %v576_v14 = vrot.slane %v574_v11, 6  ;;  %v854_v6 = vld [vmem:[%s11530_s3 + $0x270] sm:$0xff]  ;;  %v948_v9 = vld [vmem:[%s11530_s3 + $0x2e8] sm:$0xff] }
 0x11c   : > { %v669_v56 = vld [vmem:[#allocation2 + $0x47] ss:$4 sm:$0x3]  ;;  %v764_v57 = vld [vmem:[#allocation2 + $0x48] ss:$4 sm:$0x3] }
 0x11d   : > { %v424_v17 = vmul.f32 %v416_v12, %v392_v7  ;;  %v483_v20 = vsel %vm482_vm1, %v476_v5, %v480_v13  ;;  %v578_v21 = vsel %vm482_vm1, %v572_v8, %v576_v14  ;;  %v671_v62 = vrot.slane %v669_v56, 6  ;;  %v950_v5 = vld [vmem:[%s11530_s3 + $0x2f8] sm:$0xff]  ;;  %v949_v7 = vld [vmem:[%s11530_s3 + $0x2f0] sm:$0xff]  ;;  %v853_v8 = vld [vmem:[%s11530_s3 + $0x268] sm:$0xff] }
 0x11e   : > { %v7818_v22 = vpop.eup %7817  ;;  %6084 = vmatmul.mubr.f32.vlgmr.msra.gmra.mxu1 %v483_v20  ;;  %6119 = vmatmul.mubr.f32.vlgmr.msra.gmra.mxu0 %v578_v21  ;;  %v766_v63 = vrot.slane %v764_v57, 6  ;;  %v852_v10 = vld [vmem:[%s11530_s3 + $0x260] sm:$0xff]  ;;  %v851_v12 = vld [vmem:[%s11530_s3 + $0x258] sm:$0xff]  ;;  %v850_v14 = vld [vmem:[%s11530_s3 + $0x250] sm:$0xff] }
 0x11f   : > { %447 = vst [vmem:[#allocation2 + $0x78] sm:$0xff] %v424_v17  ;;  %v417_v25 = vadd.f32 1.0, %v7818_v22  ;;  %6122 = vmatpush3.msra.mxu1 %v665_v15  ;;  %6157 = vmatpush3.msra.mxu0 %v760_v16  ;;  %v673_v2 = vsel %vm482_vm1, %v667_v61, %v671_v62  ;;  %v947_v11 = vld [vmem:[%s11530_s3 + $0x2e0] sm:$0xff]  ;;  %v946_v13 = vld [vmem:[%s11530_s3 + $0x2d8] sm:$0xff]  ;;  %v945_v15 = vld [vmem:[%s11530_s3 + $0x2d0] sm:$0xff] }
 0x120   : > { %6123 = vmatprep.subr.mxu1 %v7911_v46  ;;  %6158 = vmatprep.subr.mxu0 %v7911_v46  ;;  %v768_v3 = vsel %vm482_vm1, %v762_v1, %v766_v63  ;;  %v849_v16 = vld [vmem:[%s11530_s3 + $0x248] sm:$0xff]  ;;  %v943_v20 = vld [vmem:[%s11530_s3 + $0x2c0] sm:$0xff]  ;;  %v847_v21 = vld [vmem:[%s11530_s3 + $0x238] sm:$0xff] }
 0x121   : > { %v425_v28 = vmul.f32 %v417_v25, %v393_v19  ;;  %6124 = vmatpush3.msra.mxu1 %v664_v23  ;;  %6159 = vmatpush3.msra.mxu0 %v759_v24  ;;  %v944_v17 = vld [vmem:[%s11530_s3 + $0x2c8] sm:$0xff]  ;;  %v848_v19 = vld [vmem:[%s11530_s3 + $0x240] sm:$0xff]  ;;  %v942_v22 = vld [vmem:[%s11530_s3 + $0x2b8] sm:$0xff]  ;;  %v5215_v23 = vpop.f32.mrf.mxu0 }
 0x122   : > { %v7820_v30 = vpop.eup %7819  ;;  %6125 = vmatprep.subr.mxu1 %v7911_v46  ;;  %6160 = vmatprep.subr.mxu0 %v7911_v46  ;;  %v846_v24 = vld [vmem:[%s11530_s3 + $0x230] sm:$0xff]  ;;  %v1043_v56 = vld [vmem:[%s11530_s3 + $0x368] sm:$0xff]  ;;  %v1041_v62 = vld [vmem:[%s11530_s3 + $0x358] sm:$0xff] }
 0x123   : > { %448 = vst [vmem:[#allocation2 + $0x88] sm:$0xff] %v425_v28  ;;  %6126 = vmatpush3.msra.mxu1 %v663_v26  ;;  %6161 = vmatpush3.msra.mxu0 %v758_v27  ;;  %v418_v33 = vadd.f32 1.0, %v7820_v30  ;;  %v941_v25 = vld [vmem:[%s11530_s3 + $0x2b0] sm:$0xff]  ;;  %v5216_v26 = vpop.f32.mrf.mxu0  ;;  %v845_v28 = vld [vmem:[%s11530_s3 + $0x228] sm:$0xff]  ;;  %v1136_v63 = vld [vmem:[%s11530_s3 + $0x3d8] sm:$0xff] }
 0x124   : > { %6127 = vmatprep.subr.mxu1 %v7911_v46  ;;  %6162 = vmatprep.subr.mxu0 %v7911_v46  ;;  %v5217_v27 = vadd.f32 %v5216_v26, %v5215_v23  ;;  %v1138_v57 = vld [vmem:[%s11530_s3 + $0x3e8] sm:$0xff]  ;;  %v1135_v1 = vld [vmem:[%s11530_s3 + $0x3d0] sm:$0xff]  ;;  %v1030_v26 = vld [vmem:[%s11530_s3 + $0x300] sm:$0xff] }
 0x125   : > { %6128 = vmatpush3.msra.mxu1 %v662_v31  ;;  %6163 = vmatpush3.msra.mxu0 %v757_v32  ;;  %v426_v36 = vmul.f32 %v418_v33, %v394_v29  ;;  %v940_v29 = vld [vmem:[%s11530_s3 + $0x2a8] sm:$0xff]  ;;  %v844_v31 = vld [vmem:[%s11530_s3 + $0x220] sm:$0xff] }
 0x126   : > { %6129 = vmatprep.subr.mxu1 %v7911_v46  ;;  %6164 = vmatprep.subr.mxu0 %v7911_v46  ;;  %v385_v30 = vadd.f32 %v5217_v27, %v8261_v18  ;;  %v939_v32 = vld [vmem:[%s11530_s3 + $0x2a0] sm:$0xff]  ;;  %v843_v18 = vld [vmem:[%s11530_s3 + $0x218] sm:$0xff]  ;;  %v1126_v23 = vld [vmem:[%s11530_s3 + $0x388] sm:$0xff] }
 0x127   : > { %6130 = vmatpush3.msra.mxu1 %v661_v34  ;;  %6165 = vmatpush3.msra.mxu0 %v756_v35  ;;  %449 = vst [vmem:[#allocation2 + $0x98] sm:$0xff] %v426_v36  ;;  %v938_v34 = vld [vmem:[%s11530_s3 + $0x298] sm:$0xff]  ;;  %v842_v35 = vld [vmem:[%s11530_s3 + $0x210] sm:$0xff] }
 0x128   : > { %6131 = vmatprep.subr.mxu1 %v7911_v46  ;;  %6166 = vmatprep.subr.mxu0 %v7911_v46  ;;  %v403_v33 = vmul.f32 0.70710677, %v385_v30  ;;  %v937_v36 = vld [vmem:[%s11530_s3 + $0x290] sm:$0xff] }
 0x129   : > { %6132 = vmatpush3.msra.mxu1 %v660_v37  ;;  %6167 = vmatpush3.msra.mxu0 %v755_v38  ;;  %v859_v37 = vld [vmem:[#allocation2 + $0x49] ss:$4 sm:$0x3]  ;;  %v954_v38 = vld [vmem:[#allocation2 + $0x4a] ss:$4 sm:$0x3] }
 0x12a   : > { %6133 = vmatprep.subr.mxu1 %v7911_v46  ;;  %6168 = vmatprep.subr.mxu0 %v7911_v46  ;;  %7821 = verf.f32 %v403_v33  ;;  %v1142_v27 = vld [vmem:[#allocation2 + $0x15] ss:$4 sm:$0x3] }
 0x12b   : > { %6134 = vmatpush3.msra.mxu1 %v659_v39  ;;  %6169 = vmatpush3.msra.mxu0 %v754_v40  ;;  %v841_v39 = vld [vmem:[%s11530_s3 + $0x208] sm:$0xff]  ;;  %v1234_v33 = vld [vmem:[%s11530_s3 + $0x470] sm:$0xff] }
 0x12c   : > { %6135 = vmatprep.subr.mxu1 %v7911_v46  ;;  %6170 = vmatprep.subr.mxu0 %v7911_v46  ;;  %v936_v40 = vld [vmem:[%s11530_s3 + $0x288] sm:$0xff] }
 0x12d   : > { %6136 = vmatpush3.msra.mxu1 %v658_v41  ;;  %6171 = vmatpush3.msra.mxu0 %v753_v42  ;;  %v840_v41 = vld [vmem:[%s11530_s3 + $0x200] sm:$0xff]  ;;  %v857_v42 = vld [vmem:[#allocation2 + $0x9] ss:$4 sm:$0x3] }
 0x12e   : > { %6137 = vmatprep.subr.mxu1 %v7911_v46  ;;  %6172 = vmatprep.subr.mxu0 %v7911_v46 }
 0x12f   : > { %6138 = vmatpush3.msra.mxu1 %v657_v43  ;;  %6173 = vmatpush3.msra.mxu0 %v752_v44  ;;  %v861_v43 = vrot.slane %v859_v37, 6  ;;  %v956_v44 = vrot.slane %v954_v38, 6  ;;  %v1327_v37 = vld [vmem:[%s11530_s3 + $0x4e0] sm:$0xff]  ;;  %v1231_v38 = vld [vmem:[%s11530_s3 + $0x458] sm:$0xff] }
 0x130   : > { %6139 = vmatprep.subr.mxu1 %v7911_v46  ;;  %6174 = vmatprep.subr.mxu0 %v7911_v46 }
 0x131   : > { %6140 = vmatpush3.msra.mxu1 %v656_v45  ;;  %6175 = vmatpush3.msra.mxu0 %v751_v47  ;;  %v935_v45 = vld [vmem:[%s11530_s3 + $0x280] sm:$0xff]  ;;  %v952_v47 = vld [vmem:[#allocation2 + $0xa] ss:$4 sm:$0x3] }
 0x132   : > { %6141 = vmatprep.subr.mxu1 %v7911_v46  ;;  %6176 = vmatprep.subr.mxu0 %v7911_v46 }
 0x133   : > { %6142 = vmatpush3.msra.mxu1 %v655_v48  ;;  %6177 = vmatpush3.msra.mxu0 %v750_v49  ;;  %v863_v48 = vsel %vm482_vm1, %v857_v42, %v861_v43  ;;  %v958_v49 = vsel %vm482_vm1, %v952_v47, %v956_v44  ;;  %v1229_v42 = vld [vmem:[%s11530_s3 + $0x448] sm:$0xff]  ;;  %v1228_v44 = vld [vmem:[%s11530_s3 + $0x440] sm:$0xff]  ;;  %v1227_v47 = vld [vmem:[%s11530_s3 + $0x438] sm:$0xff] }
 0x134   : > { %6143 = vmatprep.subr.mxu1 %v7911_v46  ;;  %6178 = vmatprep.subr.mxu0 %v7911_v46  ;;  %v1324_v43 = vld [vmem:[%s11530_s3 + $0x4c8] sm:$0xff] }
 0x135   : > { %6144 = vmatpush3.msra.mxu1 %v654_v50  ;;  %6179 = vmatpush3.msra.mxu0 %v749_v51  ;;  %v1045_v50 = vld [vmem:[%s11530_s3 + $0x378] sm:$0xff] }
 0x136   : > { %6145 = vmatprep.subr.mxu1 %v7911_v46  ;;  %6180 = vmatprep.subr.mxu0 %v7911_v46  ;;  %v1140_v51 = vld [vmem:[%s11530_s3 + $0x3f8] sm:$0xff] }
 0x137   : > { %6146 = vmatpush3.msra.mxu1 %v653_v52  ;;  %6181 = vmatpush3.msra.mxu0 %v748_v53  ;;  %v1044_v52 = vld [vmem:[%s11530_s3 + $0x370] sm:$0xff] }
 0x138   : > { %6147 = vmatprep.subr.mxu1 %v7911_v46  ;;  %6182 = vmatprep.subr.mxu0 %v7911_v46  ;;  %v1139_v53 = vld [vmem:[%s11530_s3 + $0x3f0] sm:$0xff] }
 0x139   : > { %6148 = vmatpush3.msra.mxu1 %v652_v54  ;;  %6183 = vmatpush3.msra.mxu0 %v747_v55  ;;  %v395_v54 = vmul.f32 0.5, %v385_v30  ;;  %v7822_v55 = vpop.eup %7821 }
 0x13a   : > { %6149 = vmatprep.subr.mxu1 %v7911_v46  ;;  %6184 = vmatprep.subr.mxu0 %v7911_v46 }
 0x13b   : > { %6150 = vmatpush3.msra.mxu1 %v651_v58  ;;  %6185 = vmatpush3.msra.mxu0 %v746_v59  ;;  %v419_v58 = vadd.f32 1.0, %v7822_v55  ;;  %v1042_v59 = vld [vmem:[%s11530_s3 + $0x360] sm:$0xff]  ;;  %v1223_v55 = vld [vmem:[%s11530_s3 + $0x418] sm:$0xff] }
 0x13c   : > { %6151 = vmatprep.subr.mxu1 %v7911_v46  ;;  %6186 = vmatprep.subr.mxu0 %v7911_v46 }
 0x13d   : > { %6152 = vmatpush3.msra.mxu1 %v650_v60  ;;  %6153 = vmatprep.mubr.msk.f32.mxu1 %vm7912_vm0, %v7911_v46  ;;  %v1137_v60 = vld [vmem:[%s11530_s3 + $0x3e0] sm:$0xff]  ;;  %v427_v61 = vmul.f32 %v419_v58, %v395_v54  ;;  %v1317_v58 = vld [vmem:[%s11530_s3 + $0x490] sm:$0xff] }
 0x13e   : > { %6187 = vmatpush3.msra.mxu0 %v745_v0  ;;  %6188 = vmatprep.mubr.msk.f32.mxu0 %vm7912_vm0, %v7911_v46  ;;  %v1040_v0 = vld [vmem:[%s11530_s3 + $0x350] sm:$0xff]  ;;  %v1319_v54 = vld [vmem:[%s11530_s3 + $0x4a0] sm:$0xff] }
 0x13f   : > { %6154 = vmatmul.mubr.f32.vlgmr.msra.gmra.mxu1 %v673_v2  ;;  %6189 = vmatmul.mubr.f32.vlgmr.msra.gmra.mxu0 %v768_v3  ;;  %450 = vst [vmem:[#allocation2 + $0xa8] sm:$0xff] %v427_v61  ;;  %v1039_v2 = vld [vmem:[%s11530_s3 + $0x348] sm:$0xff] }
 0x140   : > { %6191 = vmatprep.subr.mxu1 %v7911_v46  ;;  %6226 = vmatprep.subr.mxu0 %v7911_v46  ;;  %v1134_v3 = vld [vmem:[%s11530_s3 + $0x3c8] sm:$0xff] }
 0x141   : > { %6192 = vmatpush3.msra.mxu1 %v855_v4  ;;  %6227 = vmatpush3.msra.mxu0 %v950_v5  ;;  %v1038_v4 = vld [vmem:[%s11530_s3 + $0x340] sm:$0xff]  ;;  %v1221_v61 = vld [vmem:[%s11530_s3 + $0x408] sm:$0xff] }
 0x142   : > { %6193 = vmatprep.subr.mxu1 %v7911_v46  ;;  %6228 = vmatprep.subr.mxu0 %v7911_v46  ;;  %v1133_v5 = vld [vmem:[%s11530_s3 + $0x3c0] sm:$0xff] }
 0x143   : > { %6194 = vmatpush3.msra.mxu1 %v854_v6  ;;  %6229 = vmatpush3.msra.mxu0 %v949_v7  ;;  %v1037_v6 = vld [vmem:[%s11530_s3 + $0x338] sm:$0xff] }
 0x144   : > { %6195 = vmatprep.subr.mxu1 %v7911_v46  ;;  %6230 = vmatprep.subr.mxu0 %v7911_v46  ;;  %v1132_v7 = vld [vmem:[%s11530_s3 + $0x3b8] sm:$0xff] }
 0x145   : > { %6196 = vmatpush3.msra.mxu1 %v853_v8  ;;  %6231 = vmatpush3.msra.mxu0 %v948_v9  ;;  %v1036_v8 = vld [vmem:[%s11530_s3 + $0x330] sm:$0xff] }
 0x146   : > { %6197 = vmatprep.subr.mxu1 %v7911_v46  ;;  %6232 = vmatprep.subr.mxu0 %v7911_v46  ;;  %v1131_v9 = vld [vmem:[%s11530_s3 + $0x3b0] sm:$0xff] }
 0x147   : > { %6198 = vmatpush3.msra.mxu1 %v852_v10  ;;  %6233 = vmatpush3.msra.mxu0 %v947_v11  ;;  %v1035_v10 = vld [vmem:[%s11530_s3 + $0x328] sm:$0xff] }
 0x148   : > { %6199 = vmatprep.subr.mxu1 %v7911_v46  ;;  %6234 = vmatprep.subr.mxu0 %v7911_v46  ;;  %v1130_v11 = vld [vmem:[%s11530_s3 + $0x3a8] sm:$0xff] }
 0x149   : > { %6200 = vmatpush3.msra.mxu1 %v851_v12  ;;  %6235 = vmatpush3.msra.mxu0 %v946_v13  ;;  %v1034_v12 = vld [vmem:[%s11530_s3 + $0x320] sm:$0xff] }
 0x14a   : > { %6201 = vmatprep.subr.mxu1 %v7911_v46  ;;  %6236 = vmatprep.subr.mxu0 %v7911_v46  ;;  %v1129_v13 = vld [vmem:[%s11530_s3 + $0x3a0] sm:$0xff] }
 0x14b   : > { %6202 = vmatpush3.msra.mxu1 %v850_v14  ;;  %6237 = vmatpush3.msra.mxu0 %v945_v15  ;;  %v1033_v14 = vld [vmem:[%s11530_s3 + $0x318] sm:$0xff] }
 0x14c   : > { %6203 = vmatprep.subr.mxu1 %v7911_v46  ;;  %6238 = vmatprep.subr.mxu0 %v7911_v46  ;;  %v1128_v15 = vld [vmem:[%s11530_s3 + $0x398] sm:$0xff] }
 0x14d   : > { %6204 = vmatpush3.msra.mxu1 %v849_v16  ;;  %6239 = vmatpush3.msra.mxu0 %v944_v17  ;;  %v1032_v16 = vld [vmem:[%s11530_s3 + $0x310] sm:$0xff] }
 0x14e   : > { %6205 = vmatprep.subr.mxu1 %v7911_v46  ;;  %6240 = vmatprep.subr.mxu0 %v7911_v46  ;;  %v1127_v17 = vld [vmem:[%s11530_s3 + $0x390] sm:$0xff] }
 0x14f   : > { %6206 = vmatpush3.msra.mxu1 %v848_v19  ;;  %6241 = vmatpush3.msra.mxu0 %v943_v20  ;;  %v1049_v19 = vld [vmem:[#allocation2 + $0x4b] ss:$4 sm:$0x3]  ;;  %v1144_v20 = vld [vmem:[#allocation2 + $0x55] ss:$4 sm:$0x3] }
 0x150   : > { %6207 = vmatprep.subr.mxu1 %v7911_v46  ;;  %6242 = vmatprep.subr.mxu0 %v7911_v46 }
 0x151   : > { %6208 = vmatpush3.msra.mxu1 %v847_v21  ;;  %6243 = vmatpush3.msra.mxu0 %v942_v22  ;;  %v8649_v21 = vld [vmem:[#allocation2] sm:$0xff]  ;;  %v1031_v22 = vld [vmem:[%s11530_s3 + $0x308] sm:$0xff] }
 0x152   : > { %6209 = vmatprep.subr.mxu1 %v7911_v46  ;;  %6244 = vmatprep.subr.mxu0 %v7911_v46 }
 0x153   : > { %6210 = vmatpush3.msra.mxu1 %v846_v24  ;;  %6245 = vmatpush3.msra.mxu0 %v941_v25  ;;  %v1051_v24 = vrot.slane %v1049_v19, 6  ;;  %v1146_v25 = vrot.slane %v1144_v20, 6  ;;  %v1515_v19 = vld [vmem:[%s11530_s3 + $0x5d0] sm:$0xff]  ;;  %v1419_v20 = vld [vmem:[%s11530_s3 + $0x548] sm:$0xff] }
 0x154   : > { %6211 = vmatprep.subr.mxu1 %v7911_v46  ;;  %6246 = vmatprep.subr.mxu0 %v7911_v46 }
 0x155   : > { %6212 = vmatpush3.msra.mxu1 %v845_v28  ;;  %6247 = vmatpush3.msra.mxu0 %v940_v29  ;;  %v1125_v28 = vld [vmem:[%s11530_s3 + $0x380] sm:$0xff]  ;;  %v1148_v30 = vsel %vm482_vm1, %v1142_v27, %v1146_v25  ;;  %v1512_v25 = vld [vmem:[%s11530_s3 + $0x5b8] sm:$0xff]  ;;  %v1511_v27 = vld [vmem:[%s11530_s3 + $0x5b0] sm:$0xff] }
 0x156   : > { %6213 = vmatprep.subr.mxu1 %v7911_v46  ;;  %6248 = vmatprep.subr.mxu0 %v7911_v46 }
 0x157   : > { %6214 = vmatpush3.msra.mxu1 %v844_v31  ;;  %6249 = vmatpush3.msra.mxu0 %v939_v32  ;;  %v1235_v31 = vld [vmem:[%s11530_s3 + $0x478] sm:$0xff] }
 0x158   : > { %6215 = vmatprep.subr.mxu1 %v7911_v46  ;;  %6250 = vmatprep.subr.mxu0 %v7911_v46  ;;  %v1330_v32 = vld [vmem:[%s11530_s3 + $0x4f8] sm:$0xff] }
 0x159   : > { %6216 = vmatpush3.msra.mxu1 %v843_v18  ;;  %6251 = vmatpush3.msra.mxu0 %v938_v34  ;;  %v1329_v18 = vld [vmem:[%s11530_s3 + $0x4f0] sm:$0xff]  ;;  %v1233_v34 = vld [vmem:[%s11530_s3 + $0x468] sm:$0xff] }
 0x15a   : > { %6217 = vmatprep.subr.mxu1 %v7911_v46  ;;  %6252 = vmatprep.subr.mxu0 %v7911_v46 }
 0x15b   : > { %6218 = vmatpush3.msra.mxu1 %v842_v35  ;;  %6253 = vmatpush3.msra.mxu0 %v937_v36  ;;  %v1328_v35 = vld [vmem:[%s11530_s3 + $0x4e8] sm:$0xff]  ;;  %v1232_v36 = vld [vmem:[%s11530_s3 + $0x460] sm:$0xff] }
 0x15c   : > { %6219 = vmatprep.subr.mxu1 %v7911_v46  ;;  %6254 = vmatprep.subr.mxu0 %v7911_v46 }
 0x15d   : > { %6220 = vmatpush3.msra.mxu1 %v841_v39  ;;  %6255 = vmatpush3.msra.mxu0 %v936_v40  ;;  %v1326_v39 = vld [vmem:[%s11530_s3 + $0x4d8] sm:$0xff]  ;;  %v1230_v40 = vld [vmem:[%s11530_s3 + $0x450] sm:$0xff] }
 0x15e   : > { %6221 = vmatprep.subr.mxu1 %v7911_v46  ;;  %6256 = vmatprep.subr.mxu0 %v7911_v46 }
 0x15f   : > { %6222 = vmatpush3.msra.mxu1 %v840_v41  ;;  %6223 = vmatprep.mubr.msk.f32.mxu1 %vm7912_vm0, %v7911_v46  ;;  %v1325_v41 = vld [vmem:[%s11530_s3 + $0x4d0] sm:$0xff] }
 0x160   : > { %6257 = vmatpush3.msra.mxu0 %v935_v45  ;;  %6258 = vmatprep.mubr.msk.f32.mxu0 %vm7912_vm0, %v7911_v46  ;;  %v1323_v45 = vld [vmem:[%s11530_s3 + $0x4c0] sm:$0xff] }
 0x161   : > { %6224 = vmatmul.mubr.f32.vlgmr.msra.gmra.mxu1 %v863_v48  ;;  %6259 = vmatmul.mubr.f32.vlgmr.msra.gmra.mxu0 %v958_v49  ;;  %v1322_v48 = vld [vmem:[%s11530_s3 + $0x4b8] sm:$0xff]  ;;  %v1226_v49 = vld [vmem:[%s11530_s3 + $0x430] sm:$0xff] }
 0x162   : > { %6261 = vmatprep.subr.mxu1 %v7911_v46  ;;  %6296 = vmatprep.subr.mxu0 %v7911_v46 }
 0x163   : > { %6262 = vmatpush3.msra.mxu1 %v1045_v50  ;;  %6297 = vmatpush3.msra.mxu0 %v1140_v51  ;;  %v1321_v50 = vld [vmem:[%s11530_s3 + $0x4b0] sm:$0xff]  ;;  %v1225_v51 = vld [vmem:[%s11530_s3 + $0x428] sm:$0xff] }
 0x164   : > { %6263 = vmatprep.subr.mxu1 %v7911_v46  ;;  %6298 = vmatprep.subr.mxu0 %v7911_v46 }
 0x165   : > { %6264 = vmatpush3.msra.mxu1 %v1044_v52  ;;  %6299 = vmatpush3.msra.mxu0 %v1139_v53  ;;  %v1320_v52 = vld [vmem:[%s11530_s3 + $0x4a8] sm:$0xff]  ;;  %v1224_v53 = vld [vmem:[%s11530_s3 + $0x420] sm:$0xff] }
 0x166   : > { %6265 = vmatprep.subr.mxu1 %v7911_v46  ;;  %6300 = vmatprep.subr.mxu0 %v7911_v46 }
 0x167   : > { %6266 = vmatpush3.msra.mxu1 %v1043_v56  ;;  %6301 = vmatpush3.msra.mxu0 %v1138_v57  ;;  %v1318_v56 = vld [vmem:[%s11530_s3 + $0x498] sm:$0xff]  ;;  %v1222_v57 = vld [vmem:[%s11530_s3 + $0x410] sm:$0xff] }
 0x168   : > { %6267 = vmatprep.subr.mxu1 %v7911_v46  ;;  %6302 = vmatprep.subr.mxu0 %v7911_v46 }
 0x169   : > { %6268 = vmatpush3.msra.mxu1 %v1042_v59  ;;  %6303 = vmatpush3.msra.mxu0 %v1137_v60  ;;  %v1239_v59 = vld [vmem:[#allocation2 + $0x56] ss:$4 sm:$0x3]  ;;  %v1334_v60 = vld [vmem:[#allocation2 + $0x57] ss:$4 sm:$0x3] }
 0x16a   : > { %6269 = vmatprep.subr.mxu1 %v7911_v46  ;;  %6304 = vmatprep.subr.mxu0 %v7911_v46 }
 0x16b   : > { %6270 = vmatpush3.msra.mxu1 %v1041_v62  ;;  %6305 = vmatpush3.msra.mxu0 %v1136_v63  ;;  %v1316_v62 = vld [vmem:[%s11530_s3 + $0x488] sm:$0xff]  ;;  %v1220_v63 = vld [vmem:[%s11530_s3 + $0x400] sm:$0xff] }
 0x16c   : > { %6271 = vmatprep.subr.mxu1 %v7911_v46  ;;  %6306 = vmatprep.subr.mxu0 %v7911_v46 }
 0x16d   : > { %6272 = vmatpush3.msra.mxu1 %v1040_v0  ;;  %6307 = vmatpush3.msra.mxu0 %v1135_v1  ;;  %v1237_v0 = vld [vmem:[#allocation2 + $0x16] ss:$4 sm:$0x3]  ;;  %v1241_v1 = vrot.slane %v1239_v59, 6 }
 0x16e   : > { %6273 = vmatprep.subr.mxu1 %v7911_v46  ;;  %6308 = vmatprep.subr.mxu0 %v7911_v46  ;;  %v1705_v59 = vld [vmem:[%s11530_s3 + $0x6d0] sm:$0xff] }
 0x16f   : > { %6274 = vmatpush3.msra.mxu1 %v1039_v2  ;;  %6309 = vmatpush3.msra.mxu0 %v1134_v3  ;;  %v1336_v2 = vrot.slane %v1334_v60, 6  ;;  %v1315_v3 = vld [vmem:[%s11530_s3 + $0x480] sm:$0xff]  ;;  %v1609_v60 = vld [vmem:[%s11530_s3 + $0x648] sm:$0xff] }
 0x170   : > { %6275 = vmatprep.subr.mxu1 %v7911_v46  ;;  %6310 = vmatprep.subr.mxu0 %v7911_v46 }
 0x171   : > { %6276 = vmatpush3.msra.mxu1 %v1038_v4  ;;  %6311 = vmatpush3.msra.mxu0 %v1133_v5  ;;  %v1332_v4 = vld [vmem:[#allocation2 + $0x17] ss:$4 sm:$0x3]  ;;  %v1243_v5 = vsel %vm482_vm1, %v1237_v0, %v1241_v1 }
 0x172   : > { %6277 = vmatprep.subr.mxu1 %v7911_v46  ;;  %6312 = vmatprep.subr.mxu0 %v7911_v46  ;;  %v1607_v0 = vld [vmem:[%s11530_s3 + $0x638] sm:$0xff] }
 0x173   : > { %6278 = vmatpush3.msra.mxu1 %v1037_v6  ;;  %6313 = vmatpush3.msra.mxu0 %v1132_v7  ;;  %v1338_v6 = vsel %vm482_vm1, %v1332_v4, %v1336_v2  ;;  %v1425_v7 = vld [vmem:[%s11530_s3 + $0x578] sm:$0xff]  ;;  %v1606_v2 = vld [vmem:[%s11530_s3 + $0x630] sm:$0xff]  ;;  %v1605_v4 = vld [vmem:[%s11530_s3 + $0x628] sm:$0xff] }
 0x174   : > { %6279 = vmatprep.subr.mxu1 %v7911_v46  ;;  %6314 = vmatprep.subr.mxu0 %v7911_v46  ;;  %v1702_v1 = vld [vmem:[%s11530_s3 + $0x6b8] sm:$0xff] }
 0x175   : > { %6280 = vmatpush3.msra.mxu1 %v1036_v8  ;;  %6315 = vmatpush3.msra.mxu0 %v1131_v9  ;;  %v1520_v8 = vld [vmem:[%s11530_s3 + $0x5f8] sm:$0xff]  ;;  %v1424_v9 = vld [vmem:[%s11530_s3 + $0x570] sm:$0xff] }
 0x176   : > { %6281 = vmatprep.subr.mxu1 %v7911_v46  ;;  %6316 = vmatprep.subr.mxu0 %v7911_v46 }
 0x177   : > { %6282 = vmatpush3.msra.mxu1 %v1035_v10  ;;  %6317 = vmatpush3.msra.mxu0 %v1130_v11  ;;  %v1519_v10 = vld [vmem:[%s11530_s3 + $0x5f0] sm:$0xff]  ;;  %v1423_v11 = vld [vmem:[%s11530_s3 + $0x568] sm:$0xff] }
 0x178   : > { %6283 = vmatprep.subr.mxu1 %v7911_v46  ;;  %6318 = vmatprep.subr.mxu0 %v7911_v46 }
 0x179   : > { %6284 = vmatpush3.msra.mxu1 %v1034_v12  ;;  %6319 = vmatpush3.msra.mxu0 %v1129_v13  ;;  %v1518_v12 = vld [vmem:[%s11530_s3 + $0x5e8] sm:$0xff]  ;;  %v1422_v13 = vld [vmem:[%s11530_s3 + $0x560] sm:$0xff] }
 0x17a   : > { %6285 = vmatprep.subr.mxu1 %v7911_v46  ;;  %6320 = vmatprep.subr.mxu0 %v7911_v46  ;;  %v1047_v46 = vld [vmem:[#allocation2 + $0xb] ss:$4 sm:$0x3] }
 0x17b   : > { %6286 = vmatpush3.msra.mxu1 %v1033_v14  ;;  %6321 = vmatpush3.msra.mxu0 %v1128_v15  ;;  %v1053_v29 = vsel %vm482_vm1, %v1047_v46, %v1051_v24  ;;  %v1517_v14 = vld [vmem:[%s11530_s3 + $0x5e0] sm:$0xff]  ;;  %v1421_v15 = vld [vmem:[%s11530_s3 + $0x558] sm:$0xff] }
 0x17c   : > { %6287 = vmatprep.subr.mxu1 %v8649_v21  ;;  %6322 = vmatprep.subr.mxu0 %v8649_v21  ;;  %v1513_v46 = vld [vmem:[%s11530_s3 + $0x5c0] sm:$0xff]  ;;  %v1417_v24 = vld [vmem:[%s11530_s3 + $0x538] sm:$0xff] }
 0x17d   : > { %6288 = vmatpush3.msra.mxu1 %v1032_v16  ;;  %6323 = vmatpush3.msra.mxu0 %v1127_v17  ;;  %v1516_v16 = vld [vmem:[%s11530_s3 + $0x5d8] sm:$0xff]  ;;  %v1420_v17 = vld [vmem:[%s11530_s3 + $0x550] sm:$0xff] }
 0x17e   : > { %6289 = vmatprep.subr.mxu1 %v8649_v21  ;;  %6324 = vmatprep.subr.mxu0 %v8649_v21 }
 0x17f   : > { %6290 = vmatpush3.msra.mxu1 %v1031_v22  ;;  %6325 = vmatpush3.msra.mxu0 %v1126_v23  ;;  %v1514_v22 = vld [vmem:[%s11530_s3 + $0x5c8] sm:$0xff]  ;;  %v1418_v23 = vld [vmem:[%s11530_s3 + $0x540] sm:$0xff] }
 0x180   : > { %6291 = vmatprep.subr.mxu1 %v8649_v21  ;;  %6326 = vmatprep.subr.mxu0 %v8649_v21 }
 0x181   : > { %6292 = vmatpush3.msra.mxu1 %v1030_v26  ;;  %6293 = vmatprep.mubr.msk.f32.mxu1 %vm7912_vm0, %v8649_v21  ;;  %v1416_v26 = vld [vmem:[%s11530_s3 + $0x530] sm:$0xff] }
 0x182   : > { %6327 = vmatpush3.msra.mxu0 %v1125_v28  ;;  %6294 = vmatmul.mubr.f32.vlgmr.msra.gmra.mxu1 %v1053_v29  ;;  %v1415_v28 = vld [vmem:[%s11530_s3 + $0x528] sm:$0xff] }
 0x183   : > { %6328 = vmatprep.mubr.msk.f32.mxu0 %vm7912_vm0, %v8649_v21  ;;  %6331 = vmatprep.subr.mxu1 %v8649_v21  ;;  %v1510_v29 = vld [vmem:[%s11530_s3 + $0x5a8] sm:$0xff] }
 0x184   : > { %6366 = vmatprep.subr.mxu0 %v8649_v21  ;;  %6329 = vmatmul.mubr.f32.vlgmr.msra.gmra.mxu0 %v1148_v30  ;;  %v1414_v30 = vld [vmem:[%s11530_s3 + $0x520] sm:$0xff] }
 0x185   : > { %6332 = vmatpush3.msra.mxu1 %v1235_v31  ;;  %6367 = vmatpush3.msra.mxu0 %v1330_v32  ;;  %v1509_v31 = vld [vmem:[%s11530_s3 + $0x5a0] sm:$0xff]  ;;  %v1413_v32 = vld [vmem:[%s11530_s3 + $0x518] sm:$0xff] }
 0x186   : > { %6333 = vmatprep.subr.mxu1 %v8649_v21  ;;  %6368 = vmatprep.subr.mxu0 %v8649_v21 }
 0x187   : > { %6334 = vmatpush3.msra.mxu1 %v1234_v33  ;;  %6369 = vmatpush3.msra.mxu0 %v1329_v18  ;;  %v1508_v33 = vld [vmem:[%s11530_s3 + $0x598] sm:$0xff]  ;;  %v1412_v18 = vld [vmem:[%s11530_s3 + $0x510] sm:$0xff] }
 0x188   : > { %6335 = vmatprep.subr.mxu1 %v8649_v21  ;;  %6370 = vmatprep.subr.mxu0 %v8649_v21 }
 0x189   : > { %6336 = vmatpush3.msra.mxu1 %v1233_v34  ;;  %6371 = vmatpush3.msra.mxu0 %v1328_v35  ;;  %v1507_v34 = vld [vmem:[%s11530_s3 + $0x590] sm:$0xff]  ;;  %v1429_v35 = vld [vmem:[#allocation2 + $0x58] ss:$4 sm:$0x3] }
 0x18a   : > { %6337 = vmatprep.subr.mxu1 %v8649_v21  ;;  %6372 = vmatprep.subr.mxu0 %v8649_v21 }
 0x18b   : > { %6338 = vmatpush3.msra.mxu1 %v1232_v36  ;;  %6373 = vmatpush3.msra.mxu0 %v1327_v37  ;;  %v1524_v36 = vld [vmem:[#allocation2 + $0x59] ss:$4 sm:$0x3]  ;;  %v1411_v37 = vld [vmem:[%s11530_s3 + $0x508] sm:$0xff] }
 0x18c   : > { %6339 = vmatprep.subr.mxu1 %v8649_v21  ;;  %6374 = vmatprep.subr.mxu0 %v8649_v21 }
 0x18d   : > { %6340 = vmatpush3.msra.mxu1 %v1231_v38  ;;  %6375 = vmatpush3.msra.mxu0 %v1326_v39  ;;  %v1506_v38 = vld [vmem:[%s11530_s3 + $0x588] sm:$0xff]  ;;  %v1410_v39 = vld [vmem:[%s11530_s3 + $0x500] sm:$0xff] }
 0x18e   : > { %6341 = vmatprep.subr.mxu1 %v8649_v21  ;;  %6376 = vmatprep.subr.mxu0 %v8649_v21 }
 0x18f   : > { %6342 = vmatpush3.msra.mxu1 %v1230_v40  ;;  %6377 = vmatpush3.msra.mxu0 %v1325_v41  ;;  %v1427_v40 = vld [vmem:[#allocation2 + $0x18] ss:$4 sm:$0x3]  ;;  %v1431_v41 = vrot.slane %v1429_v35, 6  ;;  %v1803_v35 = vld [vmem:[%s11530_s3 + $0x768] sm:$0xff] }
 0x190   : > { %6343 = vmatprep.subr.mxu1 %v8649_v21  ;;  %6378 = vmatprep.subr.mxu0 %v8649_v21 }
 0x191   : > { %6344 = vmatpush3.msra.mxu1 %v1229_v42  ;;  %6379 = vmatpush3.msra.mxu0 %v1324_v43  ;;  %v1526_v42 = vrot.slane %v1524_v36, 6  ;;  %v1505_v43 = vld [vmem:[%s11530_s3 + $0x580] sm:$0xff]  ;;  %v1898_v36 = vld [vmem:[%s11530_s3 + $0x7e8] sm:$0xff] }
 0x192   : > { %6345 = vmatprep.subr.mxu1 %v8649_v21  ;;  %6380 = vmatprep.subr.mxu0 %v8649_v21 }
 0x193   : > { %6346 = vmatpush3.msra.mxu1 %v1228_v44  ;;  %6381 = vmatpush3.msra.mxu0 %v1323_v45  ;;  %v1522_v44 = vld [vmem:[#allocation2 + $0x19] ss:$4 sm:$0x3]  ;;  %v1433_v45 = vsel %vm482_vm1, %v1427_v40, %v1431_v41  ;;  %v1800_v41 = vld [vmem:[%s11530_s3 + $0x750] sm:$0xff] }
 0x194   : > { %6347 = vmatprep.subr.mxu1 %v8649_v21  ;;  %6382 = vmatprep.subr.mxu0 %v8649_v21  ;;  %v1896_v40 = vld [vmem:[%s11530_s3 + $0x7d8] sm:$0xff] }
 0x195   : > { %6348 = vmatpush3.msra.mxu1 %v1227_v47  ;;  %6383 = vmatpush3.msra.mxu0 %v1322_v48  ;;  %v1528_v47 = vsel %vm482_vm1, %v1522_v44, %v1526_v42  ;;  %v1615_v48 = vld [vmem:[%s11530_s3 + $0x678] sm:$0xff]  ;;  %v1895_v42 = vld [vmem:[%s11530_s3 + $0x7d0] sm:$0xff]  ;;  %v1894_v44 = vld [vmem:[%s11530_s3 + $0x7c8] sm:$0xff] }
 0x196   : > { %6349 = vmatprep.subr.mxu1 %v8649_v21  ;;  %6384 = vmatprep.subr.mxu0 %v8649_v21 }
 0x197   : > { %6350 = vmatpush3.msra.mxu1 %v1226_v49  ;;  %6385 = vmatpush3.msra.mxu0 %v1321_v50  ;;  %v1710_v49 = vld [vmem:[%s11530_s3 + $0x6f8] sm:$0xff]  ;;  %v1614_v50 = vld [vmem:[%s11530_s3 + $0x670] sm:$0xff] }
 0x198   : > { %6351 = vmatprep.subr.mxu1 %v8649_v21  ;;  %6386 = vmatprep.subr.mxu0 %v8649_v21 }
 0x199   : > { %6352 = vmatpush3.msra.mxu1 %v1225_v51  ;;  %6387 = vmatpush3.msra.mxu0 %v1320_v52  ;;  %v1709_v51 = vld [vmem:[%s11530_s3 + $0x6f0] sm:$0xff]  ;;  %v1613_v52 = vld [vmem:[%s11530_s3 + $0x668] sm:$0xff] }
 0x19a   : > { %6353 = vmatprep.subr.mxu1 %v8649_v21  ;;  %6388 = vmatprep.subr.mxu0 %v8649_v21 }
 0x19b   : > { %6354 = vmatpush3.msra.mxu1 %v1224_v53  ;;  %6389 = vmatpush3.msra.mxu0 %v1319_v54  ;;  %v1708_v53 = vld [vmem:[%s11530_s3 + $0x6e8] sm:$0xff]  ;;  %v1612_v54 = vld [vmem:[%s11530_s3 + $0x660] sm:$0xff] }
 0x19c   : > { %6355 = vmatprep.subr.mxu1 %v8649_v21  ;;  %6390 = vmatprep.subr.mxu0 %v8649_v21 }
 0x19d   : > { %6356 = vmatpush3.msra.mxu1 %v1223_v55  ;;  %6391 = vmatpush3.msra.mxu0 %v1318_v56  ;;  %v1707_v55 = vld [vmem:[%s11530_s3 + $0x6e0] sm:$0xff]  ;;  %v1611_v56 = vld [vmem:[%s11530_s3 + $0x658] sm:$0xff] }
 0x19e   : > { %6357 = vmatprep.subr.mxu1 %v8649_v21  ;;  %6392 = vmatprep.subr.mxu0 %v8649_v21 }
 0x19f   : > { %6358 = vmatpush3.msra.mxu1 %v1222_v57  ;;  %6393 = vmatpush3.msra.mxu0 %v1317_v58  ;;  %v1706_v57 = vld [vmem:[%s11530_s3 + $0x6d8] sm:$0xff]  ;;  %v1610_v58 = vld [vmem:[%s11530_s3 + $0x650] sm:$0xff] }
 0x1a0   : > { %6359 = vmatprep.subr.mxu1 %v8649_v21  ;;  %6394 = vmatprep.subr.mxu0 %v8649_v21 }
 0x1a1   : > { %6360 = vmatpush3.msra.mxu1 %v1221_v61  ;;  %6395 = vmatpush3.msra.mxu0 %v1316_v62  ;;  %v1704_v61 = vld [vmem:[%s11530_s3 + $0x6c8] sm:$0xff]  ;;  %v1608_v62 = vld [vmem:[%s11530_s3 + $0x640] sm:$0xff] }
 0x1a2   : > { %6361 = vmatprep.subr.mxu1 %v8649_v21  ;;  %6396 = vmatprep.subr.mxu0 %v8649_v21 }
 0x1a3   : > { %6362 = vmatpush3.msra.mxu1 %v1220_v63  ;;  %6363 = vmatprep.mubr.msk.f32.mxu1 %vm7912_vm0, %v8649_v21  ;;  %v1703_v63 = vld [vmem:[%s11530_s3 + $0x6c0] sm:$0xff] }
 0x1a4   : > { %6397 = vmatpush3.msra.mxu0 %v1315_v3  ;;  %6398 = vmatprep.mubr.msk.f32.mxu0 %vm7912_vm0, %v8649_v21  ;;  %v1701_v3 = vld [vmem:[%s11530_s3 + $0x6b0] sm:$0xff] }
 0x1a5   : > { %6364 = vmatmul.mubr.f32.vlgmr.msra.gmra.mxu1 %v1243_v5  ;;  %6399 = vmatmul.mubr.f32.vlgmr.msra.gmra.mxu0 %v1338_v6  ;;  %v1700_v5 = vld [vmem:[%s11530_s3 + $0x6a8] sm:$0xff]  ;;  %v1604_v6 = vld [vmem:[%s11530_s3 + $0x620] sm:$0xff] }
 0x1a6   : > { %6401 = vmatprep.subr.mxu1 %v8649_v21  ;;  %6436 = vmatprep.subr.mxu0 %v8649_v21 }
 0x1a7   : > { %6402 = vmatpush3.msra.mxu1 %v1425_v7  ;;  %6437 = vmatpush3.msra.mxu0 %v1520_v8  ;;  %v1699_v7 = vld [vmem:[%s11530_s3 + $0x6a0] sm:$0xff] }
 0x1a8   : > { %6403 = vmatprep.subr.mxu1 %v8649_v21  ;;  %6438 = vmatprep.subr.mxu0 %v8649_v21  ;;  %v5156_v8 = vld [vmem:[%s11531_s4] ss:$0 sm:$0xff] }
 0x1a9   : > { %6404 = vmatpush3.msra.mxu1 %v1424_v9  ;;  %6439 = vmatpush3.msra.mxu0 %v1519_v10  ;;  %v1603_v9 = vld [vmem:[%s11530_s3 + $0x618] sm:$0xff] }
 0x1aa   : > { %6405 = vmatprep.subr.mxu1 %v8649_v21  ;;  %6440 = vmatprep.subr.mxu0 %v8649_v21  ;;  %v1698_v10 = vld [vmem:[%s11530_s3 + $0x698] sm:$0xff] }
 0x1ab   : > { %6406 = vmatpush3.msra.mxu1 %v1423_v11  ;;  %6441 = vmatpush3.msra.mxu0 %v1518_v12 }
 0x1ac   : > { %6407 = vmatprep.subr.mxu1 %v8649_v21  ;;  %6442 = vmatprep.subr.mxu0 %v8649_v21 }
 0x1ad   : > { %6408 = vmatpush3.msra.mxu1 %v1422_v13  ;;  %6443 = vmatpush3.msra.mxu0 %v1517_v14  ;;  %v1602_v14 = vld [vmem:[%s11530_s3 + $0x610] sm:$0xff] }
 0x1ae   : > { %6409 = vmatprep.subr.mxu1 %v8649_v21  ;;  %6444 = vmatprep.subr.mxu0 %v8649_v21 }
 0x1af   : > { %6410 = vmatpush3.msra.mxu1 %v1421_v15  ;;  %6445 = vmatpush3.msra.mxu0 %v1516_v16  ;;  %v1697_v15 = vld [vmem:[%s11530_s3 + $0x690] sm:$0xff] }
 0x1b0   : > { %6411 = vmatprep.subr.mxu1 %v8649_v21  ;;  %6446 = vmatprep.subr.mxu0 %v8649_v21 }
 0x1b1   : > { %6412 = vmatpush3.msra.mxu1 %v1420_v17  ;;  %6447 = vmatpush3.msra.mxu0 %v1515_v19  ;;  %v1619_v19 = vld [vmem:[#allocation2 + $0x5a] ss:$4 sm:$0x3] }
 0x1b2   : > { %6413 = vmatprep.subr.mxu1 %v8649_v21  ;;  %6448 = vmatprep.subr.mxu0 %v8649_v21 }
 0x1b3   : > { %6414 = vmatpush3.msra.mxu1 %v1419_v20  ;;  %6449 = vmatpush3.msra.mxu0 %v1514_v22  ;;  %v1714_v20 = vld [vmem:[#allocation2 + $0x5b] ss:$4 sm:$0x3] }
 0x1b4   : > { %6415 = vmatprep.subr.mxu1 %v8649_v21  ;;  %6450 = vmatprep.subr.mxu0 %v8649_v21 }
 0x1b5   : > { %6416 = vmatpush3.msra.mxu1 %v1418_v23  ;;  %6451 = vmatpush3.msra.mxu0 %v1513_v46  ;;  %v1601_v23 = vld [vmem:[%s11530_s3 + $0x608] sm:$0xff] }
 0x1b6   : > { %6417 = vmatprep.subr.mxu1 %v8649_v21  ;;  %6452 = vmatprep.subr.mxu0 %v8649_v21  ;;  %v1696_v46 = vld [vmem:[%s11530_s3 + $0x688] sm:$0xff] }
 0x1b7   : > { %6418 = vmatpush3.msra.mxu1 %v1417_v24  ;;  %6453 = vmatpush3.msra.mxu0 %v1512_v25  ;;  %v1600_v24 = vld [vmem:[%s11530_s3 + $0x600] sm:$0xff]  ;;  %v1617_v25 = vld [vmem:[#allocation2 + $0x1a] ss:$4 sm:$0x3] }
 0x1b8   : > { %6419 = vmatprep.subr.mxu1 %v8649_v21  ;;  %6454 = vmatprep.subr.mxu0 %v8649_v21 }
 0x1b9   : > { %6420 = vmatpush3.msra.mxu1 %v1416_v26  ;;  %6455 = vmatpush3.msra.mxu0 %v1511_v27  ;;  %v1621_v26 = vrot.slane %v1619_v19, 6  ;;  %v1716_v27 = vrot.slane %v1714_v20, 6  ;;  %v1993_v19 = vld [vmem:[%s11530_s3 + $0x868] sm:$0xff] }
 0x1ba   : > { %6421 = vmatprep.subr.mxu1 %v8649_v21  ;;  %6456 = vmatprep.subr.mxu0 %v8649_v21  ;;  %v2088_v20 = vld [vmem:[%s11530_s3 + $0x8e8] sm:$0xff] }
 0x1bb   : > { %6422 = vmatpush3.msra.mxu1 %v1415_v28  ;;  %6457 = vmatpush3.msra.mxu0 %v1510_v29  ;;  %v1695_v28 = vld [vmem:[%s11530_s3 + $0x680] sm:$0xff]  ;;  %v1712_v29 = vld [vmem:[#allocation2 + $0x1b] ss:$4 sm:$0x3] }
 0x1bc   : > { %6423 = vmatprep.subr.mxu1 %v8649_v21  ;;  %6458 = vmatprep.subr.mxu0 %v8649_v21 }
 0x1bd   : > { %6424 = vmatpush3.msra.mxu1 %v1414_v30  ;;  %6459 = vmatpush3.msra.mxu0 %v1509_v31  ;;  %v1623_v30 = vsel %vm482_vm1, %v1617_v25, %v1621_v26  ;;  %v1718_v31 = vsel %vm482_vm1, %v1712_v29, %v1716_v27  ;;  %v1990_v25 = vld [vmem:[%s11530_s3 + $0x850] sm:$0xff]  ;;  %v1989_v27 = vld [vmem:[%s11530_s3 + $0x848] sm:$0xff]  ;;  %v1988_v29 = vld [vmem:[%s11530_s3 + $0x840] sm:$0xff] }
 0x1be   : > { %6425 = vmatprep.subr.mxu1 %v8649_v21  ;;  %6460 = vmatprep.subr.mxu0 %v8649_v21  ;;  %v2085_v26 = vld [vmem:[%s11530_s3 + $0x8d0] sm:$0xff] }
 0x1bf   : > { %6426 = vmatpush3.msra.mxu1 %v1413_v32  ;;  %6461 = vmatpush3.msra.mxu0 %v1508_v33  ;;  %v1805_v32 = vld [vmem:[%s11530_s3 + $0x778] sm:$0xff] }
 0x1c0   : > { %6427 = vmatprep.subr.mxu1 %v8649_v21  ;;  %6462 = vmatprep.subr.mxu0 %v8649_v21  ;;  %v1900_v33 = vld [vmem:[%s11530_s3 + $0x7f8] sm:$0xff] }
 0x1c1   : > { %6428 = vmatpush3.msra.mxu1 %v1412_v18  ;;  %6463 = vmatpush3.msra.mxu0 %v1507_v34  ;;  %v1804_v18 = vld [vmem:[%s11530_s3 + $0x770] sm:$0xff] }
 0x1c2   : > { %6429 = vmatprep.subr.mxu1 %v8649_v21  ;;  %6464 = vmatprep.subr.mxu0 %v8649_v21  ;;  %v1899_v34 = vld [vmem:[%s11530_s3 + $0x7f0] sm:$0xff] }
 0x1c3   : > { %6430 = vmatpush3.msra.mxu1 %v1411_v37  ;;  %6465 = vmatpush3.msra.mxu0 %v1506_v38  ;;  %v1802_v37 = vld [vmem:[%s11530_s3 + $0x760] sm:$0xff] }
 0x1c4   : > { %6431 = vmatprep.subr.mxu1 %v8649_v21  ;;  %6466 = vmatprep.subr.mxu0 %v8649_v21  ;;  %v1897_v38 = vld [vmem:[%s11530_s3 + $0x7e0] sm:$0xff] }
 0x1c5   : > { %6432 = vmatpush3.msra.mxu1 %v1410_v39  ;;  %6433 = vmatprep.mubr.msk.f32.mxu1 %vm7912_vm0, %v8649_v21  ;;  %v1801_v39 = vld [vmem:[%s11530_s3 + $0x758] sm:$0xff] }
 0x1c6   : > { %6467 = vmatpush3.msra.mxu0 %v1505_v43  ;;  %6468 = vmatprep.mubr.msk.f32.mxu0 %vm7912_vm0, %v8649_v21  ;;  %v1799_v43 = vld [vmem:[%s11530_s3 + $0x748] sm:$0xff] }
 0x1c7   : > { %6434 = vmatmul.mubr.f32.vlgmr.msra.gmra.mxu1 %v1433_v45  ;;  %6469 = vmatmul.mubr.f32.vlgmr.msra.gmra.mxu0 %v1528_v47  ;;  %v1798_v45 = vld [vmem:[%s11530_s3 + $0x740] sm:$0xff] }
 0x1c8   : > { %6471 = vmatprep.subr.mxu1 %v8649_v21  ;;  %6506 = vmatprep.subr.mxu0 %v8649_v21  ;;  %v1893_v47 = vld [vmem:[%s11530_s3 + $0x7c0] sm:$0xff] }
 0x1c9   : > { %6472 = vmatpush3.msra.mxu1 %v1615_v48  ;;  %6507 = vmatpush3.msra.mxu0 %v1710_v49  ;;  %v1797_v48 = vld [vmem:[%s11530_s3 + $0x738] sm:$0xff] }
 0x1ca   : > { %6473 = vmatprep.subr.mxu1 %v8649_v21  ;;  %6508 = vmatprep.subr.mxu0 %v8649_v21  ;;  %v1892_v49 = vld [vmem:[%s11530_s3 + $0x7b8] sm:$0xff] }
 0x1cb   : > { %6474 = vmatpush3.msra.mxu1 %v1614_v50  ;;  %6509 = vmatpush3.msra.mxu0 %v1709_v51  ;;  %v1796_v50 = vld [vmem:[%s11530_s3 + $0x730] sm:$0xff] }
 0x1cc   : > { %6475 = vmatprep.subr.mxu1 %v8649_v21  ;;  %6510 = vmatprep.subr.mxu0 %v8649_v21  ;;  %v1891_v51 = vld [vmem:[%s11530_s3 + $0x7b0] sm:$0xff] }
 0x1cd   : > { %6476 = vmatpush3.msra.mxu1 %v1613_v52  ;;  %6511 = vmatpush3.msra.mxu0 %v1708_v53  ;;  %v1795_v52 = vld [vmem:[%s11530_s3 + $0x728] sm:$0xff] }
 0x1ce   : > { %6477 = vmatprep.subr.mxu1 %v8649_v21  ;;  %6512 = vmatprep.subr.mxu0 %v8649_v21  ;;  %v1890_v53 = vld [vmem:[%s11530_s3 + $0x7a8] sm:$0xff] }
 0x1cf   : > { %6478 = vmatpush3.msra.mxu1 %v1612_v54  ;;  %6513 = vmatpush3.msra.mxu0 %v1707_v55  ;;  %v1794_v54 = vld [vmem:[%s11530_s3 + $0x720] sm:$0xff] }
 0x1d0   : > { %6479 = vmatprep.subr.mxu1 %v8649_v21  ;;  %6514 = vmatprep.subr.mxu0 %v8649_v21  ;;  %v1889_v55 = vld [vmem:[%s11530_s3 + $0x7a0] sm:$0xff] }
 0x1d1   : > { %6480 = vmatpush3.msra.mxu1 %v1611_v56  ;;  %6515 = vmatpush3.msra.mxu0 %v1706_v57 }
 0x1d2   : > { %6481 = vmatprep.subr.mxu1 %v8649_v21  ;;  %6516 = vmatprep.subr.mxu0 %v8649_v21 }
 0x1d3   : > { %6482 = vmatpush3.msra.mxu1 %v1610_v58  ;;  %6517 = vmatpush3.msra.mxu0 %v1705_v59  ;;  %v1793_v58 = vld [vmem:[%s11530_s3 + $0x718] sm:$0xff] }
 0x1d4   : > { %6483 = vmatprep.subr.mxu1 %v8649_v21  ;;  %6518 = vmatprep.subr.mxu0 %v8649_v21  ;;  %v1888_v59 = vld [vmem:[%s11530_s3 + $0x798] sm:$0xff] }
 0x1d5   : > { %6484 = vmatpush3.msra.mxu1 %v1609_v60  ;;  %6519 = vmatpush3.msra.mxu0 %v1704_v61 }
 0x1d6   : > { %6485 = vmatprep.subr.mxu1 %v8649_v21  ;;  %6520 = vmatprep.subr.mxu0 %v8649_v21 }
 0x1d7   : > { %6486 = vmatpush3.msra.mxu1 %v1608_v62  ;;  %6521 = vmatpush3.msra.mxu0 %v1703_v63  ;;  %v1792_v63 = vld [vmem:[%s11530_s3 + $0x710] sm:$0xff] }
 0x1d8   : > { %6487 = vmatprep.subr.mxu1 %v8649_v21  ;;  %6522 = vmatprep.subr.mxu0 %v8649_v21 }
 0x1d9   : > { %6488 = vmatpush3.msra.mxu1 %v1607_v0  ;;  %6523 = vmatpush3.msra.mxu0 %v1702_v1  ;;  %v1887_v0 = vld [vmem:[%s11530_s3 + $0x790] sm:$0xff] }
 0x1da   : > { %6489 = vmatprep.subr.mxu1 %v8649_v21  ;;  %6524 = vmatprep.subr.mxu0 %v8649_v21 }
 0x1db   : > { %6490 = vmatpush3.msra.mxu1 %v1606_v2  ;;  %6525 = vmatpush3.msra.mxu0 %v1701_v3  ;;  %v1809_v2 = vld [vmem:[#allocation2 + $0x65] ss:$4 sm:$0x3]  ;;  %v1904_v3 = vld [vmem:[#allocation2 + $0x66] ss:$4 sm:$0x3] }
 0x1dc   : > { %6491 = vmatprep.subr.mxu1 %v8649_v21  ;;  %6526 = vmatprep.subr.mxu0 %v8649_v21 }
 0x1dd   : > { %6492 = vmatpush3.msra.mxu1 %v1605_v4  ;;  %6527 = vmatpush3.msra.mxu0 %v1700_v5  ;;  %v1791_v4 = vld [vmem:[%s11530_s3 + $0x708] sm:$0xff] }
 0x1de   : > { %6493 = vmatprep.subr.mxu1 %v8649_v21  ;;  %6528 = vmatprep.subr.mxu0 %v8649_v21  ;;  %v550_v11 = vpop.f32.mrf.mxu1  ;;  %v645_v12 = vpop.f32.mrf.mxu0  ;;  %v1886_v5 = vld [vmem:[%s11530_s3 + $0x788] sm:$0xff] }
 0x1df   : > { %6494 = vmatpush3.msra.mxu1 %v1604_v6  ;;  %6529 = vmatpush3.msra.mxu0 %v1699_v7  ;;  %v554_v13 = vadd.f32 %v5156_v8, %v550_v11  ;;  %v1790_v6 = vld [vmem:[%s11530_s3 + $0x700] sm:$0xff]  ;;  %v1811_v8 = vrot.slane %v1809_v2, 6  ;;  %v2278_v2 = vld [vmem:[%s11530_s3 + $0x9e8] sm:$0xff] }
 0x1e0   : > { %6495 = vmatprep.subr.mxu1 %v8649_v21  ;;  %6530 = vmatprep.subr.mxu0 %v8649_v21  ;;  %v6085_v16 = vpop.f32.mrf.mxu1  ;;  %v6120_v17 = vpop.f32.mrf.mxu0  ;;  %v1807_v7 = vld [vmem:[#allocation2 + $0x25] ss:$4 sm:$0x3]  ;;  %v1902_v11 = vld [vmem:[#allocation2 + $0x26] ss:$4 sm:$0x3] }
 0x1e1   : > { %6496 = vmatpush3.msra.mxu1 %v1603_v9  ;;  %6531 = vmatpush3.msra.mxu0 %v1698_v10  ;;  %v9056_v22 = vadd.f32 %v645_v12, %v554_v13  ;;  %v1906_v9 = vrot.slane %v1904_v3, 6  ;;  %v1885_v10 = vld [vmem:[%s11530_s3 + $0x780] sm:$0xff]  ;;  %v1813_v12 = vsel %vm482_vm1, %v1807_v7, %v1811_v8  ;;  %v1994_v16 = vld [vmem:[%s11530_s3 + $0x870] sm:$0xff] }
 0x1e2   : > { %6497 = vmatprep.subr.mxu1 %v8649_v21  ;;  %6532 = vmatprep.subr.mxu0 %v8649_v21  ;;  %v2089_v17 = vld [vmem:[%s11530_s3 + $0x8f0] sm:$0xff]  ;;  %v2182_v3 = vld [vmem:[%s11530_s3 + $0x960] sm:$0xff] }
 0x1e3   : > { %6498 = vmatpush3.msra.mxu1 %v1602_v14  ;;  %6533 = vmatpush3.msra.mxu0 %v1697_v15  ;;  %v1908_v13 = vsel %vm482_vm1, %v1902_v11, %v1906_v9  ;;  %v1995_v14 = vld [vmem:[%s11530_s3 + $0x878] sm:$0xff]  ;;  %v2180_v7 = vld [vmem:[%s11530_s3 + $0x950] sm:$0xff]  ;;  %v2179_v9 = vld [vmem:[%s11530_s3 + $0x948] sm:$0xff] }
 0x1e4   : > { %6499 = vmatprep.subr.mxu1 %v8649_v21  ;;  %6534 = vmatprep.subr.mxu0 %v8649_v21  ;;  %v2090_v15 = vld [vmem:[%s11530_s3 + $0x8f8] sm:$0xff]  ;;  %v2275_v8 = vld [vmem:[%s11530_s3 + $0x9d0] sm:$0xff]  ;;  %v2178_v11 = vld [vmem:[%s11530_s3 + $0x940] sm:$0xff] }
 0x1e5   : > { %6500 = vmatpush3.msra.mxu1 %v1601_v23  ;;  %6535 = vmatpush3.msra.mxu0 %v1696_v46  ;;  %v2087_v23 = vld [vmem:[%s11530_s3 + $0x8e0] sm:$0xff]  ;;  %v1991_v46 = vld [vmem:[%s11530_s3 + $0x858] sm:$0xff] }
 0x1e6   : > { %6501 = vmatprep.subr.mxu1 %v8649_v21  ;;  %6536 = vmatprep.subr.mxu0 %v8649_v21 }
 0x1e7   : > { %6502 = vmatpush3.msra.mxu1 %v1600_v24  ;;  %6503 = vmatprep.mubr.msk.f32.mxu1 %vm7912_vm0, %v8649_v21  ;;  %v2086_v24 = vld [vmem:[%s11530_s3 + $0x8d8] sm:$0xff] }
 0x1e8   : > { %6537 = vmatpush3.msra.mxu0 %v1695_v28  ;;  %6538 = vmatprep.mubr.msk.f32.mxu0 %vm7912_vm0, %v8649_v21  ;;  %v2084_v28 = vld [vmem:[%s11530_s3 + $0x8c8] sm:$0xff] }
 0x1e9   : > { %6504 = vmatmul.mubr.f32.vlgmr.msra.gmra.mxu1 %v1623_v30  ;;  %6539 = vmatmul.mubr.f32.vlgmr.msra.gmra.mxu0 %v1718_v31  ;;  %v2083_v30 = vld [vmem:[%s11530_s3 + $0x8c0] sm:$0xff] }
 0x1ea   : > { %6541 = vmatprep.subr.mxu1 %v8649_v21  ;;  %6576 = vmatprep.subr.mxu0 %v8649_v21  ;;  %v9281_v31 = vld [vmem:[#allocation2] sm:$0xff] }
 0x1eb   : > { %6542 = vmatpush3.msra.mxu1 %v1805_v32  ;;  %6577 = vmatpush3.msra.mxu0 %v1900_v33  ;;  %v2082_v32 = vld [vmem:[%s11530_s3 + $0x8b8] sm:$0xff]  ;;  %v1986_v33 = vld [vmem:[%s11530_s3 + $0x830] sm:$0xff] }
 0x1ec   : > { %6543 = vmatprep.subr.mxu1 %v8649_v21  ;;  %6578 = vmatprep.subr.mxu0 %v8649_v21 }
 0x1ed   : > { %6544 = vmatpush3.msra.mxu1 %v1804_v18  ;;  %6579 = vmatpush3.msra.mxu0 %v1899_v34  ;;  %v2081_v18 = vld [vmem:[%s11530_s3 + $0x8b0] sm:$0xff]  ;;  %v1985_v34 = vld [vmem:[%s11530_s3 + $0x828] sm:$0xff] }
 0x1ee   : > { %6545 = vmatprep.subr.mxu1 %v8649_v21  ;;  %6580 = vmatprep.subr.mxu0 %v8649_v21 }
 0x1ef   : > { %6546 = vmatpush3.msra.mxu1 %v1803_v35  ;;  %6581 = vmatpush3.msra.mxu0 %v1898_v36  ;;  %v2080_v35 = vld [vmem:[%s11530_s3 + $0x8a8] sm:$0xff]  ;;  %v1984_v36 = vld [vmem:[%s11530_s3 + $0x820] sm:$0xff] }
 0x1f0   : > { %6547 = vmatprep.subr.mxu1 %v8649_v21  ;;  %6582 = vmatprep.subr.mxu0 %v8649_v21 }
 0x1f1   : > { %6548 = vmatpush3.msra.mxu1 %v1802_v37  ;;  %6583 = vmatpush3.msra.mxu0 %v1897_v38  ;;  %v2079_v37 = vld [vmem:[%s11530_s3 + $0x8a0] sm:$0xff] }
 0x1f2   : > { %6549 = vmatprep.subr.mxu1 %v8649_v21  ;;  %6584 = vmatprep.subr.mxu0 %v8649_v21 }
 0x1f3   : > { %6550 = vmatpush3.msra.mxu1 %v1801_v39  ;;  %6585 = vmatpush3.msra.mxu0 %v1896_v40  ;;  %v1983_v40 = vld [vmem:[%s11530_s3 + $0x818] sm:$0xff] }
 0x1f4   : > { %6551 = vmatprep.subr.mxu1 %v8649_v21  ;;  %6586 = vmatprep.subr.mxu0 %v8649_v21 }
 0x1f5   : > { %6552 = vmatpush3.msra.mxu1 %v1800_v41  ;;  %6587 = vmatpush3.msra.mxu0 %v1895_v42  ;;  %v2078_v41 = vld [vmem:[%s11530_s3 + $0x898] sm:$0xff] }
 0x1f6   : > { %6553 = vmatprep.subr.mxu1 %v8649_v21  ;;  %6588 = vmatprep.subr.mxu0 %v8649_v21 }
 0x1f7   : > { %6554 = vmatpush3.msra.mxu1 %v1799_v43  ;;  %6589 = vmatpush3.msra.mxu0 %v1894_v44 }
 0x1f8   : > { %6555 = vmatprep.subr.mxu1 %v8649_v21  ;;  %6590 = vmatprep.subr.mxu0 %v8649_v21 }
 0x1f9   : > { %6556 = vmatpush3.msra.mxu1 %v1798_v45  ;;  %6591 = vmatpush3.msra.mxu0 %v1893_v47  ;;  %v1982_v45 = vld [vmem:[%s11530_s3 + $0x810] sm:$0xff] }
 0x1fa   : > { %6557 = vmatprep.subr.mxu1 %v8649_v21  ;;  %6592 = vmatprep.subr.mxu0 %v8649_v21  ;;  %v2077_v47 = vld [vmem:[%s11530_s3 + $0x890] sm:$0xff] }
 0x1fb   : > { %6558 = vmatpush3.msra.mxu1 %v1797_v48  ;;  %6593 = vmatpush3.msra.mxu0 %v1892_v49  ;;  %v1999_v49 = vld [vmem:[#allocation2 + $0x67] ss:$4 sm:$0x3] }
 0x1fc   : > { %6559 = vmatprep.subr.mxu1 %v8649_v21  ;;  %6594 = vmatprep.subr.mxu0 %v8649_v21 }
 0x1fd   : > { %6560 = vmatpush3.msra.mxu1 %v1796_v50  ;;  %6595 = vmatpush3.msra.mxu0 %v1891_v51  ;;  %v2094_v50 = vld [vmem:[#allocation2 + $0x68] ss:$4 sm:$0x3] }
 0x1fe   : > { %6561 = vmatprep.subr.mxu1 %v8649_v21  ;;  %6596 = vmatprep.subr.mxu0 %v8649_v21  ;;  %v1981_v51 = vld [vmem:[%s11530_s3 + $0x808] sm:$0xff] }
 0x1ff   : > { %6562 = vmatpush3.msra.mxu1 %v1795_v52  ;;  %6597 = vmatpush3.msra.mxu0 %v1890_v53  ;;  %v740_v56 = vpop.f32.mrf.mxu1  ;;  %v835_v57 = vpop.f32.mrf.mxu0  ;;  %v2076_v52 = vld [vmem:[%s11530_s3 + $0x888] sm:$0xff]  ;;  %v1980_v53 = vld [vmem:[%s11530_s3 + $0x800] sm:$0xff] }
 0x200   : > { %6563 = vmatprep.subr.mxu1 %v8649_v21  ;;  %6598 = vmatprep.subr.mxu0 %v8649_v21  ;;  %v744_v60 = vadd.f32 %v740_v56, %v9056_v22  ;;  %v1992_v22 = vld [vmem:[%s11530_s3 + $0x860] sm:$0xff]  ;;  %v2096_v56 = vrot.slane %v2094_v50, 6 }
 0x201   : > { %6564 = vmatpush3.msra.mxu1 %v1794_v54  ;;  %6599 = vmatpush3.msra.mxu0 %v1889_v55  ;;  %v6155_v61 = vpop.f32.mrf.mxu1  ;;  %v6190_v62 = vpop.f32.mrf.mxu0  ;;  %v1997_v54 = vld [vmem:[#allocation2 + $0x27] ss:$4 sm:$0x3]  ;;  %v2001_v55 = vrot.slane %v1999_v49, 6 }
 0x202   : > { %6565 = vmatprep.subr.mxu1 %v8649_v21  ;;  %6600 = vmatprep.subr.mxu0 %v8649_v21  ;;  %v9193_v1 = vadd.f32 %v835_v57, %v744_v60  ;;  %v2075_v57 = vld [vmem:[%s11530_s3 + $0x880] sm:$0xff]  ;;  %v2185_v61 = vld [vmem:[%s11530_s3 + $0x978] sm:$0xff]  ;;  %v2468_v49 = vld [vmem:[%s11530_s3 + $0xae8] sm:$0xff] }
 0x203   : > { %6566 = vmatpush3.msra.mxu1 %v1793_v58  ;;  %6601 = vmatpush3.msra.mxu0 %v1888_v59  ;;  %v2092_v58 = vld [vmem:[#allocation2 + $0x28] ss:$4 sm:$0x3]  ;;  %v2003_v59 = vsel %vm482_vm1, %v1997_v54, %v2001_v55  ;;  %v2280_v62 = vld [vmem:[%s11530_s3 + $0x9f8] sm:$0xff]  ;;  %v2372_v50 = vld [vmem:[%s11530_s3 + $0xa60] sm:$0xff] }
 0x204   : > { %6567 = vmatprep.subr.mxu1 %v8649_v21  ;;  %6602 = vmatprep.subr.mxu0 %v8649_v21  ;;  %v2098_v60 = vsel %vm482_vm1, %v2092_v58, %v2096_v56  ;;  %v2370_v54 = vld [vmem:[%s11530_s3 + $0xa50] sm:$0xff]  ;;  %v2369_v56 = vld [vmem:[%s11530_s3 + $0xa48] sm:$0xff]  ;;  %v2368_v58 = vld [vmem:[%s11530_s3 + $0xa40] sm:$0xff] }
 0x205   : > { %6568 = vmatpush3.msra.mxu1 %v1792_v63  ;;  %6603 = vmatpush3.msra.mxu0 %v1887_v0  ;;  %v2184_v63 = vld [vmem:[%s11530_s3 + $0x970] sm:$0xff] }
 0x206   : > { %6569 = vmatprep.subr.mxu1 %v8649_v21  ;;  %6604 = vmatprep.subr.mxu0 %v8649_v21  ;;  %v2279_v0 = vld [vmem:[%s11530_s3 + $0x9f0] sm:$0xff] }
 0x207   : > { %6570 = vmatpush3.msra.mxu1 %v1791_v4  ;;  %6605 = vmatpush3.msra.mxu0 %v1886_v5  ;;  %v2277_v4 = vld [vmem:[%s11530_s3 + $0x9e0] sm:$0xff]  ;;  %v2181_v5 = vld [vmem:[%s11530_s3 + $0x958] sm:$0xff]  ;;  %v2465_v55 = vld [vmem:[%s11530_s3 + $0xad0] sm:$0xff] }
 0x208   : > { %6571 = vmatprep.subr.mxu1 %v8649_v21  ;;  %6606 = vmatprep.subr.mxu0 %v8649_v21 }
 0x209   : > { %6572 = vmatpush3.msra.mxu1 %v1790_v6  ;;  %6573 = vmatprep.mubr.msk.f32.mxu1 %vm7912_vm0, %v8649_v21  ;;  %v2276_v6 = vld [vmem:[%s11530_s3 + $0x9d8] sm:$0xff] }
 0x20a   : > { %6607 = vmatpush3.msra.mxu0 %v1885_v10  ;;  %6608 = vmatprep.mubr.msk.f32.mxu0 %vm7912_vm0, %v8649_v21  ;;  %v2274_v10 = vld [vmem:[%s11530_s3 + $0x9c8] sm:$0xff] }
 0x20b   : > { %6574 = vmatmul.mubr.f32.vlgmr.msra.gmra.mxu1 %v1813_v12  ;;  %6609 = vmatmul.mubr.f32.vlgmr.msra.gmra.mxu0 %v1908_v13  ;;  %v2273_v12 = vld [vmem:[%s11530_s3 + $0x9c0] sm:$0xff]  ;;  %v2177_v13 = vld [vmem:[%s11530_s3 + $0x938] sm:$0xff] }
 0x20c   : > { %6611 = vmatprep.subr.mxu1 %v8649_v21  ;;  %6646 = vmatprep.subr.mxu0 %v8649_v21 }
 0x20d   : > { %6612 = vmatpush3.msra.mxu1 %v1995_v14  ;;  %6647 = vmatpush3.msra.mxu0 %v2090_v15  ;;  %v2272_v14 = vld [vmem:[%s11530_s3 + $0x9b8] sm:$0xff]  ;;  %v2176_v15 = vld [vmem:[%s11530_s3 + $0x930] sm:$0xff] }
 0x20e   : > { %6613 = vmatprep.subr.mxu1 %v8649_v21  ;;  %6648 = vmatprep.subr.mxu0 %v8649_v21 }
 0x20f   : > { %6614 = vmatpush3.msra.mxu1 %v1994_v16  ;;  %6649 = vmatpush3.msra.mxu0 %v2089_v17  ;;  %v2271_v16 = vld [vmem:[%s11530_s3 + $0x9b0] sm:$0xff]  ;;  %v2175_v17 = vld [vmem:[%s11530_s3 + $0x928] sm:$0xff] }
 0x210   : > { %6615 = vmatprep.subr.mxu1 %v8649_v21  ;;  %6650 = vmatprep.subr.mxu0 %v8649_v21 }
 0x211   : > { %6616 = vmatpush3.msra.mxu1 %v1993_v19  ;;  %6651 = vmatpush3.msra.mxu0 %v2088_v20  ;;  %v2270_v19 = vld [vmem:[%s11530_s3 + $0x9a8] sm:$0xff]  ;;  %v2174_v20 = vld [vmem:[%s11530_s3 + $0x920] sm:$0xff] }
 0x212   : > { %6617 = vmatprep.subr.mxu1 %v8649_v21  ;;  %6652 = vmatprep.subr.mxu0 %v8649_v21 }
 0x213   : > { %6618 = vmatpush3.msra.mxu1 %v1992_v22  ;;  %6653 = vmatpush3.msra.mxu0 %v2087_v23  ;;  %v2269_v22 = vld [vmem:[%s11530_s3 + $0x9a0] sm:$0xff] }
 0x214   : > { %6619 = vmatprep.subr.mxu1 %v8649_v21  ;;  %6654 = vmatprep.subr.mxu0 %v8649_v21 }
 0x215   : > { %6620 = vmatpush3.msra.mxu1 %v1991_v46  ;;  %6655 = vmatpush3.msra.mxu0 %v2086_v24  ;;  %v2173_v24 = vld [vmem:[%s11530_s3 + $0x918] sm:$0xff] }
 0x216   : > { %6621 = vmatprep.subr.mxu1 %v8649_v21  ;;  %6656 = vmatprep.subr.mxu0 %v8649_v21 }
 0x217   : > { %6622 = vmatpush3.msra.mxu1 %v1990_v25  ;;  %6657 = vmatpush3.msra.mxu0 %v2085_v26  ;;  %v2268_v25 = vld [vmem:[%s11530_s3 + $0x998] sm:$0xff] }
 0x218   : > { %6623 = vmatprep.subr.mxu1 %v8649_v21  ;;  %6658 = vmatprep.subr.mxu0 %v8649_v21  ;;  %v1987_v21 = vld [vmem:[%s11530_s3 + $0x838] sm:$0xff] }
 0x219   : > { %6624 = vmatpush3.msra.mxu1 %v1989_v27  ;;  %6659 = vmatpush3.msra.mxu0 %v2084_v28 }
 0x21a   : > { %6625 = vmatprep.subr.mxu1 %v9281_v31  ;;  %6660 = vmatprep.subr.mxu0 %v9281_v31 }
 0x21b   : > { %6626 = vmatpush3.msra.mxu1 %v1988_v29  ;;  %6661 = vmatpush3.msra.mxu0 %v2083_v30  ;;  %v2172_v29 = vld [vmem:[%s11530_s3 + $0x910] sm:$0xff] }
 0x21c   : > { %6627 = vmatprep.subr.mxu1 %v9281_v31  ;;  %6662 = vmatprep.subr.mxu0 %v9281_v31  ;;  %v2267_v30 = vld [vmem:[%s11530_s3 + $0x990] sm:$0xff] }
 0x21d   : > { %6628 = vmatpush3.msra.mxu1 %v1987_v21  ;;  %6663 = vmatpush3.msra.mxu0 %v2082_v32  ;;  %v2189_v32 = vld [vmem:[#allocation2 + $0x69] ss:$4 sm:$0x3] }
 0x21e   : > { %6629 = vmatprep.subr.mxu1 %v9281_v31  ;;  %6664 = vmatprep.subr.mxu0 %v9281_v31 }
 0x21f   : > { %6630 = vmatpush3.msra.mxu1 %v1986_v33  ;;  %6665 = vmatpush3.msra.mxu0 %v2081_v18  ;;  %v2284_v33 = vld [vmem:[#allocation2 + $0x6a] ss:$4 sm:$0x3] }
 0x220   : > { %6631 = vmatprep.subr.mxu1 %v9281_v31  ;;  %6666 = vmatprep.subr.mxu0 %v9281_v31  ;;  %v2171_v18 = vld [vmem:[%s11530_s3 + $0x908] sm:$0xff] }
 0x221   : > { %6632 = vmatpush3.msra.mxu1 %v1985_v34  ;;  %6667 = vmatpush3.msra.mxu0 %v2080_v35  ;;  %v930_v38 = vpop.f32.mrf.mxu1  ;;  %v1025_v39 = vpop.f32.mrf.mxu0  ;;  %v2266_v34 = vld [vmem:[%s11530_s3 + $0x988] sm:$0xff]  ;;  %v2170_v35 = vld [vmem:[%s11530_s3 + $0x900] sm:$0xff] }
 0x222   : > { %6633 = vmatprep.subr.mxu1 %v9281_v31  ;;  %6668 = vmatprep.subr.mxu0 %v9281_v31  ;;  %v934_v42 = vadd.f32 %v930_v38, %v9193_v1  ;;  %v2183_v1 = vld [vmem:[%s11530_s3 + $0x968] sm:$0xff]  ;;  %v2286_v38 = vrot.slane %v2284_v33, 6  ;;  %v2562_v33 = vld [vmem:[%s11530_s3 + $0xb60] sm:$0xff] }
 0x223   : > { %6634 = vmatpush3.msra.mxu1 %v1984_v36  ;;  %6669 = vmatpush3.msra.mxu0 %v2079_v37  ;;  %v6225_v43 = vpop.f32.mrf.mxu1  ;;  %v6260_v44 = vpop.f32.mrf.mxu0  ;;  %v2187_v36 = vld [vmem:[#allocation2 + $0x29] ss:$4 sm:$0x3]  ;;  %v2191_v37 = vrot.slane %v2189_v32, 6 }
 0x224   : > { %6635 = vmatprep.subr.mxu1 %v9281_v31  ;;  %6670 = vmatprep.subr.mxu0 %v9281_v31  ;;  %v9332_v48 = vadd.f32 %v1025_v39, %v934_v42  ;;  %v2265_v39 = vld [vmem:[%s11530_s3 + $0x980] sm:$0xff]  ;;  %v2375_v43 = vld [vmem:[%s11530_s3 + $0xa78] sm:$0xff]  ;;  %v2658_v32 = vld [vmem:[%s11530_s3 + $0xbe8] sm:$0xff] }
 0x225   : > { %6636 = vmatpush3.msra.mxu1 %v1983_v40  ;;  %6671 = vmatpush3.msra.mxu0 %v2078_v41  ;;  %v2282_v40 = vld [vmem:[#allocation2 + $0x2a] ss:$4 sm:$0x3]  ;;  %v2193_v41 = vsel %vm482_vm1, %v2187_v36, %v2191_v37  ;;  %v2470_v44 = vld [vmem:[%s11530_s3 + $0xaf8] sm:$0xff]  ;;  %v2560_v36 = vld [vmem:[%s11530_s3 + $0xb50] sm:$0xff] }
 0x226   : > { %6637 = vmatprep.subr.mxu1 %v9281_v31  ;;  %6672 = vmatprep.subr.mxu0 %v9281_v31  ;;  %v2288_v42 = vsel %vm482_vm1, %v2282_v40, %v2286_v38  ;;  %v2655_v37 = vld [vmem:[%s11530_s3 + $0xbd0] sm:$0xff]  ;;  %v2559_v38 = vld [vmem:[%s11530_s3 + $0xb48] sm:$0xff]  ;;  %v2558_v40 = vld [vmem:[%s11530_s3 + $0xb40] sm:$0xff] }
 0x227   : > { %6638 = vmatpush3.msra.mxu1 %v1982_v45  ;;  %6673 = vmatpush3.msra.mxu0 %v2077_v47  ;;  %v2374_v45 = vld [vmem:[%s11530_s3 + $0xa70] sm:$0xff] }
 0x228   : > { %6639 = vmatprep.subr.mxu1 %v9281_v31  ;;  %6674 = vmatprep.subr.mxu0 %v9281_v31  ;;  %v2469_v47 = vld [vmem:[%s11530_s3 + $0xaf0] sm:$0xff] }
 0x229   : > { %6640 = vmatpush3.msra.mxu1 %v1981_v51  ;;  %6675 = vmatpush3.msra.mxu0 %v2076_v52  ;;  %v2467_v51 = vld [vmem:[%s11530_s3 + $0xae0] sm:$0xff]  ;;  %v2371_v52 = vld [vmem:[%s11530_s3 + $0xa58] sm:$0xff] }
 0x22a   : > { %6641 = vmatprep.subr.mxu1 %v9281_v31  ;;  %6676 = vmatprep.subr.mxu0 %v9281_v31 }
 0x22b   : > { %6642 = vmatpush3.msra.mxu1 %v1980_v53  ;;  %6643 = vmatprep.mubr.msk.f32.mxu1 %vm7912_vm0, %v9281_v31  ;;  %v2466_v53 = vld [vmem:[%s11530_s3 + $0xad8] sm:$0xff] }
 0x22c   : > { %6677 = vmatpush3.msra.mxu0 %v2075_v57  ;;  %6678 = vmatprep.mubr.msk.f32.mxu0 %vm7912_vm0, %v9281_v31  ;;  %v2464_v57 = vld [vmem:[%s11530_s3 + $0xac8] sm:$0xff] }
 0x22d   : > { %6644 = vmatmul.mubr.f32.vlgmr.msra.gmra.mxu1 %v2003_v59  ;;  %6679 = vmatmul.mubr.f32.vlgmr.msra.gmra.mxu0 %v2098_v60  ;;  %v2463_v59 = vld [vmem:[%s11530_s3 + $0xac0] sm:$0xff]  ;;  %v2367_v60 = vld [vmem:[%s11530_s3 + $0xa38] sm:$0xff] }
 0x22e   : > { %6681 = vmatprep.subr.mxu1 %v9281_v31  ;;  %6716 = vmatprep.subr.mxu0 %v9281_v31 }
 0x22f   : > { %6682 = vmatpush3.msra.mxu1 %v2185_v61  ;;  %6717 = vmatpush3.msra.mxu0 %v2280_v62  ;;  %v2462_v61 = vld [vmem:[%s11530_s3 + $0xab8] sm:$0xff]  ;;  %v2366_v62 = vld [vmem:[%s11530_s3 + $0xa30] sm:$0xff] }
 0x230   : > { %6683 = vmatprep.subr.mxu1 %v9281_v31  ;;  %6718 = vmatprep.subr.mxu0 %v9281_v31 }
 0x231   : > { %6684 = vmatpush3.msra.mxu1 %v2184_v63  ;;  %6719 = vmatpush3.msra.mxu0 %v2279_v0  ;;  %v2461_v63 = vld [vmem:[%s11530_s3 + $0xab0] sm:$0xff]  ;;  %v2365_v0 = vld [vmem:[%s11530_s3 + $0xa28] sm:$0xff] }
 0x232   : > { %6685 = vmatprep.subr.mxu1 %v9281_v31  ;;  %6720 = vmatprep.subr.mxu0 %v9281_v31 }
 0x233   : > { %6686 = vmatpush3.msra.mxu1 %v2183_v1  ;;  %6721 = vmatpush3.msra.mxu0 %v2278_v2  ;;  %v2460_v1 = vld [vmem:[%s11530_s3 + $0xaa8] sm:$0xff]  ;;  %v2364_v2 = vld [vmem:[%s11530_s3 + $0xa20] sm:$0xff] }
 0x234   : > { %6687 = vmatprep.subr.mxu1 %v9281_v31  ;;  %6722 = vmatprep.subr.mxu0 %v9281_v31 }
 0x235   : > { %6688 = vmatpush3.msra.mxu1 %v2182_v3  ;;  %6723 = vmatpush3.msra.mxu0 %v2277_v4  ;;  %v2459_v3 = vld [vmem:[%s11530_s3 + $0xaa0] sm:$0xff] }
 0x236   : > { %6689 = vmatprep.subr.mxu1 %v9281_v31  ;;  %6724 = vmatprep.subr.mxu0 %v9281_v31 }
 0x237   : > { %6690 = vmatpush3.msra.mxu1 %v2181_v5  ;;  %6725 = vmatpush3.msra.mxu0 %v2276_v6  ;;  %v2363_v6 = vld [vmem:[%s11530_s3 + $0xa18] sm:$0xff] }
 0x238   : > { %6691 = vmatprep.subr.mxu1 %v9281_v31  ;;  %6726 = vmatprep.subr.mxu0 %v9281_v31 }
 0x239   : > { %6692 = vmatpush3.msra.mxu1 %v2180_v7  ;;  %6727 = vmatpush3.msra.mxu0 %v2275_v8  ;;  %v2458_v7 = vld [vmem:[%s11530_s3 + $0xa98] sm:$0xff] }
 0x23a   : > { %6693 = vmatprep.subr.mxu1 %v9281_v31  ;;  %6728 = vmatprep.subr.mxu0 %v9281_v31 }
 0x23b   : > { %6694 = vmatpush3.msra.mxu1 %v2179_v9  ;;  %6729 = vmatpush3.msra.mxu0 %v2274_v10 }
 0x23c   : > { %6695 = vmatprep.subr.mxu1 %v9281_v31  ;;  %6730 = vmatprep.subr.mxu0 %v9281_v31 }
 0x23d   : > { %6696 = vmatpush3.msra.mxu1 %v2178_v11  ;;  %6731 = vmatpush3.msra.mxu0 %v2273_v12  ;;  %v2362_v11 = vld [vmem:[%s11530_s3 + $0xa10] sm:$0xff] }
 0x23e   : > { %6697 = vmatprep.subr.mxu1 %v9281_v31  ;;  %6732 = vmatprep.subr.mxu0 %v9281_v31  ;;  %v2457_v12 = vld [vmem:[%s11530_s3 + $0xa90] sm:$0xff] }
 0x23f   : > { %6698 = vmatpush3.msra.mxu1 %v2177_v13  ;;  %6733 = vmatpush3.msra.mxu0 %v2272_v14  ;;  %v2379_v14 = vld [vmem:[#allocation2 + $0x6b] ss:$4 sm:$0x3] }
 0x240   : > { %6699 = vmatprep.subr.mxu1 %v9281_v31  ;;  %6734 = vmatprep.subr.mxu0 %v9281_v31 }
 0x241   : > { %6700 = vmatpush3.msra.mxu1 %v2176_v15  ;;  %6735 = vmatpush3.msra.mxu0 %v2271_v16  ;;  %v2474_v15 = vld [vmem:[#allocation2 + $0x75] ss:$4 sm:$0x3]  ;;  %v2361_v16 = vld [vmem:[%s11530_s3 + $0xa08] sm:$0xff] }
 0x242   : > { %6701 = vmatprep.subr.mxu1 %v9281_v31  ;;  %6736 = vmatprep.subr.mxu0 %v9281_v31  ;;  %v1120_v23 = vpop.f32.mrf.mxu1 }
 0x243   : > { %6702 = vmatpush3.msra.mxu1 %v2175_v17  ;;  %6737 = vmatpush3.msra.mxu0 %v2270_v19  ;;  %v1124_v46 = vadd.f32 %v1120_v23, %v9332_v48  ;;  %v2373_v48 = vld [vmem:[%s11530_s3 + $0xa68] sm:$0xff]  ;;  %v2360_v19 = vld [vmem:[%s11530_s3 + $0xa00] sm:$0xff] }
 0x244   : > { %6703 = vmatprep.subr.mxu1 %v9281_v31  ;;  %6738 = vmatprep.subr.mxu0 %v9281_v31  ;;  %v6295_v26 = vpop.f32.mrf.mxu1  ;;  %v1215_v27 = vpop.f32.mrf.mxu0  ;;  %v2456_v17 = vld [vmem:[%s11530_s3 + $0xa88] sm:$0xff]  ;;  %v2455_v23 = vld [vmem:[%s11530_s3 + $0xa80] sm:$0xff] }
 0x245   : > { %6704 = vmatpush3.msra.mxu1 %v2174_v20  ;;  %6739 = vmatpush3.msra.mxu0 %v2269_v22  ;;  %v9461_v28 = vadd.f32 %v1215_v27, %v1124_v46  ;;  %v2381_v20 = vrot.slane %v2379_v14, 6  ;;  %v2476_v22 = vrot.slane %v2474_v15, 6  ;;  %v2377_v46 = vld [vmem:[#allocation2 + $0x2b] ss:$4 sm:$0x3]  ;;  %v2565_v27 = vld [vmem:[%s11530_s3 + $0xb78] sm:$0xff] }
 0x246   : > { %6705 = vmatprep.subr.mxu1 %v9281_v31  ;;  %6740 = vmatprep.subr.mxu0 %v9281_v31  ;;  %v6330_v21 = vpop.f32.mrf.mxu0  ;;  %v2848_v14 = vld [vmem:[%s11530_s3 + $0xce8] sm:$0xff]  ;;  %v2752_v15 = vld [vmem:[%s11530_s3 + $0xc60] sm:$0xff] }
 0x247   : > { %6706 = vmatpush3.msra.mxu1 %v2173_v24  ;;  %6741 = vmatpush3.msra.mxu0 %v2268_v25  ;;  %v2472_v24 = vld [vmem:[#allocation2 + $0x35] ss:$4 sm:$0x3]  ;;  %v2383_v25 = vsel %vm482_vm1, %v2377_v46, %v2381_v20  ;;  %v2563_v21 = vld [vmem:[%s11530_s3 + $0xb68] sm:$0xff] }
 0x248   : > { %6707 = vmatprep.subr.mxu1 %v9281_v31  ;;  %6742 = vmatprep.subr.mxu0 %v9281_v31  ;;  %v2478_v26 = vsel %vm482_vm1, %v2472_v24, %v2476_v22  ;;  %v2750_v20 = vld [vmem:[%s11530_s3 + $0xc50] sm:$0xff]  ;;  %v2844_v46 = vld [vmem:[%s11530_s3 + $0xcc8] sm:$0xff]  ;;  %v2748_v24 = vld [vmem:[%s11530_s3 + $0xc40] sm:$0xff] }
 0x249   : > { %6708 = vmatpush3.msra.mxu1 %v2172_v29  ;;  %6743 = vmatpush3.msra.mxu0 %v2267_v30  ;;  %v2564_v29 = vld [vmem:[%s11530_s3 + $0xb70] sm:$0xff] }
 0x24a   : > { %6709 = vmatprep.subr.mxu1 %v9281_v31  ;;  %6744 = vmatprep.subr.mxu0 %v9281_v31  ;;  %v2659_v30 = vld [vmem:[%s11530_s3 + $0xbf0] sm:$0xff] }
 0x24b   : > { %6710 = vmatpush3.msra.mxu1 %v2171_v18  ;;  %6745 = vmatpush3.msra.mxu0 %v2266_v34  ;;  %v2657_v18 = vld [vmem:[%s11530_s3 + $0xbe0] sm:$0xff]  ;;  %v2561_v34 = vld [vmem:[%s11530_s3 + $0xb58] sm:$0xff]  ;;  %v2845_v22 = vld [vmem:[%s11530_s3 + $0xcd0] sm:$0xff] }
 0x24c   : > { %6711 = vmatprep.subr.mxu1 %v9281_v31  ;;  %6746 = vmatprep.subr.mxu0 %v9281_v31 }
 0x24d   : > { %6712 = vmatpush3.msra.mxu1 %v2170_v35  ;;  %6713 = vmatprep.mubr.msk.f32.mxu1 %vm7912_vm0, %v9281_v31  ;;  %v2656_v35 = vld [vmem:[%s11530_s3 + $0xbd8] sm:$0xff] }
 0x24e   : > { %6747 = vmatpush3.msra.mxu0 %v2265_v39  ;;  %6748 = vmatprep.mubr.msk.f32.mxu0 %vm7912_vm0, %v9281_v31  ;;  %v2654_v39 = vld [vmem:[%s11530_s3 + $0xbc8] sm:$0xff] }
 0x24f   : > { %6714 = vmatmul.mubr.f32.vlgmr.msra.gmra.mxu1 %v2193_v41  ;;  %6749 = vmatmul.mubr.f32.vlgmr.msra.gmra.mxu0 %v2288_v42  ;;  %v2653_v41 = vld [vmem:[%s11530_s3 + $0xbc0] sm:$0xff]  ;;  %v2557_v42 = vld [vmem:[%s11530_s3 + $0xb38] sm:$0xff] }
 0x250   : > { %6751 = vmatprep.subr.mxu1 %v9281_v31  ;;  %6786 = vmatprep.subr.mxu0 %v9281_v31 }
 0x251   : > { %6752 = vmatpush3.msra.mxu1 %v2375_v43  ;;  %6787 = vmatpush3.msra.mxu0 %v2470_v44  ;;  %v2652_v43 = vld [vmem:[%s11530_s3 + $0xbb8] sm:$0xff]  ;;  %v2556_v44 = vld [vmem:[%s11530_s3 + $0xb30] sm:$0xff] }
 0x252   : > { %6753 = vmatprep.subr.mxu1 %v9281_v31  ;;  %6788 = vmatprep.subr.mxu0 %v9281_v31 }
 0x253   : > { %6754 = vmatpush3.msra.mxu1 %v2374_v45  ;;  %6789 = vmatpush3.msra.mxu0 %v2469_v47  ;;  %v2651_v45 = vld [vmem:[%s11530_s3 + $0xbb0] sm:$0xff]  ;;  %v2555_v47 = vld [vmem:[%s11530_s3 + $0xb28] sm:$0xff] }
 0x254   : > { %6755 = vmatprep.subr.mxu1 %v9281_v31  ;;  %6790 = vmatprep.subr.mxu0 %v9281_v31 }
 0x255   : > { %6756 = vmatpush3.msra.mxu1 %v2373_v48  ;;  %6791 = vmatpush3.msra.mxu0 %v2468_v49  ;;  %v2650_v48 = vld [vmem:[%s11530_s3 + $0xba8] sm:$0xff]  ;;  %v2554_v49 = vld [vmem:[%s11530_s3 + $0xb20] sm:$0xff] }
 0x256   : > { %6757 = vmatprep.subr.mxu1 %v9281_v31  ;;  %6792 = vmatprep.subr.mxu0 %v9281_v31 }
 0x257   : > { %6758 = vmatpush3.msra.mxu1 %v2372_v50  ;;  %6793 = vmatpush3.msra.mxu0 %v2467_v51  ;;  %v2649_v50 = vld [vmem:[%s11530_s3 + $0xba0] sm:$0xff] }
 0x258   : > { %6759 = vmatprep.subr.mxu1 %v9281_v31  ;;  %6794 = vmatprep.subr.mxu0 %v9281_v31 }
 0x259   : > { %6760 = vmatpush3.msra.mxu1 %v2371_v52  ;;  %6795 = vmatpush3.msra.mxu0 %v2466_v53  ;;  %v2553_v53 = vld [vmem:[%s11530_s3 + $0xb18] sm:$0xff] }
 0x25a   : > { %6761 = vmatprep.subr.mxu1 %v9281_v31  ;;  %6796 = vmatprep.subr.mxu0 %v9281_v31 }
 0x25b   : > { %6762 = vmatpush3.msra.mxu1 %v2370_v54  ;;  %6797 = vmatpush3.msra.mxu0 %v2465_v55  ;;  %v2648_v54 = vld [vmem:[%s11530_s3 + $0xb98] sm:$0xff] }
 0x25c   : > { %6763 = vmatprep.subr.mxu1 %v9281_v31  ;;  %6798 = vmatprep.subr.mxu0 %v9281_v31 }
 0x25d   : > { %6764 = vmatpush3.msra.mxu1 %v2369_v56  ;;  %6799 = vmatpush3.msra.mxu0 %v2464_v57 }
 0x25e   : > { %6765 = vmatprep.subr.mxu1 %v9281_v31  ;;  %6800 = vmatprep.subr.mxu0 %v9281_v31 }
 0x25f   : > { %6766 = vmatpush3.msra.mxu1 %v2368_v58  ;;  %6801 = vmatpush3.msra.mxu0 %v2463_v59  ;;  %v2552_v58 = vld [vmem:[%s11530_s3 + $0xb10] sm:$0xff] }
 0x260   : > { %6767 = vmatprep.subr.mxu1 %v9281_v31  ;;  %6802 = vmatprep.subr.mxu0 %v9281_v31  ;;  %v2647_v59 = vld [vmem:[%s11530_s3 + $0xb90] sm:$0xff] }
 0x261   : > { %6768 = vmatpush3.msra.mxu1 %v2367_v60  ;;  %6803 = vmatpush3.msra.mxu0 %v2462_v61  ;;  %v2569_v61 = vld [vmem:[#allocation2 + $0x76] ss:$4 sm:$0x3] }
 0x262   : > { %6769 = vmatprep.subr.mxu1 %v9281_v31  ;;  %6804 = vmatprep.subr.mxu0 %v9281_v31 }
 0x263   : > { %6770 = vmatpush3.msra.mxu1 %v2366_v62  ;;  %6805 = vmatpush3.msra.mxu0 %v2461_v63  ;;  %v2664_v62 = vld [vmem:[#allocation2 + $0x77] ss:$4 sm:$0x3]  ;;  %v2551_v63 = vld [vmem:[%s11530_s3 + $0xb08] sm:$0xff] }
 0x264   : > { %6771 = vmatprep.subr.mxu1 %v9281_v31  ;;  %6806 = vmatprep.subr.mxu0 %v9281_v31 }
 0x265   : > { %6772 = vmatpush3.msra.mxu1 %v2365_v0  ;;  %6807 = vmatpush3.msra.mxu0 %v2460_v1  ;;  %v1310_v4 = vpop.f32.mrf.mxu1  ;;  %v1405_v5 = vpop.f32.mrf.mxu0  ;;  %v2646_v0 = vld [vmem:[%s11530_s3 + $0xb88] sm:$0xff]  ;;  %v2550_v1 = vld [vmem:[%s11530_s3 + $0xb00] sm:$0xff] }
 0x266   : > { %6773 = vmatprep.subr.mxu1 %v9281_v31  ;;  %6808 = vmatprep.subr.mxu0 %v9281_v31  ;;  %v1314_v8 = vadd.f32 %v1310_v4, %v9461_v28  ;;  %v2660_v28 = vld [vmem:[%s11530_s3 + $0xbf8] sm:$0xff]  ;;  %v2645_v4 = vld [vmem:[%s11530_s3 + $0xb80] sm:$0xff] }
 0x267   : > { %6774 = vmatpush3.msra.mxu1 %v2364_v2  ;;  %6809 = vmatpush3.msra.mxu0 %v2459_v3  ;;  %v6365_v9 = vpop.f32.mrf.mxu1  ;;  %v6400_v10 = vpop.f32.mrf.mxu0  ;;  %v2571_v2 = vrot.slane %v2569_v61, 6  ;;  %v2666_v3 = vrot.slane %v2664_v62, 6  ;;  %v3038_v61 = vld [vmem:[%s11530_s3 + $0xde8] sm:$0xff]  ;;  %v2942_v62 = vld [vmem:[%s11530_s3 + $0xd60] sm:$0xff] }
 0x268   : > { %6775 = vmatprep.subr.mxu1 %v9281_v31  ;;  %6810 = vmatprep.subr.mxu0 %v9281_v31  ;;  %v9606_v13 = vadd.f32 %v1405_v5, %v1314_v8  ;;  %v2567_v5 = vld [vmem:[#allocation2 + $0x36] ss:$4 sm:$0x3] }
 0x269   : > { %6776 = vmatpush3.msra.mxu1 %v2363_v6  ;;  %6811 = vmatpush3.msra.mxu0 %v2458_v7  ;;  %v2662_v6 = vld [vmem:[#allocation2 + $0x37] ss:$4 sm:$0x3]  ;;  %v2573_v7 = vsel %vm482_vm1, %v2567_v5, %v2571_v2  ;;  %v3034_v5 = vld [vmem:[%s11530_s3 + $0xdc8] sm:$0xff] }
 0x26a   : > { %6777 = vmatprep.subr.mxu1 %v9281_v31  ;;  %6812 = vmatprep.subr.mxu0 %v9281_v31  ;;  %v2668_v8 = vsel %vm482_vm1, %v2662_v6, %v2666_v3  ;;  %v2755_v9 = vld [vmem:[%s11530_s3 + $0xc78] sm:$0xff]  ;;  %v2940_v2 = vld [vmem:[%s11530_s3 + $0xd50] sm:$0xff]  ;;  %v2938_v6 = vld [vmem:[%s11530_s3 + $0xd40] sm:$0xff] }
 0x26b   : > { %6778 = vmatpush3.msra.mxu1 %v2362_v11  ;;  %6813 = vmatpush3.msra.mxu0 %v2457_v12  ;;  %v2850_v10 = vld [vmem:[%s11530_s3 + $0xcf8] sm:$0xff]  ;;  %v2754_v11 = vld [vmem:[%s11530_s3 + $0xc70] sm:$0xff] }
 0x26c   : > { %6779 = vmatprep.subr.mxu1 %v9281_v31  ;;  %6814 = vmatprep.subr.mxu0 %v9281_v31  ;;  %v2849_v12 = vld [vmem:[%s11530_s3 + $0xcf0] sm:$0xff] }
 0x26d   : > { %6780 = vmatpush3.msra.mxu1 %v2361_v16  ;;  %6815 = vmatpush3.msra.mxu0 %v2456_v17  ;;  %v2847_v16 = vld [vmem:[%s11530_s3 + $0xce0] sm:$0xff]  ;;  %v2751_v17 = vld [vmem:[%s11530_s3 + $0xc58] sm:$0xff]  ;;  %v3035_v3 = vld [vmem:[%s11530_s3 + $0xdd0] sm:$0xff] }
 0x26e   : > { %6781 = vmatprep.subr.mxu1 %v9281_v31  ;;  %6816 = vmatprep.subr.mxu0 %v9281_v31 }
 0x26f   : > { %6782 = vmatpush3.msra.mxu1 %v2360_v19  ;;  %6783 = vmatprep.mubr.msk.f32.mxu1 %vm7912_vm0, %v9281_v31  ;;  %v2846_v19 = vld [vmem:[%s11530_s3 + $0xcd8] sm:$0xff] }
 0x270   : > { %6817 = vmatpush3.msra.mxu0 %v2455_v23  ;;  %6818 = vmatprep.mubr.msk.f32.mxu0 %vm7912_vm0, %v9281_v31  ;;  %v2749_v23 = vld [vmem:[%s11530_s3 + $0xc48] sm:$0xff] }
 0x271   : > { %6784 = vmatmul.mubr.f32.vlgmr.msra.gmra.mxu1 %v2383_v25  ;;  %6819 = vmatmul.mubr.f32.vlgmr.msra.gmra.mxu0 %v2478_v26  ;;  %v2843_v25 = vld [vmem:[%s11530_s3 + $0xcc0] sm:$0xff]  ;;  %v2747_v26 = vld [vmem:[%s11530_s3 + $0xc38] sm:$0xff] }
 0x272   : > { %6821 = vmatprep.subr.mxu1 %v9281_v31  ;;  %6856 = vmatprep.subr.mxu0 %v9281_v31 }
 0x273   : > { %6822 = vmatpush3.msra.mxu1 %v2565_v27  ;;  %6857 = vmatpush3.msra.mxu0 %v2660_v28  ;;  %v2842_v27 = vld [vmem:[%s11530_s3 + $0xcb8] sm:$0xff]  ;;  %v2746_v28 = vld [vmem:[%s11530_s3 + $0xc30] sm:$0xff] }
 0x274   : > { %6823 = vmatprep.subr.mxu1 %v9281_v31  ;;  %6858 = vmatprep.subr.mxu0 %v9281_v31 }
 0x275   : > { %6824 = vmatpush3.msra.mxu1 %v2564_v29  ;;  %6859 = vmatpush3.msra.mxu0 %v2659_v30  ;;  %v2841_v29 = vld [vmem:[%s11530_s3 + $0xcb0] sm:$0xff]  ;;  %v2745_v30 = vld [vmem:[%s11530_s3 + $0xc28] sm:$0xff] }
 0x276   : > { %6825 = vmatprep.subr.mxu1 %v9281_v31  ;;  %6860 = vmatprep.subr.mxu0 %v9281_v31 }
 0x277   : > { %6826 = vmatpush3.msra.mxu1 %v2563_v21  ;;  %6861 = vmatpush3.msra.mxu0 %v2658_v32  ;;  %v2840_v21 = vld [vmem:[%s11530_s3 + $0xca8] sm:$0xff]  ;;  %v2744_v32 = vld [vmem:[%s11530_s3 + $0xc20] sm:$0xff] }
 0x278   : > { %6827 = vmatprep.subr.mxu1 %v9281_v31  ;;  %6862 = vmatprep.subr.mxu0 %v9281_v31 }
 0x279   : > { %6828 = vmatpush3.msra.mxu1 %v2562_v33  ;;  %6863 = vmatpush3.msra.mxu0 %v2657_v18  ;;  %v2839_v33 = vld [vmem:[%s11530_s3 + $0xca0] sm:$0xff] }
 0x27a   : > { %6829 = vmatprep.subr.mxu1 %v9281_v31  ;;  %6864 = vmatprep.subr.mxu0 %v9281_v31 }
 0x27b   : > { %6830 = vmatpush3.msra.mxu1 %v2561_v34  ;;  %6865 = vmatpush3.msra.mxu0 %v2656_v35  ;;  %v2743_v35 = vld [vmem:[%s11530_s3 + $0xc18] sm:$0xff] }
 0x27c   : > { %6831 = vmatprep.subr.mxu1 %v9281_v31  ;;  %6866 = vmatprep.subr.mxu0 %v9281_v31 }
 0x27d   : > { %6832 = vmatpush3.msra.mxu1 %v2560_v36  ;;  %6867 = vmatpush3.msra.mxu0 %v2655_v37  ;;  %v2838_v36 = vld [vmem:[%s11530_s3 + $0xc98] sm:$0xff] }
 0x27e   : > { %6833 = vmatprep.subr.mxu1 %v9281_v31  ;;  %6868 = vmatprep.subr.mxu0 %v9281_v31 }
 0x27f   : > { %6834 = vmatpush3.msra.mxu1 %v2559_v38  ;;  %6869 = vmatpush3.msra.mxu0 %v2654_v39 }
 0x280   : > { %6835 = vmatprep.subr.mxu1 %v9281_v31  ;;  %6870 = vmatprep.subr.mxu0 %v9281_v31 }
 0x281   : > { %6836 = vmatpush3.msra.mxu1 %v2558_v40  ;;  %6871 = vmatpush3.msra.mxu0 %v2653_v41  ;;  %v2742_v40 = vld [vmem:[%s11530_s3 + $0xc10] sm:$0xff] }
 0x282   : > { %6837 = vmatprep.subr.mxu1 %v9281_v31  ;;  %6872 = vmatprep.subr.mxu0 %v9281_v31  ;;  %v2837_v41 = vld [vmem:[%s11530_s3 + $0xc90] sm:$0xff] }
 0x283   : > { %6838 = vmatpush3.msra.mxu1 %v2557_v42  ;;  %6873 = vmatpush3.msra.mxu0 %v2652_v43  ;;  %v2759_v43 = vld [vmem:[#allocation2 + $0x78] ss:$4 sm:$0x3] }
 0x284   : > { %6839 = vmatprep.subr.mxu1 %v9281_v31  ;;  %6874 = vmatprep.subr.mxu0 %v9281_v31 }
 0x285   : > { %6840 = vmatpush3.msra.mxu1 %v2556_v44  ;;  %6875 = vmatpush3.msra.mxu0 %v2651_v45  ;;  %v2854_v44 = vld [vmem:[#allocation2 + $0x79] ss:$4 sm:$0x3]  ;;  %v2741_v45 = vld [vmem:[%s11530_s3 + $0xc08] sm:$0xff] }
 0x286   : > { %6841 = vmatprep.subr.mxu1 %v9281_v31  ;;  %6876 = vmatprep.subr.mxu0 %v9281_v31 }
 0x287   : > { %6842 = vmatpush3.msra.mxu1 %v2555_v47  ;;  %6877 = vmatpush3.msra.mxu0 %v2650_v48  ;;  %v1500_v51 = vpop.f32.mrf.mxu1  ;;  %v1595_v52 = vpop.f32.mrf.mxu0  ;;  %v2836_v47 = vld [vmem:[%s11530_s3 + $0xc88] sm:$0xff]  ;;  %v2740_v48 = vld [vmem:[%s11530_s3 + $0xc00] sm:$0xff] }
 0x288   : > { %6843 = vmatprep.subr.mxu1 %v9281_v31  ;;  %6878 = vmatprep.subr.mxu0 %v9281_v31  ;;  %v1504_v55 = vadd.f32 %v1500_v51, %v9606_v13  ;;  %v2753_v13 = vld [vmem:[%s11530_s3 + $0xc68] sm:$0xff]  ;;  %v2835_v51 = vld [vmem:[%s11530_s3 + $0xc80] sm:$0xff] }
 0x289   : > { %6844 = vmatpush3.msra.mxu1 %v2554_v49  ;;  %6879 = vmatpush3.msra.mxu0 %v2649_v50  ;;  %v6435_v56 = vpop.f32.mrf.mxu1  ;;  %v6470_v57 = vpop.f32.mrf.mxu0  ;;  %v2761_v49 = vrot.slane %v2759_v43, 6  ;;  %v2856_v50 = vrot.slane %v2854_v44, 6  ;;  %v3226_v43 = vld [vmem:[%s11530_s3 + $0xee8] sm:$0xff]  ;;  %v3132_v44 = vld [vmem:[%s11530_s3 + $0xe60] sm:$0xff] }
 0x28a   : > { %6845 = vmatprep.subr.mxu1 %v9281_v31  ;;  %6880 = vmatprep.subr.mxu0 %v9281_v31  ;;  %v9743_v60 = vadd.f32 %v1595_v52, %v1504_v55  ;;  %v9898_v52 = vld [vmem:[#allocation2] sm:$0xff]  ;;  %v2945_v56 = vld [vmem:[%s11530_s3 + $0xd78] sm:$0xff] }
 0x28b   : > { %6846 = vmatpush3.msra.mxu1 %v2553_v53  ;;  %6881 = vmatpush3.msra.mxu0 %v2648_v54  ;;  %v2852_v53 = vld [vmem:[#allocation2 + $0x39] ss:$4 sm:$0x3] }
 0x28c   : > { %6847 = vmatprep.subr.mxu1 %v9281_v31  ;;  %6882 = vmatprep.subr.mxu0 %v9281_v31  ;;  %v2858_v55 = vsel %vm482_vm1, %v2852_v53, %v2856_v50  ;;  %v3040_v57 = vld [vmem:[%s11530_s3 + $0xdf8] sm:$0xff]  ;;  %v3223_v50 = vld [vmem:[%s11530_s3 + $0xed0] sm:$0xff]  ;;  %v3128_v53 = vld [vmem:[%s11530_s3 + $0xe40] sm:$0xff] }
 0x28d   : > { %6848 = vmatpush3.msra.mxu1 %v2552_v58  ;;  %6883 = vmatpush3.msra.mxu0 %v2647_v59  ;;  %v2944_v58 = vld [vmem:[%s11530_s3 + $0xd70] sm:$0xff] }
 0x28e   : > { %6849 = vmatprep.subr.mxu1 %v9281_v31  ;;  %6884 = vmatprep.subr.mxu0 %v9281_v31  ;;  %v3039_v59 = vld [vmem:[%s11530_s3 + $0xdf0] sm:$0xff] }
 0x28f   : > { %6850 = vmatpush3.msra.mxu1 %v2551_v63  ;;  %6885 = vmatpush3.msra.mxu0 %v2646_v0  ;;  %v3037_v63 = vld [vmem:[%s11530_s3 + $0xde0] sm:$0xff]  ;;  %v2941_v0 = vld [vmem:[%s11530_s3 + $0xd58] sm:$0xff] }
 0x290   : > { %6851 = vmatprep.subr.mxu1 %v9281_v31  ;;  %6886 = vmatprep.subr.mxu0 %v9281_v31 }
 0x291   : > { %6852 = vmatpush3.msra.mxu1 %v2550_v1  ;;  %6853 = vmatprep.mubr.msk.f32.mxu1 %vm7912_vm0, %v9281_v31  ;;  %v3036_v1 = vld [vmem:[%s11530_s3 + $0xdd8] sm:$0xff] }
 0x292   : > { %6887 = vmatpush3.msra.mxu0 %v2645_v4  ;;  %6888 = vmatprep.mubr.msk.f32.mxu0 %vm7912_vm0, %v9281_v31  ;;  %v2939_v4 = vld [vmem:[%s11530_s3 + $0xd48] sm:$0xff] }
 0x293   : > { %6854 = vmatmul.mubr.f32.vlgmr.msra.gmra.mxu1 %v2573_v7  ;;  %6889 = vmatmul.mubr.f32.vlgmr.msra.gmra.mxu0 %v2668_v8  ;;  %v3033_v7 = vld [vmem:[%s11530_s3 + $0xdc0] sm:$0xff]  ;;  %v2937_v8 = vld [vmem:[%s11530_s3 + $0xd38] sm:$0xff] }
 0x294   : > { %6891 = vmatprep.subr.mxu1 %v9281_v31  ;;  %6926 = vmatprep.subr.mxu0 %v9281_v31 }
 0x295   : > { %6892 = vmatpush3.msra.mxu1 %v2755_v9  ;;  %6927 = vmatpush3.msra.mxu0 %v2850_v10  ;;  %v3032_v9 = vld [vmem:[%s11530_s3 + $0xdb8] sm:$0xff]  ;;  %v2936_v10 = vld [vmem:[%s11530_s3 + $0xd30] sm:$0xff] }
 0x296   : > { %6893 = vmatprep.subr.mxu1 %v9281_v31  ;;  %6928 = vmatprep.subr.mxu0 %v9281_v31 }
 0x297   : > { %6894 = vmatpush3.msra.mxu1 %v2754_v11  ;;  %6929 = vmatpush3.msra.mxu0 %v2849_v12  ;;  %v3031_v11 = vld [vmem:[%s11530_s3 + $0xdb0] sm:$0xff]  ;;  %v2935_v12 = vld [vmem:[%s11530_s3 + $0xd28] sm:$0xff] }
 0x298   : > { %6895 = vmatprep.subr.mxu1 %v9281_v31  ;;  %6930 = vmatprep.subr.mxu0 %v9281_v31 }
 0x299   : > { %6896 = vmatpush3.msra.mxu1 %v2753_v13  ;;  %6931 = vmatpush3.msra.mxu0 %v2848_v14  ;;  %v3030_v13 = vld [vmem:[%s11530_s3 + $0xda8] sm:$0xff]  ;;  %v2934_v14 = vld [vmem:[%s11530_s3 + $0xd20] sm:$0xff] }
 0x29a   : > { %6897 = vmatprep.subr.mxu1 %v9281_v31  ;;  %6932 = vmatprep.subr.mxu0 %v9281_v31 }
 0x29b   : > { %6898 = vmatpush3.msra.mxu1 %v2752_v15  ;;  %6933 = vmatpush3.msra.mxu0 %v2847_v16  ;;  %v3029_v15 = vld [vmem:[%s11530_s3 + $0xda0] sm:$0xff] }
 0x29c   : > { %6899 = vmatprep.subr.mxu1 %v9281_v31  ;;  %6934 = vmatprep.subr.mxu0 %v9281_v31 }
 0x29d   : > { %6900 = vmatpush3.msra.mxu1 %v2751_v17  ;;  %6935 = vmatpush3.msra.mxu0 %v2846_v19  ;;  %v2933_v19 = vld [vmem:[%s11530_s3 + $0xd18] sm:$0xff] }
 0x29e   : > { %6901 = vmatprep.subr.mxu1 %v9281_v31  ;;  %6936 = vmatprep.subr.mxu0 %v9281_v31 }
 0x29f   : > { %6902 = vmatpush3.msra.mxu1 %v2750_v20  ;;  %6937 = vmatpush3.msra.mxu0 %v2845_v22  ;;  %v3028_v20 = vld [vmem:[%s11530_s3 + $0xd98] sm:$0xff] }
 0x2a0   : > { %6903 = vmatprep.subr.mxu1 %v9281_v31  ;;  %6938 = vmatprep.subr.mxu0 %v9281_v31 }
 0x2a1   : > { %6904 = vmatpush3.msra.mxu1 %v2749_v23  ;;  %6939 = vmatpush3.msra.mxu0 %v2844_v46 }
 0x2a2   : > { %6905 = vmatprep.subr.mxu1 %v9281_v31  ;;  %6940 = vmatprep.subr.mxu0 %v9281_v31 }
 0x2a3   : > { %6906 = vmatpush3.msra.mxu1 %v2748_v24  ;;  %6941 = vmatpush3.msra.mxu0 %v2843_v25  ;;  %v2932_v24 = vld [vmem:[%s11530_s3 + $0xd10] sm:$0xff] }
 0x2a4   : > { %6907 = vmatprep.subr.mxu1 %v9281_v31  ;;  %6942 = vmatprep.subr.mxu0 %v9281_v31  ;;  %v3027_v25 = vld [vmem:[%s11530_s3 + $0xd90] sm:$0xff] }
 0x2a5   : > { %6908 = vmatpush3.msra.mxu1 %v2747_v26  ;;  %6943 = vmatpush3.msra.mxu0 %v2842_v27  ;;  %v2949_v27 = vld [vmem:[#allocation2 + $0x7a] ss:$4 sm:$0x3] }
 0x2a6   : > { %6909 = vmatprep.subr.mxu1 %v9281_v31  ;;  %6944 = vmatprep.subr.mxu0 %v9281_v31 }
 0x2a7   : > { %6910 = vmatpush3.msra.mxu1 %v2746_v28  ;;  %6945 = vmatpush3.msra.mxu0 %v2841_v29  ;;  %v3044_v28 = vld [vmem:[#allocation2 + $0x7b] ss:$4 sm:$0x3]  ;;  %v2931_v29 = vld [vmem:[%s11530_s3 + $0xd08] sm:$0xff] }
 0x2a8   : > { %6911 = vmatprep.subr.mxu1 %v9281_v31  ;;  %6946 = vmatprep.subr.mxu0 %v9281_v31 }
 0x2a9   : > { %6912 = vmatpush3.msra.mxu1 %v2745_v30  ;;  %6947 = vmatpush3.msra.mxu0 %v2840_v21  ;;  %v1690_v18 = vpop.f32.mrf.mxu1  ;;  %v1785_v34 = vpop.f32.mrf.mxu0  ;;  %v3026_v30 = vld [vmem:[%s11530_s3 + $0xd88] sm:$0xff]  ;;  %v2930_v21 = vld [vmem:[%s11530_s3 + $0xd00] sm:$0xff] }
 0x2aa   : > { %6913 = vmatprep.subr.mxu1 %v9281_v31  ;;  %6948 = vmatprep.subr.mxu0 %v9281_v31  ;;  %v1694_v37 = vadd.f32 %v1690_v18, %v9743_v60  ;;  %v2943_v60 = vld [vmem:[%s11530_s3 + $0xd68] sm:$0xff]  ;;  %v3025_v18 = vld [vmem:[%s11530_s3 + $0xd80] sm:$0xff] }
 0x2ab   : > { %6914 = vmatpush3.msra.mxu1 %v2744_v32  ;;  %6949 = vmatpush3.msra.mxu0 %v2839_v33  ;;  %v6505_v38 = vpop.f32.mrf.mxu1  ;;  %v6540_v39 = vpop.f32.mrf.mxu0  ;;  %v2951_v32 = vrot.slane %v2949_v27, 6  ;;  %v3046_v33 = vrot.slane %v3044_v28, 6  ;;  %v3412_v27 = vld [vmem:[%s11530_s3 + $0xfe8] sm:$0xff]  ;;  %v3318_v28 = vld [vmem:[%s11530_s3 + $0xf60] sm:$0xff] }
 0x2ac   : > { %6915 = vmatprep.subr.mxu1 %v9281_v31  ;;  %6950 = vmatprep.subr.mxu0 %v9281_v31  ;;  %v9880_v42 = vadd.f32 %v1785_v34, %v1694_v37  ;;  %v2947_v34 = vld [vmem:[#allocation2 + $0x3a] ss:$4 sm:$0x3] }
 0x2ad   : > { %6916 = vmatpush3.msra.mxu1 %v2743_v35  ;;  %6951 = vmatpush3.msra.mxu0 %v2838_v36  ;;  %v3042_v35 = vld [vmem:[#allocation2 + $0x3b] ss:$4 sm:$0x3]  ;;  %v2953_v36 = vsel %vm482_vm1, %v2947_v34, %v2951_v32  ;;  %v3316_v32 = vld [vmem:[%s11530_s3 + $0xf50] sm:$0xff]  ;;  %v3408_v34 = vld [vmem:[%s11530_s3 + $0xfc8] sm:$0xff] }
 0x2ae   : > { %6917 = vmatprep.subr.mxu1 %v9281_v31  ;;  %6952 = vmatprep.subr.mxu0 %v9281_v31  ;;  %v3048_v37 = vsel %vm482_vm1, %v3042_v35, %v3046_v33  ;;  %v3135_v38 = vld [vmem:[%s11530_s3 + $0xe78] sm:$0xff]  ;;  %v3409_v33 = vld [vmem:[%s11530_s3 + $0xfd0] sm:$0xff]  ;;  %v3314_v35 = vld [vmem:[%s11530_s3 + $0xf40] sm:$0xff] }
 0x2af   : > { %6918 = vmatpush3.msra.mxu1 %v2742_v40  ;;  %6953 = vmatpush3.msra.mxu0 %v2837_v41  ;;  %v3228_v39 = vld [vmem:[%s11530_s3 + $0xef8] sm:$0xff]  ;;  %v3134_v40 = vld [vmem:[%s11530_s3 + $0xe70] sm:$0xff] }
 0x2b0   : > { %6919 = vmatprep.subr.mxu1 %v9281_v31  ;;  %6954 = vmatprep.subr.mxu0 %v9281_v31  ;;  %v2757_v31 = vld [vmem:[#allocation2 + $0x38] ss:$4 sm:$0x3]  ;;  %v3227_v41 = vld [vmem:[%s11530_s3 + $0xef0] sm:$0xff] }
 0x2b1   : > { %6920 = vmatpush3.msra.mxu1 %v2741_v45  ;;  %6955 = vmatpush3.msra.mxu0 %v2836_v47  ;;  %v2763_v54 = vsel %vm482_vm1, %v2757_v31, %v2761_v49  ;;  %v3225_v45 = vld [vmem:[%s11530_s3 + $0xee0] sm:$0xff]  ;;  %v3131_v47 = vld [vmem:[%s11530_s3 + $0xe58] sm:$0xff]  ;;  %v3130_v49 = vld [vmem:[%s11530_s3 + $0xe50] sm:$0xff] }
 0x2b2   : > { %6921 = vmatprep.subr.mxu1 %v9898_v52  ;;  %6956 = vmatprep.subr.mxu0 %v9898_v52  ;;  %v3222_v31 = vld [vmem:[%s11530_s3 + $0xec8] sm:$0xff] }
 0x2b3   : > { %6922 = vmatpush3.msra.mxu1 %v2740_v48  ;;  %6923 = vmatprep.mubr.msk.f32.mxu1 %vm7912_vm0, %v9898_v52  ;;  %v3224_v48 = vld [vmem:[%s11530_s3 + $0xed8] sm:$0xff] }
 0x2b4   : > { %6957 = vmatpush3.msra.mxu0 %v2835_v51  ;;  %6958 = vmatprep.mubr.msk.f32.mxu0 %vm7912_vm0, %v9898_v52  ;;  %v3129_v51 = vld [vmem:[%s11530_s3 + $0xe48] sm:$0xff] }
 0x2b5   : > { %6924 = vmatmul.mubr.f32.vlgmr.msra.gmra.mxu1 %v2763_v54  ;;  %6959 = vmatmul.mubr.f32.vlgmr.msra.gmra.mxu0 %v2858_v55  ;;  %v3221_v54 = vld [vmem:[%s11530_s3 + $0xec0] sm:$0xff]  ;;  %v3127_v55 = vld [vmem:[%s11530_s3 + $0xe38] sm:$0xff] }
 0x2b6   : > { %6961 = vmatprep.subr.mxu1 %v9898_v52  ;;  %6996 = vmatprep.subr.mxu0 %v9898_v52 }
 0x2b7   : > { %6962 = vmatpush3.msra.mxu1 %v2945_v56  ;;  %6997 = vmatpush3.msra.mxu0 %v3040_v57  ;;  %v3220_v56 = vld [vmem:[%s11530_s3 + $0xeb8] sm:$0xff]  ;;  %v3126_v57 = vld [vmem:[%s11530_s3 + $0xe30] sm:$0xff] }
 0x2b8   : > { %6963 = vmatprep.subr.mxu1 %v9898_v52  ;;  %6998 = vmatprep.subr.mxu0 %v9898_v52 }
 0x2b9   : > { %6964 = vmatpush3.msra.mxu1 %v2944_v58  ;;  %6999 = vmatpush3.msra.mxu0 %v3039_v59  ;;  %v3219_v58 = vld [vmem:[%s11530_s3 + $0xeb0] sm:$0xff]  ;;  %v3125_v59 = vld [vmem:[%s11530_s3 + $0xe28] sm:$0xff] }
 0x2ba   : > { %6965 = vmatprep.subr.mxu1 %v9898_v52  ;;  %7000 = vmatprep.subr.mxu0 %v9898_v52 }
 0x2bb   : > { %6966 = vmatpush3.msra.mxu1 %v2943_v60  ;;  %7001 = vmatpush3.msra.mxu0 %v3038_v61  ;;  %v3218_v60 = vld [vmem:[%s11530_s3 + $0xea8] sm:$0xff]  ;;  %v3124_v61 = vld [vmem:[%s11530_s3 + $0xe20] sm:$0xff] }
 0x2bc   : > { %6967 = vmatprep.subr.mxu1 %v9898_v52  ;;  %7002 = vmatprep.subr.mxu0 %v9898_v52 }
 0x2bd   : > { %6968 = vmatpush3.msra.mxu1 %v2942_v62  ;;  %7003 = vmatpush3.msra.mxu0 %v3037_v63  ;;  %v3217_v62 = vld [vmem:[%s11530_s3 + $0xea0] sm:$0xff] }
 0x2be   : > { %6969 = vmatprep.subr.mxu1 %v9898_v52  ;;  %7004 = vmatprep.subr.mxu0 %v9898_v52 }
 0x2bf   : > { %6970 = vmatpush3.msra.mxu1 %v2941_v0  ;;  %7005 = vmatpush3.msra.mxu0 %v3036_v1  ;;  %v3123_v1 = vld [vmem:[%s11530_s3 + $0xe18] sm:$0xff] }
 0x2c0   : > { %6971 = vmatprep.subr.mxu1 %v9898_v52  ;;  %7006 = vmatprep.subr.mxu0 %v9898_v52 }
 0x2c1   : > { %6972 = vmatpush3.msra.mxu1 %v2940_v2  ;;  %7007 = vmatpush3.msra.mxu0 %v3035_v3  ;;  %v3216_v2 = vld [vmem:[%s11530_s3 + $0xe98] sm:$0xff] }
 0x2c2   : > { %6973 = vmatprep.subr.mxu1 %v9898_v52  ;;  %7008 = vmatprep.subr.mxu0 %v9898_v52 }
 0x2c3   : > { %6974 = vmatpush3.msra.mxu1 %v2939_v4  ;;  %7009 = vmatpush3.msra.mxu0 %v3034_v5 }
 0x2c4   : > { %6975 = vmatprep.subr.mxu1 %v9898_v52  ;;  %7010 = vmatprep.subr.mxu0 %v9898_v52 }
 0x2c5   : > { %6976 = vmatpush3.msra.mxu1 %v2938_v6  ;;  %7011 = vmatpush3.msra.mxu0 %v3033_v7  ;;  %v3122_v6 = vld [vmem:[%s11530_s3 + $0xe10] sm:$0xff] }
 0x2c6   : > { %6977 = vmatprep.subr.mxu1 %v9898_v52  ;;  %7012 = vmatprep.subr.mxu0 %v9898_v52  ;;  %v3215_v7 = vld [vmem:[%s11530_s3 + $0xe90] sm:$0xff] }
 0x2c7   : > { %6978 = vmatpush3.msra.mxu1 %v2937_v8  ;;  %7013 = vmatpush3.msra.mxu0 %v3032_v9  ;;  %v3137_v9 = vld [vmem:[#allocation2 + $0x85] ss:$4 sm:$0x3] }
 0x2c8   : > { %6979 = vmatprep.subr.mxu1 %v9898_v52  ;;  %7014 = vmatprep.subr.mxu0 %v9898_v52 }
 0x2c9   : > { %6980 = vmatpush3.msra.mxu1 %v2936_v10  ;;  %7015 = vmatpush3.msra.mxu0 %v3031_v11  ;;  %v3230_v10 = vld [vmem:[#allocation2 + $0x86] ss:$4 sm:$0x3] }
 0x2ca   : > { %6981 = vmatprep.subr.mxu1 %v9898_v52  ;;  %7016 = vmatprep.subr.mxu0 %v9898_v52  ;;  %v3121_v11 = vld [vmem:[%s11530_s3 + $0xe08] sm:$0xff] }
 0x2cb   : > { %6982 = vmatpush3.msra.mxu1 %v2935_v12  ;;  %7017 = vmatpush3.msra.mxu0 %v3030_v13  ;;  %v1880_v16 = vpop.f32.mrf.mxu1  ;;  %v1975_v17 = vpop.f32.mrf.mxu0  ;;  %v3214_v12 = vld [vmem:[%s11530_s3 + $0xe88] sm:$0xff]  ;;  %v3120_v13 = vld [vmem:[%s11530_s3 + $0xe00] sm:$0xff] }
 0x2cc   : > { %6983 = vmatprep.subr.mxu1 %v9898_v52  ;;  %7018 = vmatprep.subr.mxu0 %v9898_v52  ;;  %v1884_v22 = vadd.f32 %v1880_v16, %v9880_v42  ;;  %v3133_v42 = vld [vmem:[%s11530_s3 + $0xe68] sm:$0xff]  ;;  %v3213_v16 = vld [vmem:[%s11530_s3 + $0xe80] sm:$0xff] }
 0x2cd   : > { %6984 = vmatpush3.msra.mxu1 %v2934_v14  ;;  %7019 = vmatpush3.msra.mxu0 %v3029_v15  ;;  %v6575_v23 = vpop.f32.mrf.mxu1  ;;  %v6610_v46 = vpop.f32.mrf.mxu0  ;;  %v3139_v14 = vrot.slane %v3137_v9, 6  ;;  %v3232_v15 = vrot.slane %v3230_v10, 6  ;;  %v3598_v9 = vld [vmem:[%s11530_s3 + $0x10e8] sm:$0xff]  ;;  %v3504_v10 = vld [vmem:[%s11530_s3 + $0x1060] sm:$0xff] }
 0x2ce   : > { %6985 = vmatprep.subr.mxu1 %v9898_v52  ;;  %7020 = vmatprep.subr.mxu0 %v9898_v52  ;;  %v10019_v26 = vadd.f32 %v1975_v17, %v1884_v22  ;;  %v7826_v17 = vld [vmem:[#allocation2 + $0x45] ss:$4 sm:$0x3]  ;;  %v3321_v23 = vld [vmem:[%s11530_s3 + $0xf78] sm:$0xff] }
 0x2cf   : > { %6986 = vmatpush3.msra.mxu1 %v2933_v19  ;;  %7021 = vmatpush3.msra.mxu0 %v3028_v20  ;;  %v3141_v19 = vsel %vm482_vm1, %v7826_v17, %v3139_v14  ;;  %v7827_v20 = vld [vmem:[#allocation2 + $0x46] ss:$4 sm:$0x3]  ;;  %v3414_v46 = vld [vmem:[%s11530_s3 + $0xff8] sm:$0xff]  ;;  %v3502_v14 = vld [vmem:[%s11530_s3 + $0x1050] sm:$0xff] }
 0x2d0   : > { %6987 = vmatprep.subr.mxu1 %v9898_v52  ;;  %7022 = vmatprep.subr.mxu0 %v9898_v52  ;;  %v3234_v22 = vsel %vm482_vm1, %v7827_v20, %v3232_v15  ;;  %v3595_v15 = vld [vmem:[%s11530_s3 + $0x10d0] sm:$0xff]  ;;  %v3594_v17 = vld [vmem:[%s11530_s3 + $0x10c8] sm:$0xff]  ;;  %v3593_v20 = vld [vmem:[%s11530_s3 + $0x10c0] sm:$0xff] }
 0x2d1   : > { %6988 = vmatpush3.msra.mxu1 %v2932_v24  ;;  %7023 = vmatpush3.msra.mxu0 %v3027_v25  ;;  %v3320_v24 = vld [vmem:[%s11530_s3 + $0xf70] sm:$0xff] }
 0x2d2   : > { %6989 = vmatprep.subr.mxu1 %v9898_v52  ;;  %7024 = vmatprep.subr.mxu0 %v9898_v52  ;;  %v3413_v25 = vld [vmem:[%s11530_s3 + $0xff0] sm:$0xff] }
 0x2d3   : > { %6990 = vmatpush3.msra.mxu1 %v2931_v29  ;;  %7025 = vmatpush3.msra.mxu0 %v3026_v30  ;;  %v3411_v29 = vld [vmem:[%s11530_s3 + $0xfe0] sm:$0xff]  ;;  %v3317_v30 = vld [vmem:[%s11530_s3 + $0xf58] sm:$0xff] }
 0x2d4   : > { %6991 = vmatprep.subr.mxu1 %v9898_v52  ;;  %7026 = vmatprep.subr.mxu0 %v9898_v52 }
 0x2d5   : > { %6992 = vmatpush3.msra.mxu1 %v2930_v21  ;;  %6993 = vmatprep.mubr.msk.f32.mxu1 %vm7912_vm0, %v9898_v52  ;;  %v3410_v21 = vld [vmem:[%s11530_s3 + $0xfd8] sm:$0xff] }
 0x2d6   : > { %7027 = vmatpush3.msra.mxu0 %v3025_v18  ;;  %7028 = vmatprep.mubr.msk.f32.mxu0 %vm7912_vm0, %v9898_v52  ;;  %v3315_v18 = vld [vmem:[%s11530_s3 + $0xf48] sm:$0xff] }
 0x2d7   : > { %6994 = vmatmul.mubr.f32.vlgmr.msra.gmra.mxu1 %v2953_v36  ;;  %7029 = vmatmul.mubr.f32.vlgmr.msra.gmra.mxu0 %v3048_v37  ;;  %v3407_v36 = vld [vmem:[%s11530_s3 + $0xfc0] sm:$0xff]  ;;  %v3313_v37 = vld [vmem:[%s11530_s3 + $0xf38] sm:$0xff] }
 0x2d8   : > { %7031 = vmatprep.subr.mxu1 %v9898_v52  ;;  %7066 = vmatprep.subr.mxu0 %v9898_v52 }
 0x2d9   : > { %7032 = vmatpush3.msra.mxu1 %v3135_v38  ;;  %7067 = vmatpush3.msra.mxu0 %v3228_v39  ;;  %v3406_v38 = vld [vmem:[%s11530_s3 + $0xfb8] sm:$0xff]  ;;  %v3312_v39 = vld [vmem:[%s11530_s3 + $0xf30] sm:$0xff] }
 0x2da   : > { %7033 = vmatprep.subr.mxu1 %v9898_v52  ;;  %7068 = vmatprep.subr.mxu0 %v9898_v52 }
 0x2db   : > { %7034 = vmatpush3.msra.mxu1 %v3134_v40  ;;  %7069 = vmatpush3.msra.mxu0 %v3227_v41  ;;  %v3405_v40 = vld [vmem:[%s11530_s3 + $0xfb0] sm:$0xff]  ;;  %v3311_v41 = vld [vmem:[%s11530_s3 + $0xf28] sm:$0xff] }
 0x2dc   : > { %7035 = vmatprep.subr.mxu1 %v9898_v52  ;;  %7070 = vmatprep.subr.mxu0 %v9898_v52 }
 0x2dd   : > { %7036 = vmatpush3.msra.mxu1 %v3133_v42  ;;  %7071 = vmatpush3.msra.mxu0 %v3226_v43  ;;  %v3404_v42 = vld [vmem:[%s11530_s3 + $0xfa8] sm:$0xff]  ;;  %v3310_v43 = vld [vmem:[%s11530_s3 + $0xf20] sm:$0xff] }
 0x2de   : > { %7037 = vmatprep.subr.mxu1 %v9898_v52  ;;  %7072 = vmatprep.subr.mxu0 %v9898_v52 }
 0x2df   : > { %7038 = vmatpush3.msra.mxu1 %v3132_v44  ;;  %7073 = vmatpush3.msra.mxu0 %v3225_v45  ;;  %v3403_v44 = vld [vmem:[%s11530_s3 + $0xfa0] sm:$0xff] }
 0x2e0   : > { %7039 = vmatprep.subr.mxu1 %v9898_v52  ;;  %7074 = vmatprep.subr.mxu0 %v9898_v52 }
 0x2e1   : > { %7040 = vmatpush3.msra.mxu1 %v3131_v47  ;;  %7075 = vmatpush3.msra.mxu0 %v3224_v48  ;;  %v3309_v48 = vld [vmem:[%s11530_s3 + $0xf18] sm:$0xff] }
 0x2e2   : > { %7041 = vmatprep.subr.mxu1 %v9898_v52  ;;  %7076 = vmatprep.subr.mxu0 %v9898_v52 }
 0x2e3   : > { %7042 = vmatpush3.msra.mxu1 %v3130_v49  ;;  %7077 = vmatpush3.msra.mxu0 %v3223_v50  ;;  %v3402_v49 = vld [vmem:[%s11530_s3 + $0xf98] sm:$0xff] }
 0x2e4   : > { %7043 = vmatprep.subr.mxu1 %v9898_v52  ;;  %7078 = vmatprep.subr.mxu0 %v9898_v52 }
 0x2e5   : > { %7044 = vmatpush3.msra.mxu1 %v3129_v51  ;;  %7079 = vmatpush3.msra.mxu0 %v3222_v31 }
 0x2e6   : > { %7045 = vmatprep.subr.mxu1 %v9898_v52  ;;  %7080 = vmatprep.subr.mxu0 %v9898_v52 }
 0x2e7   : > { %7046 = vmatpush3.msra.mxu1 %v3128_v53  ;;  %7081 = vmatpush3.msra.mxu0 %v3221_v54  ;;  %v3308_v53 = vld [vmem:[%s11530_s3 + $0xf10] sm:$0xff] }
 0x2e8   : > { %7047 = vmatprep.subr.mxu1 %v9898_v52  ;;  %7082 = vmatprep.subr.mxu0 %v9898_v52  ;;  %v3401_v54 = vld [vmem:[%s11530_s3 + $0xf90] sm:$0xff] }
 0x2e9   : > { %7048 = vmatpush3.msra.mxu1 %v3127_v55  ;;  %7083 = vmatpush3.msra.mxu0 %v3220_v56  ;;  %v3323_v56 = vld [vmem:[#allocation2 + $0x87] ss:$4 sm:$0x3] }
 0x2ea   : > { %7049 = vmatprep.subr.mxu1 %v9898_v52  ;;  %7084 = vmatprep.subr.mxu0 %v9898_v52 }
 0x2eb   : > { %7050 = vmatpush3.msra.mxu1 %v3126_v57  ;;  %7085 = vmatpush3.msra.mxu0 %v3219_v58  ;;  %v3416_v57 = vld [vmem:[#allocation2 + $0x88] ss:$4 sm:$0x3] }
 0x2ec   : > { %7051 = vmatprep.subr.mxu1 %v9898_v52  ;;  %7086 = vmatprep.subr.mxu0 %v9898_v52  ;;  %v3307_v58 = vld [vmem:[%s11530_s3 + $0xf08] sm:$0xff] }
 0x2ed   : > { %7052 = vmatpush3.msra.mxu1 %v3125_v59  ;;  %7087 = vmatpush3.msra.mxu0 %v3218_v60  ;;  %v2070_v63 = vpop.f32.mrf.mxu1  ;;  %v2165_v0 = vpop.f32.mrf.mxu0  ;;  %v3400_v59 = vld [vmem:[%s11530_s3 + $0xf88] sm:$0xff]  ;;  %v3306_v60 = vld [vmem:[%s11530_s3 + $0xf00] sm:$0xff] }
 0x2ee   : > { %7053 = vmatprep.subr.mxu1 %v9898_v52  ;;  %7088 = vmatprep.subr.mxu0 %v9898_v52  ;;  %v2074_v3 = vadd.f32 %v2070_v63, %v10019_v26  ;;  %v3319_v26 = vld [vmem:[%s11530_s3 + $0xf68] sm:$0xff]  ;;  %v3399_v63 = vld [vmem:[%s11530_s3 + $0xf80] sm:$0xff] }
 0x2ef   : > { %7054 = vmatpush3.msra.mxu1 %v3124_v61  ;;  %7089 = vmatpush3.msra.mxu0 %v3217_v62  ;;  %v6645_v4 = vpop.f32.mrf.mxu1  ;;  %v6680_v5 = vpop.f32.mrf.mxu0  ;;  %v3325_v61 = vrot.slane %v3323_v56, 6  ;;  %v3418_v62 = vrot.slane %v3416_v57, 6  ;;  %v3784_v56 = vld [vmem:[%s11530_s3 + $0x11e8] sm:$0xff]  ;;  %v3690_v57 = vld [vmem:[%s11530_s3 + $0x1160] sm:$0xff] }
 0x2f0   : > { %7055 = vmatprep.subr.mxu1 %v9898_v52  ;;  %7090 = vmatprep.subr.mxu0 %v9898_v52  ;;  %v10156_v8 = vadd.f32 %v2165_v0, %v2074_v3  ;;  %v7828_v0 = vld [vmem:[#allocation2 + $0x47] ss:$4 sm:$0x3]  ;;  %v3507_v4 = vld [vmem:[%s11530_s3 + $0x1078] sm:$0xff] }
 0x2f1   : > { %7056 = vmatpush3.msra.mxu1 %v3123_v1  ;;  %7091 = vmatpush3.msra.mxu0 %v3216_v2  ;;  %v3327_v1 = vsel %vm482_vm1, %v7828_v0, %v3325_v61  ;;  %v7829_v2 = vld [vmem:[#allocation2 + $0x48] ss:$4 sm:$0x3]  ;;  %v3600_v5 = vld [vmem:[%s11530_s3 + $0x10f8] sm:$0xff]  ;;  %v3688_v61 = vld [vmem:[%s11530_s3 + $0x1150] sm:$0xff] }
 0x2f2   : > { %7057 = vmatprep.subr.mxu1 %v9898_v52  ;;  %7092 = vmatprep.subr.mxu0 %v9898_v52  ;;  %v3420_v3 = vsel %vm482_vm1, %v7829_v2, %v3418_v62  ;;  %v3781_v62 = vld [vmem:[%s11530_s3 + $0x11d0] sm:$0xff]  ;;  %v3780_v0 = vld [vmem:[%s11530_s3 + $0x11c8] sm:$0xff]  ;;  %v3779_v2 = vld [vmem:[%s11530_s3 + $0x11c0] sm:$0xff] }
 0x2f3   : > { %7058 = vmatpush3.msra.mxu1 %v3122_v6  ;;  %7093 = vmatpush3.msra.mxu0 %v3215_v7  ;;  %v3506_v6 = vld [vmem:[%s11530_s3 + $0x1070] sm:$0xff] }
 0x2f4   : > { %7059 = vmatprep.subr.mxu1 %v9898_v52  ;;  %7094 = vmatprep.subr.mxu0 %v9898_v52  ;;  %v3599_v7 = vld [vmem:[%s11530_s3 + $0x10f0] sm:$0xff] }
 0x2f5   : > { %7060 = vmatpush3.msra.mxu1 %v3121_v11  ;;  %7095 = vmatpush3.msra.mxu0 %v3214_v12  ;;  %v3597_v11 = vld [vmem:[%s11530_s3 + $0x10e0] sm:$0xff]  ;;  %v3503_v12 = vld [vmem:[%s11530_s3 + $0x1058] sm:$0xff] }
 0x2f6   : > { %7061 = vmatprep.subr.mxu1 %v9898_v52  ;;  %7096 = vmatprep.subr.mxu0 %v9898_v52 }
 0x2f7   : > { %7062 = vmatpush3.msra.mxu1 %v3120_v13  ;;  %7063 = vmatprep.mubr.msk.f32.mxu1 %vm7912_vm0, %v9898_v52  ;;  %v3596_v13 = vld [vmem:[%s11530_s3 + $0x10d8] sm:$0xff] }
 0x2f8   : > { %7097 = vmatpush3.msra.mxu0 %v3213_v16  ;;  %7098 = vmatprep.mubr.msk.f32.mxu0 %vm7912_vm0, %v9898_v52  ;;  %v3501_v16 = vld [vmem:[%s11530_s3 + $0x1048] sm:$0xff] }
 0x2f9   : > { %7064 = vmatmul.mubr.f32.vlgmr.msra.gmra.mxu1 %v3141_v19  ;;  %7099 = vmatmul.mubr.f32.vlgmr.msra.gmra.mxu0 %v3234_v22  ;;  %v3500_v19 = vld [vmem:[%s11530_s3 + $0x1040] sm:$0xff]  ;;  %v3499_v22 = vld [vmem:[%s11530_s3 + $0x1038] sm:$0xff] }
 0x2fa   : > { %7101 = vmatprep.subr.mxu1 %v9898_v52  ;;  %7136 = vmatprep.subr.mxu0 %v9898_v52 }
 0x2fb   : > { %7102 = vmatpush3.msra.mxu1 %v3321_v23  ;;  %7137 = vmatpush3.msra.mxu0 %v3414_v46  ;;  %v3592_v23 = vld [vmem:[%s11530_s3 + $0x10b8] sm:$0xff]  ;;  %v3498_v46 = vld [vmem:[%s11530_s3 + $0x1030] sm:$0xff] }
 0x2fc   : > { %7103 = vmatprep.subr.mxu1 %v9898_v52  ;;  %7138 = vmatprep.subr.mxu0 %v9898_v52 }
 0x2fd   : > { %7104 = vmatpush3.msra.mxu1 %v3320_v24  ;;  %7139 = vmatpush3.msra.mxu0 %v3413_v25  ;;  %v3591_v24 = vld [vmem:[%s11530_s3 + $0x10b0] sm:$0xff]  ;;  %v3497_v25 = vld [vmem:[%s11530_s3 + $0x1028] sm:$0xff] }
 0x2fe   : > { %7105 = vmatprep.subr.mxu1 %v9898_v52  ;;  %7140 = vmatprep.subr.mxu0 %v9898_v52 }
 0x2ff   : > { %7106 = vmatpush3.msra.mxu1 %v3319_v26  ;;  %7141 = vmatpush3.msra.mxu0 %v3412_v27  ;;  %v3590_v26 = vld [vmem:[%s11530_s3 + $0x10a8] sm:$0xff]  ;;  %v3496_v27 = vld [vmem:[%s11530_s3 + $0x1020] sm:$0xff] }
 0x300   : > { %7107 = vmatprep.subr.mxu1 %v9898_v52  ;;  %7142 = vmatprep.subr.mxu0 %v9898_v52 }
 0x301   : > { %7108 = vmatpush3.msra.mxu1 %v3318_v28  ;;  %7143 = vmatpush3.msra.mxu0 %v3411_v29  ;;  %v3589_v28 = vld [vmem:[%s11530_s3 + $0x10a0] sm:$0xff] }
 0x302   : > { %7109 = vmatprep.subr.mxu1 %v9898_v52  ;;  %7144 = vmatprep.subr.mxu0 %v9898_v52 }
 0x303   : > { %7110 = vmatpush3.msra.mxu1 %v3317_v30  ;;  %7145 = vmatpush3.msra.mxu0 %v3410_v21  ;;  %v3495_v21 = vld [vmem:[%s11530_s3 + $0x1018] sm:$0xff] }
 0x304   : > { %7111 = vmatprep.subr.mxu1 %v9898_v52  ;;  %7146 = vmatprep.subr.mxu0 %v9898_v52 }
 0x305   : > { %7112 = vmatpush3.msra.mxu1 %v3316_v32  ;;  %7147 = vmatpush3.msra.mxu0 %v3409_v33  ;;  %v3588_v32 = vld [vmem:[%s11530_s3 + $0x1098] sm:$0xff] }
 0x306   : > { %7113 = vmatprep.subr.mxu1 %v9898_v52  ;;  %7148 = vmatprep.subr.mxu0 %v9898_v52 }
 0x307   : > { %7114 = vmatpush3.msra.mxu1 %v3315_v18  ;;  %7149 = vmatpush3.msra.mxu0 %v3408_v34 }
 0x308   : > { %7115 = vmatprep.subr.mxu1 %v9898_v52  ;;  %7150 = vmatprep.subr.mxu0 %v9898_v52 }
 0x309   : > { %7116 = vmatpush3.msra.mxu1 %v3314_v35  ;;  %7151 = vmatpush3.msra.mxu0 %v3407_v36  ;;  %v3494_v35 = vld [vmem:[%s11530_s3 + $0x1010] sm:$0xff] }
 0x30a   : > { %7117 = vmatprep.subr.mxu1 %v9898_v52  ;;  %7152 = vmatprep.subr.mxu0 %v9898_v52  ;;  %v3587_v36 = vld [vmem:[%s11530_s3 + $0x1090] sm:$0xff] }
 0x30b   : > { %7118 = vmatpush3.msra.mxu1 %v3313_v37  ;;  %7153 = vmatpush3.msra.mxu0 %v3406_v38  ;;  %v3509_v38 = vld [vmem:[#allocation2 + $0x89] ss:$4 sm:$0x3] }
 0x30c   : > { %7119 = vmatprep.subr.mxu1 %v9898_v52  ;;  %7154 = vmatprep.subr.mxu0 %v9898_v52 }
 0x30d   : > { %7120 = vmatpush3.msra.mxu1 %v3312_v39  ;;  %7155 = vmatpush3.msra.mxu0 %v3405_v40  ;;  %v3602_v39 = vld [vmem:[#allocation2 + $0x8a] ss:$4 sm:$0x3] }
 0x30e   : > { %7121 = vmatprep.subr.mxu1 %v9898_v52  ;;  %7156 = vmatprep.subr.mxu0 %v9898_v52  ;;  %v3493_v40 = vld [vmem:[%s11530_s3 + $0x1008] sm:$0xff] }
 0x30f   : > { %7122 = vmatpush3.msra.mxu1 %v3311_v41  ;;  %7157 = vmatpush3.msra.mxu0 %v3404_v42  ;;  %v2260_v45 = vpop.f32.mrf.mxu1  ;;  %v2355_v47 = vpop.f32.mrf.mxu0  ;;  %v3586_v41 = vld [vmem:[%s11530_s3 + $0x1088] sm:$0xff]  ;;  %v3492_v42 = vld [vmem:[%s11530_s3 + $0x1000] sm:$0xff] }
 0x310   : > { %7123 = vmatprep.subr.mxu1 %v9898_v52  ;;  %7158 = vmatprep.subr.mxu0 %v9898_v52  ;;  %v2264_v50 = vadd.f32 %v2260_v45, %v10156_v8  ;;  %v3505_v8 = vld [vmem:[%s11530_s3 + $0x1068] sm:$0xff]  ;;  %v3585_v45 = vld [vmem:[%s11530_s3 + $0x1080] sm:$0xff] }
 0x311   : > { %7124 = vmatpush3.msra.mxu1 %v3310_v43  ;;  %7159 = vmatpush3.msra.mxu0 %v3403_v44  ;;  %v6715_v51 = vpop.f32.mrf.mxu1  ;;  %v6750_v31 = vpop.f32.mrf.mxu0  ;;  %v3511_v43 = vrot.slane %v3509_v38, 6  ;;  %v3604_v44 = vrot.slane %v3602_v39, 6  ;;  %v3970_v38 = vld [vmem:[%s11530_s3 + $0x12e8] sm:$0xff]  ;;  %v3876_v39 = vld [vmem:[%s11530_s3 + $0x1260] sm:$0xff] }
 0x312   : > { %7125 = vmatprep.subr.mxu1 %v9898_v52  ;;  %7160 = vmatprep.subr.mxu0 %v9898_v52  ;;  %v10293_v55 = vadd.f32 %v2355_v47, %v2264_v50  ;;  %v7830_v47 = vld [vmem:[#allocation2 + $0x49] ss:$4 sm:$0x3]  ;;  %v3693_v51 = vld [vmem:[%s11530_s3 + $0x1178] sm:$0xff] }
 0x313   : > { %7126 = vmatpush3.msra.mxu1 %v3309_v48  ;;  %7161 = vmatpush3.msra.mxu0 %v3402_v49  ;;  %v3513_v48 = vsel %vm482_vm1, %v7830_v47, %v3511_v43  ;;  %v7831_v49 = vld [vmem:[#allocation2 + $0x4a] ss:$4 sm:$0x3]  ;;  %v3786_v31 = vld [vmem:[%s11530_s3 + $0x11f8] sm:$0xff]  ;;  %v3874_v43 = vld [vmem:[%s11530_s3 + $0x1250] sm:$0xff] }
 0x314   : > { %7127 = vmatprep.subr.mxu1 %v9898_v52  ;;  %7162 = vmatprep.subr.mxu0 %v9898_v52  ;;  %v3606_v50 = vsel %vm482_vm1, %v7831_v49, %v3604_v44  ;;  %v3967_v44 = vld [vmem:[%s11530_s3 + $0x12d0] sm:$0xff]  ;;  %v3966_v47 = vld [vmem:[%s11530_s3 + $0x12c8] sm:$0xff]  ;;  %v3965_v49 = vld [vmem:[%s11530_s3 + $0x12c0] sm:$0xff] }
 0x315   : > { %7128 = vmatpush3.msra.mxu1 %v3308_v53  ;;  %7163 = vmatpush3.msra.mxu0 %v3401_v54  ;;  %v3692_v53 = vld [vmem:[%s11530_s3 + $0x1170] sm:$0xff] }
 0x316   : > { %7129 = vmatprep.subr.mxu1 %v9898_v52  ;;  %7164 = vmatprep.subr.mxu0 %v9898_v52  ;;  %v3785_v54 = vld [vmem:[%s11530_s3 + $0x11f0] sm:$0xff] }
 0x317   : > { %7130 = vmatpush3.msra.mxu1 %v3307_v58  ;;  %7165 = vmatpush3.msra.mxu0 %v3400_v59  ;;  %v3783_v58 = vld [vmem:[%s11530_s3 + $0x11e0] sm:$0xff]  ;;  %v3689_v59 = vld [vmem:[%s11530_s3 + $0x1158] sm:$0xff] }
 0x318   : > { %7131 = vmatprep.subr.mxu1 %v9898_v52  ;;  %7166 = vmatprep.subr.mxu0 %v9898_v52 }
 0x319   : > { %7132 = vmatpush3.msra.mxu1 %v3306_v60  ;;  %7133 = vmatprep.mubr.msk.f32.mxu1 %vm7912_vm0, %v9898_v52  ;;  %v3782_v60 = vld [vmem:[%s11530_s3 + $0x11d8] sm:$0xff] }
 0x31a   : > { %7167 = vmatpush3.msra.mxu0 %v3399_v63  ;;  %7168 = vmatprep.mubr.msk.f32.mxu0 %vm7912_vm0, %v9898_v52  ;;  %v3687_v63 = vld [vmem:[%s11530_s3 + $0x1148] sm:$0xff] }
 0x31b   : > { %7134 = vmatmul.mubr.f32.vlgmr.msra.gmra.mxu1 %v3327_v1  ;;  %7169 = vmatmul.mubr.f32.vlgmr.msra.gmra.mxu0 %v3420_v3  ;;  %v3686_v1 = vld [vmem:[%s11530_s3 + $0x1140] sm:$0xff]  ;;  %v3685_v3 = vld [vmem:[%s11530_s3 + $0x1138] sm:$0xff] }
 0x31c   : > { %7171 = vmatprep.subr.mxu1 %v9898_v52  ;;  %7206 = vmatprep.subr.mxu0 %v9898_v52 }
 0x31d   : > { %7172 = vmatpush3.msra.mxu1 %v3507_v4  ;;  %7207 = vmatpush3.msra.mxu0 %v3600_v5  ;;  %v3778_v4 = vld [vmem:[%s11530_s3 + $0x11b8] sm:$0xff]  ;;  %v10526_v5 = vld [vmem:[#allocation2] sm:$0xff] }
 0x31e   : > { %7173 = vmatprep.subr.mxu1 %v9898_v52  ;;  %7208 = vmatprep.subr.mxu0 %v9898_v52 }
 0x31f   : > { %7174 = vmatpush3.msra.mxu1 %v3506_v6  ;;  %7209 = vmatpush3.msra.mxu0 %v3599_v7  ;;  %v3777_v6 = vld [vmem:[%s11530_s3 + $0x11b0] sm:$0xff]  ;;  %v3683_v7 = vld [vmem:[%s11530_s3 + $0x1128] sm:$0xff] }
 0x320   : > { %7175 = vmatprep.subr.mxu1 %v9898_v52  ;;  %7210 = vmatprep.subr.mxu0 %v9898_v52 }
 0x321   : > { %7176 = vmatpush3.msra.mxu1 %v3505_v8  ;;  %7211 = vmatpush3.msra.mxu0 %v3598_v9  ;;  %v3776_v8 = vld [vmem:[%s11530_s3 + $0x11a8] sm:$0xff]  ;;  %v3682_v9 = vld [vmem:[%s11530_s3 + $0x1120] sm:$0xff] }
 0x322   : > { %7177 = vmatprep.subr.mxu1 %v9898_v52  ;;  %7212 = vmatprep.subr.mxu0 %v9898_v52 }
 0x323   : > { %7178 = vmatpush3.msra.mxu1 %v3504_v10  ;;  %7213 = vmatpush3.msra.mxu0 %v3597_v11  ;;  %v3775_v10 = vld [vmem:[%s11530_s3 + $0x11a0] sm:$0xff] }
 0x324   : > { %7179 = vmatprep.subr.mxu1 %v9898_v52  ;;  %7214 = vmatprep.subr.mxu0 %v9898_v52 }
 0x325   : > { %7180 = vmatpush3.msra.mxu1 %v3503_v12  ;;  %7215 = vmatpush3.msra.mxu0 %v3596_v13  ;;  %v3681_v13 = vld [vmem:[%s11530_s3 + $0x1118] sm:$0xff] }
 0x326   : > { %7181 = vmatprep.subr.mxu1 %v9898_v52  ;;  %7216 = vmatprep.subr.mxu0 %v9898_v52 }
 0x327   : > { %7182 = vmatpush3.msra.mxu1 %v3502_v14  ;;  %7217 = vmatpush3.msra.mxu0 %v3595_v15  ;;  %v3774_v14 = vld [vmem:[%s11530_s3 + $0x1198] sm:$0xff] }
 0x328   : > { %7183 = vmatprep.subr.mxu1 %v9898_v52  ;;  %7218 = vmatprep.subr.mxu0 %v9898_v52 }
 0x329   : > { %7184 = vmatpush3.msra.mxu1 %v3501_v16  ;;  %7219 = vmatpush3.msra.mxu0 %v3594_v17 }
 0x32a   : > { %7185 = vmatprep.subr.mxu1 %v9898_v52  ;;  %7220 = vmatprep.subr.mxu0 %v9898_v52 }
 0x32b   : > { %7186 = vmatpush3.msra.mxu1 %v3500_v19  ;;  %7221 = vmatpush3.msra.mxu0 %v3593_v20  ;;  %v3680_v19 = vld [vmem:[%s11530_s3 + $0x1110] sm:$0xff] }
 0x32c   : > { %7187 = vmatprep.subr.mxu1 %v9898_v52  ;;  %7222 = vmatprep.subr.mxu0 %v9898_v52  ;;  %v3773_v20 = vld [vmem:[%s11530_s3 + $0x1190] sm:$0xff] }
 0x32d   : > { %7188 = vmatpush3.msra.mxu1 %v3499_v22  ;;  %7223 = vmatpush3.msra.mxu0 %v3592_v23  ;;  %v3695_v23 = vld [vmem:[#allocation2 + $0x8b] ss:$4 sm:$0x3] }
 0x32e   : > { %7189 = vmatprep.subr.mxu1 %v9898_v52  ;;  %7224 = vmatprep.subr.mxu0 %v9898_v52 }
 0x32f   : > { %7190 = vmatpush3.msra.mxu1 %v3498_v46  ;;  %7225 = vmatpush3.msra.mxu0 %v3591_v24  ;;  %v3788_v46 = vld [vmem:[#allocation2 + $0x95] ss:$4 sm:$0x3]  ;;  %v3679_v24 = vld [vmem:[%s11530_s3 + $0x1108] sm:$0xff] }
 0x330   : > { %7191 = vmatprep.subr.mxu1 %v9898_v52  ;;  %7226 = vmatprep.subr.mxu0 %v9898_v52 }
 0x331   : > { %7192 = vmatpush3.msra.mxu1 %v3497_v25  ;;  %7227 = vmatpush3.msra.mxu0 %v3590_v26  ;;  %v2450_v29 = vpop.f32.mrf.mxu1  ;;  %v2545_v30 = vpop.f32.mrf.mxu0  ;;  %v3772_v25 = vld [vmem:[%s11530_s3 + $0x1188] sm:$0xff]  ;;  %v3678_v26 = vld [vmem:[%s11530_s3 + $0x1100] sm:$0xff] }
 0x332   : > { %7193 = vmatprep.subr.mxu1 %v9898_v52  ;;  %7228 = vmatprep.subr.mxu0 %v9898_v52  ;;  %v2454_v33 = vadd.f32 %v2450_v29, %v10293_v55  ;;  %v3691_v55 = vld [vmem:[%s11530_s3 + $0x1168] sm:$0xff]  ;;  %v3771_v29 = vld [vmem:[%s11530_s3 + $0x1180] sm:$0xff] }
 0x333   : > { %7194 = vmatpush3.msra.mxu1 %v3496_v27  ;;  %7229 = vmatpush3.msra.mxu0 %v3589_v28  ;;  %v6785_v18 = vpop.f32.mrf.mxu1  ;;  %v6820_v34 = vpop.f32.mrf.mxu0  ;;  %v3697_v27 = vrot.slane %v3695_v23, 6  ;;  %v3790_v28 = vrot.slane %v3788_v46, 6  ;;  %v4156_v23 = vld [vmem:[%s11530_s3 + $0x13e8] sm:$0xff]  ;;  %v4062_v46 = vld [vmem:[%s11530_s3 + $0x1360] sm:$0xff] }
 0x334   : > { %7195 = vmatprep.subr.mxu1 %v9898_v52  ;;  %7230 = vmatprep.subr.mxu0 %v9898_v52  ;;  %v10430_v37 = vadd.f32 %v2545_v30, %v2454_v33  ;;  %v7833_v30 = vld [vmem:[#allocation2 + $0x4b] ss:$4 sm:$0x3]  ;;  %v3879_v18 = vld [vmem:[%s11530_s3 + $0x1278] sm:$0xff] }
 0x335   : > { %7196 = vmatpush3.msra.mxu1 %v3495_v21  ;;  %7231 = vmatpush3.msra.mxu0 %v3588_v32  ;;  %v3699_v21 = vsel %vm482_vm1, %v7833_v30, %v3697_v27  ;;  %v7834_v32 = vld [vmem:[#allocation2 + $0x55] ss:$4 sm:$0x3]  ;;  %v4152_v30 = vld [vmem:[%s11530_s3 + $0x13c8] sm:$0xff] }
 0x336   : > { %7197 = vmatprep.subr.mxu1 %v9898_v52  ;;  %7232 = vmatprep.subr.mxu0 %v9898_v52  ;;  %v3792_v33 = vsel %vm482_vm1, %v7834_v32, %v3790_v28  ;;  %v3972_v34 = vld [vmem:[%s11530_s3 + $0x12f8] sm:$0xff]  ;;  %v4060_v27 = vld [vmem:[%s11530_s3 + $0x1350] sm:$0xff]  ;;  %v4151_v32 = vld [vmem:[%s11530_s3 + $0x13c0] sm:$0xff] }
 0x337   : > { %7198 = vmatpush3.msra.mxu1 %v3494_v35  ;;  %7233 = vmatpush3.msra.mxu0 %v3587_v36  ;;  %v3878_v35 = vld [vmem:[%s11530_s3 + $0x1270] sm:$0xff] }
 0x338   : > { %7199 = vmatprep.subr.mxu1 %v9898_v52  ;;  %7234 = vmatprep.subr.mxu0 %v9898_v52  ;;  %v3971_v36 = vld [vmem:[%s11530_s3 + $0x12f0] sm:$0xff] }
 0x339   : > { %7200 = vmatpush3.msra.mxu1 %v3493_v40  ;;  %7235 = vmatpush3.msra.mxu0 %v3586_v41  ;;  %v3969_v40 = vld [vmem:[%s11530_s3 + $0x12e0] sm:$0xff]  ;;  %v3875_v41 = vld [vmem:[%s11530_s3 + $0x1258] sm:$0xff]  ;;  %v4153_v28 = vld [vmem:[%s11530_s3 + $0x13d0] sm:$0xff] }
 0x33a   : > { %7201 = vmatprep.subr.mxu1 %v9898_v52  ;;  %7236 = vmatprep.subr.mxu0 %v9898_v52 }
 0x33b   : > { %7202 = vmatpush3.msra.mxu1 %v3492_v42  ;;  %7203 = vmatprep.mubr.msk.f32.mxu1 %vm7912_vm0, %v9898_v52  ;;  %v3968_v42 = vld [vmem:[%s11530_s3 + $0x12d8] sm:$0xff] }
 0x33c   : > { %7237 = vmatpush3.msra.mxu0 %v3585_v45  ;;  %7238 = vmatprep.mubr.msk.f32.mxu0 %vm7912_vm0, %v9898_v52  ;;  %v3873_v45 = vld [vmem:[%s11530_s3 + $0x1248] sm:$0xff] }
 0x33d   : > { %7204 = vmatmul.mubr.f32.vlgmr.msra.gmra.mxu1 %v3513_v48  ;;  %7239 = vmatmul.mubr.f32.vlgmr.msra.gmra.mxu0 %v3606_v50  ;;  %v3872_v48 = vld [vmem:[%s11530_s3 + $0x1240] sm:$0xff]  ;;  %v3871_v50 = vld [vmem:[%s11530_s3 + $0x1238] sm:$0xff] }
 0x33e   : > { %7241 = vmatprep.subr.mxu1 %v9898_v52  ;;  %7276 = vmatprep.subr.mxu0 %v9898_v52 }
 0x33f   : > { %7242 = vmatpush3.msra.mxu1 %v3693_v51  ;;  %7277 = vmatpush3.msra.mxu0 %v3786_v31  ;;  %v3964_v51 = vld [vmem:[%s11530_s3 + $0x12b8] sm:$0xff]  ;;  %v3870_v31 = vld [vmem:[%s11530_s3 + $0x1230] sm:$0xff] }
 0x340   : > { %7243 = vmatprep.subr.mxu1 %v9898_v52  ;;  %7278 = vmatprep.subr.mxu0 %v9898_v52 }
 0x341   : > { %7244 = vmatpush3.msra.mxu1 %v3692_v53  ;;  %7279 = vmatpush3.msra.mxu0 %v3785_v54  ;;  %v3963_v53 = vld [vmem:[%s11530_s3 + $0x12b0] sm:$0xff]  ;;  %v3869_v54 = vld [vmem:[%s11530_s3 + $0x1228] sm:$0xff] }
 0x342   : > { %7245 = vmatprep.subr.mxu1 %v9898_v52  ;;  %7280 = vmatprep.subr.mxu0 %v9898_v52 }
 0x343   : > { %7246 = vmatpush3.msra.mxu1 %v3691_v55  ;;  %7281 = vmatpush3.msra.mxu0 %v3784_v56  ;;  %v3962_v55 = vld [vmem:[%s11530_s3 + $0x12a8] sm:$0xff]  ;;  %v3868_v56 = vld [vmem:[%s11530_s3 + $0x1220] sm:$0xff] }
 0x344   : > { %7247 = vmatprep.subr.mxu1 %v9898_v52  ;;  %7282 = vmatprep.subr.mxu0 %v9898_v52 }
 0x345   : > { %7248 = vmatpush3.msra.mxu1 %v3690_v57  ;;  %7283 = vmatpush3.msra.mxu0 %v3783_v58  ;;  %v3961_v57 = vld [vmem:[%s11530_s3 + $0x12a0] sm:$0xff] }
 0x346   : > { %7249 = vmatprep.subr.mxu1 %v9898_v52  ;;  %7284 = vmatprep.subr.mxu0 %v9898_v52 }
 0x347   : > { %7250 = vmatpush3.msra.mxu1 %v3689_v59  ;;  %7285 = vmatpush3.msra.mxu0 %v3782_v60  ;;  %v3867_v60 = vld [vmem:[%s11530_s3 + $0x1218] sm:$0xff] }
 0x348   : > { %7251 = vmatprep.subr.mxu1 %v9898_v52  ;;  %7286 = vmatprep.subr.mxu0 %v9898_v52 }
 0x349   : > { %7252 = vmatpush3.msra.mxu1 %v3688_v61  ;;  %7287 = vmatpush3.msra.mxu0 %v3781_v62  ;;  %v3960_v61 = vld [vmem:[%s11530_s3 + $0x1298] sm:$0xff] }
 0x34a   : > { %7253 = vmatprep.subr.mxu1 %v9898_v52  ;;  %7288 = vmatprep.subr.mxu0 %v9898_v52 }
 0x34b   : > { %7254 = vmatpush3.msra.mxu1 %v3687_v63  ;;  %7289 = vmatpush3.msra.mxu0 %v3780_v0 }
 0x34c   : > { %7255 = vmatprep.subr.mxu1 %v9898_v52  ;;  %7290 = vmatprep.subr.mxu0 %v9898_v52  ;;  %v3684_v52 = vld [vmem:[%s11530_s3 + $0x1130] sm:$0xff] }
 0x34d   : > { %7256 = vmatpush3.msra.mxu1 %v3686_v1  ;;  %7291 = vmatpush3.msra.mxu0 %v3779_v2  ;;  %v3866_v1 = vld [vmem:[%s11530_s3 + $0x1210] sm:$0xff] }
 0x34e   : > { %7257 = vmatprep.subr.mxu1 %v10526_v5  ;;  %7292 = vmatprep.subr.mxu0 %v10526_v5  ;;  %v3959_v2 = vld [vmem:[%s11530_s3 + $0x1290] sm:$0xff] }
 0x34f   : > { %7258 = vmatpush3.msra.mxu1 %v3685_v3  ;;  %7293 = vmatpush3.msra.mxu0 %v3778_v4  ;;  %v3881_v4 = vld [vmem:[#allocation2 + $0x96] ss:$4 sm:$0x3] }
 0x350   : > { %7259 = vmatprep.subr.mxu1 %v10526_v5  ;;  %7294 = vmatprep.subr.mxu0 %v10526_v5 }
 0x351   : > { %7260 = vmatpush3.msra.mxu1 %v3684_v52  ;;  %7295 = vmatpush3.msra.mxu0 %v3777_v6  ;;  %v3974_v52 = vld [vmem:[#allocation2 + $0x97] ss:$4 sm:$0x3]  ;;  %v3865_v6 = vld [vmem:[%s11530_s3 + $0x1208] sm:$0xff] }
 0x352   : > { %7261 = vmatprep.subr.mxu1 %v10526_v5  ;;  %7296 = vmatprep.subr.mxu0 %v10526_v5 }
 0x353   : > { %7262 = vmatpush3.msra.mxu1 %v3683_v7  ;;  %7297 = vmatpush3.msra.mxu0 %v3776_v8  ;;  %v2640_v11 = vpop.f32.mrf.mxu1  ;;  %v2735_v12 = vpop.f32.mrf.mxu0  ;;  %v3958_v7 = vld [vmem:[%s11530_s3 + $0x1288] sm:$0xff]  ;;  %v3864_v8 = vld [vmem:[%s11530_s3 + $0x1200] sm:$0xff] }
 0x354   : > { %7263 = vmatprep.subr.mxu1 %v10526_v5  ;;  %7298 = vmatprep.subr.mxu0 %v10526_v5  ;;  %v2644_v15 = vadd.f32 %v2640_v11, %v10430_v37  ;;  %v3877_v37 = vld [vmem:[%s11530_s3 + $0x1268] sm:$0xff]  ;;  %v3957_v11 = vld [vmem:[%s11530_s3 + $0x1280] sm:$0xff] }
 0x355   : > { %7264 = vmatpush3.msra.mxu1 %v3682_v9  ;;  %7299 = vmatpush3.msra.mxu0 %v3775_v10  ;;  %v6855_v16 = vpop.f32.mrf.mxu1  ;;  %v6890_v17 = vpop.f32.mrf.mxu0  ;;  %v3883_v9 = vrot.slane %v3881_v4, 6  ;;  %v3976_v10 = vrot.slane %v3974_v52, 6  ;;  %v4342_v4 = vld [vmem:[%s11530_s3 + $0x14e8] sm:$0xff]  ;;  %v4248_v52 = vld [vmem:[%s11530_s3 + $0x1460] sm:$0xff] }
 0x356   : > { %7265 = vmatprep.subr.mxu1 %v10526_v5  ;;  %7300 = vmatprep.subr.mxu0 %v10526_v5  ;;  %v10569_v22 = vadd.f32 %v2735_v12, %v2644_v15  ;;  %v7835_v12 = vld [vmem:[#allocation2 + $0x56] ss:$4 sm:$0x3] }
 0x357   : > { %7266 = vmatpush3.msra.mxu1 %v3681_v13  ;;  %7301 = vmatpush3.msra.mxu0 %v3774_v14  ;;  %v3885_v13 = vsel %vm482_vm1, %v7835_v12, %v3883_v9  ;;  %v7836_v14 = vld [vmem:[#allocation2 + $0x57] ss:$4 sm:$0x3]  ;;  %v4338_v12 = vld [vmem:[%s11530_s3 + $0x14c8] sm:$0xff] }
 0x358   : > { %7267 = vmatprep.subr.mxu1 %v10526_v5  ;;  %7302 = vmatprep.subr.mxu0 %v10526_v5  ;;  %v3978_v15 = vsel %vm482_vm1, %v7836_v14, %v3976_v10  ;;  %v4065_v16 = vld [vmem:[%s11530_s3 + $0x1378] sm:$0xff]  ;;  %v4246_v9 = vld [vmem:[%s11530_s3 + $0x1450] sm:$0xff]  ;;  %v4337_v14 = vld [vmem:[%s11530_s3 + $0x14c0] sm:$0xff] }
 0x359   : > { %7268 = vmatpush3.msra.mxu1 %v3680_v19  ;;  %7303 = vmatpush3.msra.mxu0 %v3773_v20  ;;  %v4158_v17 = vld [vmem:[%s11530_s3 + $0x13f8] sm:$0xff]  ;;  %v4064_v19 = vld [vmem:[%s11530_s3 + $0x1370] sm:$0xff] }
 0x35a   : > { %7269 = vmatprep.subr.mxu1 %v10526_v5  ;;  %7304 = vmatprep.subr.mxu0 %v10526_v5  ;;  %v4157_v20 = vld [vmem:[%s11530_s3 + $0x13f0] sm:$0xff] }
 0x35b   : > { %7270 = vmatpush3.msra.mxu1 %v3679_v24  ;;  %7305 = vmatpush3.msra.mxu0 %v3772_v25  ;;  %v4155_v24 = vld [vmem:[%s11530_s3 + $0x13e0] sm:$0xff]  ;;  %v4061_v25 = vld [vmem:[%s11530_s3 + $0x1358] sm:$0xff]  ;;  %v4339_v10 = vld [vmem:[%s11530_s3 + $0x14d0] sm:$0xff] }
 0x35c   : > { %7271 = vmatprep.subr.mxu1 %v10526_v5  ;;  %7306 = vmatprep.subr.mxu0 %v10526_v5 }
 0x35d   : > { %7272 = vmatpush3.msra.mxu1 %v3678_v26  ;;  %7273 = vmatprep.mubr.msk.f32.mxu1 %vm7912_vm0, %v10526_v5  ;;  %v4154_v26 = vld [vmem:[%s11530_s3 + $0x13d8] sm:$0xff] }
 0x35e   : > { %7307 = vmatpush3.msra.mxu0 %v3771_v29  ;;  %7308 = vmatprep.mubr.msk.f32.mxu0 %vm7912_vm0, %v10526_v5  ;;  %v4059_v29 = vld [vmem:[%s11530_s3 + $0x1348] sm:$0xff] }
 0x35f   : > { %7274 = vmatmul.mubr.f32.vlgmr.msra.gmra.mxu1 %v3699_v21  ;;  %7309 = vmatmul.mubr.f32.vlgmr.msra.gmra.mxu0 %v3792_v33  ;;  %v4058_v21 = vld [vmem:[%s11530_s3 + $0x1340] sm:$0xff]  ;;  %v4057_v33 = vld [vmem:[%s11530_s3 + $0x1338] sm:$0xff] }
 0x360   : > { %7311 = vmatprep.subr.mxu1 %v10526_v5  ;;  %7346 = vmatprep.subr.mxu0 %v10526_v5 }
 0x361   : > { %7312 = vmatpush3.msra.mxu1 %v3879_v18  ;;  %7347 = vmatpush3.msra.mxu0 %v3972_v34  ;;  %v4150_v18 = vld [vmem:[%s11530_s3 + $0x13b8] sm:$0xff]  ;;  %v4056_v34 = vld [vmem:[%s11530_s3 + $0x1330] sm:$0xff] }
 0x362   : > { %7313 = vmatprep.subr.mxu1 %v10526_v5  ;;  %7348 = vmatprep.subr.mxu0 %v10526_v5 }
 0x363   : > { %7314 = vmatpush3.msra.mxu1 %v3878_v35  ;;  %7349 = vmatpush3.msra.mxu0 %v3971_v36  ;;  %v4149_v35 = vld [vmem:[%s11530_s3 + $0x13b0] sm:$0xff]  ;;  %v4055_v36 = vld [vmem:[%s11530_s3 + $0x1328] sm:$0xff] }
 0x364   : > { %7315 = vmatprep.subr.mxu1 %v10526_v5  ;;  %7350 = vmatprep.subr.mxu0 %v10526_v5 }
 0x365   : > { %7316 = vmatpush3.msra.mxu1 %v3877_v37  ;;  %7351 = vmatpush3.msra.mxu0 %v3970_v38  ;;  %v4148_v37 = vld [vmem:[%s11530_s3 + $0x13a8] sm:$0xff]  ;;  %v4054_v38 = vld [vmem:[%s11530_s3 + $0x1320] sm:$0xff] }
 0x366   : > { %7317 = vmatprep.subr.mxu1 %v10526_v5  ;;  %7352 = vmatprep.subr.mxu0 %v10526_v5 }
 0x367   : > { %7318 = vmatpush3.msra.mxu1 %v3876_v39  ;;  %7353 = vmatpush3.msra.mxu0 %v3969_v40  ;;  %v4147_v39 = vld [vmem:[%s11530_s3 + $0x13a0] sm:$0xff] }
 0x368   : > { %7319 = vmatprep.subr.mxu1 %v10526_v5  ;;  %7354 = vmatprep.subr.mxu0 %v10526_v5 }
 0x369   : > { %7320 = vmatpush3.msra.mxu1 %v3875_v41  ;;  %7355 = vmatpush3.msra.mxu0 %v3968_v42  ;;  %v4053_v42 = vld [vmem:[%s11530_s3 + $0x1318] sm:$0xff] }
 0x36a   : > { %7321 = vmatprep.subr.mxu1 %v10526_v5  ;;  %7356 = vmatprep.subr.mxu0 %v10526_v5 }
 0x36b   : > { %7322 = vmatpush3.msra.mxu1 %v3874_v43  ;;  %7357 = vmatpush3.msra.mxu0 %v3967_v44  ;;  %v4146_v43 = vld [vmem:[%s11530_s3 + $0x1398] sm:$0xff] }
 0x36c   : > { %7323 = vmatprep.subr.mxu1 %v10526_v5  ;;  %7358 = vmatprep.subr.mxu0 %v10526_v5 }
 0x36d   : > { %7324 = vmatpush3.msra.mxu1 %v3873_v45  ;;  %7359 = vmatpush3.msra.mxu0 %v3966_v47 }
 0x36e   : > { %7325 = vmatprep.subr.mxu1 %v10526_v5  ;;  %7360 = vmatprep.subr.mxu0 %v10526_v5 }
 0x36f   : > { %7326 = vmatpush3.msra.mxu1 %v3872_v48  ;;  %7361 = vmatpush3.msra.mxu0 %v3965_v49  ;;  %v4052_v48 = vld [vmem:[%s11530_s3 + $0x1310] sm:$0xff] }
 0x370   : > { %7327 = vmatprep.subr.mxu1 %v10526_v5  ;;  %7362 = vmatprep.subr.mxu0 %v10526_v5  ;;  %v4145_v49 = vld [vmem:[%s11530_s3 + $0x1390] sm:$0xff] }
 0x371   : > { %7328 = vmatpush3.msra.mxu1 %v3871_v50  ;;  %7363 = vmatpush3.msra.mxu0 %v3964_v51  ;;  %v4067_v51 = vld [vmem:[#allocation2 + $0x98] ss:$4 sm:$0x3] }
 0x372   : > { %7329 = vmatprep.subr.mxu1 %v10526_v5  ;;  %7364 = vmatprep.subr.mxu0 %v10526_v5 }
 0x373   : > { %7330 = vmatpush3.msra.mxu1 %v3870_v31  ;;  %7365 = vmatpush3.msra.mxu0 %v3963_v53  ;;  %v4160_v31 = vld [vmem:[#allocation2 + $0x99] ss:$4 sm:$0x3]  ;;  %v4051_v53 = vld [vmem:[%s11530_s3 + $0x1308] sm:$0xff] }
 0x374   : > { %7331 = vmatprep.subr.mxu1 %v10526_v5  ;;  %7366 = vmatprep.subr.mxu0 %v10526_v5 }
 0x375   : > { %7332 = vmatpush3.msra.mxu1 %v3869_v54  ;;  %7367 = vmatpush3.msra.mxu0 %v3962_v55  ;;  %v2830_v58 = vpop.f32.mrf.mxu1  ;;  %v2925_v59 = vpop.f32.mrf.mxu0  ;;  %v4144_v54 = vld [vmem:[%s11530_s3 + $0x1388] sm:$0xff]  ;;  %v4050_v55 = vld [vmem:[%s11530_s3 + $0x1300] sm:$0xff] }
 0x376   : > { %7333 = vmatprep.subr.mxu1 %v10526_v5  ;;  %7368 = vmatprep.subr.mxu0 %v10526_v5  ;;  %v2834_v62 = vadd.f32 %v2830_v58, %v10569_v22  ;;  %v4063_v22 = vld [vmem:[%s11530_s3 + $0x1368] sm:$0xff]  ;;  %v4143_v58 = vld [vmem:[%s11530_s3 + $0x1380] sm:$0xff] }
 0x377   : > { %7334 = vmatpush3.msra.mxu1 %v3868_v56  ;;  %7369 = vmatpush3.msra.mxu0 %v3961_v57  ;;  %v6925_v63 = vpop.f32.mrf.mxu1  ;;  %v6960_v0 = vpop.f32.mrf.mxu0  ;;  %v4069_v56 = vrot.slane %v4067_v51, 6  ;;  %v4162_v57 = vrot.slane %v4160_v31, 6  ;;  %v4528_v51 = vld [vmem:[%s11530_s3 + $0x15e8] sm:$0xff]  ;;  %v4434_v31 = vld [vmem:[%s11530_s3 + $0x1560] sm:$0xff] }
 0x378   : > { %7335 = vmatprep.subr.mxu1 %v10526_v5  ;;  %7370 = vmatprep.subr.mxu0 %v10526_v5  ;;  %v10706_v3 = vadd.f32 %v2925_v59, %v2834_v62  ;;  %v7837_v59 = vld [vmem:[#allocation2 + $0x58] ss:$4 sm:$0x3] }
 0x379   : > { %7336 = vmatpush3.msra.mxu1 %v3867_v60  ;;  %7371 = vmatpush3.msra.mxu0 %v3960_v61  ;;  %v4071_v60 = vsel %vm482_vm1, %v7837_v59, %v4069_v56  ;;  %v7838_v61 = vld [vmem:[#allocation2 + $0x59] ss:$4 sm:$0x3]  ;;  %v4432_v56 = vld [vmem:[%s11530_s3 + $0x1550] sm:$0xff]  ;;  %v4524_v59 = vld [vmem:[%s11530_s3 + $0x15c8] sm:$0xff] }
 0x37a   : > { %7337 = vmatprep.subr.mxu1 %v10526_v5  ;;  %7372 = vmatprep.subr.mxu0 %v10526_v5  ;;  %v4164_v62 = vsel %vm482_vm1, %v7838_v61, %v4162_v57  ;;  %v4251_v63 = vld [vmem:[%s11530_s3 + $0x1478] sm:$0xff]  ;;  %v4525_v57 = vld [vmem:[%s11530_s3 + $0x15d0] sm:$0xff]  ;;  %v4523_v61 = vld [vmem:[%s11530_s3 + $0x15c0] sm:$0xff] }
 0x37b   : > { %7338 = vmatpush3.msra.mxu1 %v3866_v1  ;;  %7373 = vmatpush3.msra.mxu0 %v3959_v2  ;;  %v4344_v0 = vld [vmem:[%s11530_s3 + $0x14f8] sm:$0xff]  ;;  %v4250_v1 = vld [vmem:[%s11530_s3 + $0x1470] sm:$0xff] }
 0x37c   : > { %7339 = vmatprep.subr.mxu1 %v10526_v5  ;;  %7374 = vmatprep.subr.mxu0 %v10526_v5  ;;  %v4343_v2 = vld [vmem:[%s11530_s3 + $0x14f0] sm:$0xff] }
 0x37d   : > { %7340 = vmatpush3.msra.mxu1 %v3865_v6  ;;  %7375 = vmatpush3.msra.mxu0 %v3958_v7  ;;  %v4341_v6 = vld [vmem:[%s11530_s3 + $0x14e0] sm:$0xff]  ;;  %v4247_v7 = vld [vmem:[%s11530_s3 + $0x1458] sm:$0xff] }
 0x37e   : > { %7341 = vmatprep.subr.mxu1 %v10526_v5  ;;  %7376 = vmatprep.subr.mxu0 %v10526_v5 }
 0x37f   : > { %7342 = vmatpush3.msra.mxu1 %v3864_v8  ;;  %7343 = vmatprep.mubr.msk.f32.mxu1 %vm7912_vm0, %v10526_v5  ;;  %v4340_v8 = vld [vmem:[%s11530_s3 + $0x14d8] sm:$0xff] }
 0x380   : > { %7377 = vmatpush3.msra.mxu0 %v3957_v11  ;;  %7378 = vmatprep.mubr.msk.f32.mxu0 %vm7912_vm0, %v10526_v5  ;;  %v4245_v11 = vld [vmem:[%s11530_s3 + $0x1448] sm:$0xff] }
 0x381   : > { %7344 = vmatmul.mubr.f32.vlgmr.msra.gmra.mxu1 %v3885_v13  ;;  %7379 = vmatmul.mubr.f32.vlgmr.msra.gmra.mxu0 %v3978_v15  ;;  %v4244_v13 = vld [vmem:[%s11530_s3 + $0x1440] sm:$0xff]  ;;  %v4243_v15 = vld [vmem:[%s11530_s3 + $0x1438] sm:$0xff] }
 0x382   : > { %7381 = vmatprep.subr.mxu1 %v10526_v5  ;;  %7416 = vmatprep.subr.mxu0 %v10526_v5 }
 0x383   : > { %7382 = vmatpush3.msra.mxu1 %v4065_v16  ;;  %7417 = vmatpush3.msra.mxu0 %v4158_v17  ;;  %v4336_v16 = vld [vmem:[%s11530_s3 + $0x14b8] sm:$0xff]  ;;  %v4242_v17 = vld [vmem:[%s11530_s3 + $0x1430] sm:$0xff] }
 0x384   : > { %7383 = vmatprep.subr.mxu1 %v10526_v5  ;;  %7418 = vmatprep.subr.mxu0 %v10526_v5 }
 0x385   : > { %7384 = vmatpush3.msra.mxu1 %v4064_v19  ;;  %7419 = vmatpush3.msra.mxu0 %v4157_v20  ;;  %v4335_v19 = vld [vmem:[%s11530_s3 + $0x14b0] sm:$0xff]  ;;  %v4241_v20 = vld [vmem:[%s11530_s3 + $0x1428] sm:$0xff] }
 0x386   : > { %7385 = vmatprep.subr.mxu1 %v10526_v5  ;;  %7420 = vmatprep.subr.mxu0 %v10526_v5 }
 0x387   : > { %7386 = vmatpush3.msra.mxu1 %v4063_v22  ;;  %7421 = vmatpush3.msra.mxu0 %v4156_v23  ;;  %v4334_v22 = vld [vmem:[%s11530_s3 + $0x14a8] sm:$0xff]  ;;  %v4240_v23 = vld [vmem:[%s11530_s3 + $0x1420] sm:$0xff] }
 0x388   : > { %7387 = vmatprep.subr.mxu1 %v10526_v5  ;;  %7422 = vmatprep.subr.mxu0 %v10526_v5 }
 0x389   : > { %7388 = vmatpush3.msra.mxu1 %v4062_v46  ;;  %7423 = vmatpush3.msra.mxu0 %v4155_v24  ;;  %v4333_v46 = vld [vmem:[%s11530_s3 + $0x14a0] sm:$0xff] }
 0x38a   : > { %7389 = vmatprep.subr.mxu1 %v10526_v5  ;;  %7424 = vmatprep.subr.mxu0 %v10526_v5 }
 0x38b   : > { %7390 = vmatpush3.msra.mxu1 %v4061_v25  ;;  %7425 = vmatpush3.msra.mxu0 %v4154_v26  ;;  %v4239_v26 = vld [vmem:[%s11530_s3 + $0x1418] sm:$0xff] }
 0x38c   : > { %7391 = vmatprep.subr.mxu1 %v10526_v5  ;;  %7426 = vmatprep.subr.mxu0 %v10526_v5 }
 0x38d   : > { %7392 = vmatpush3.msra.mxu1 %v4060_v27  ;;  %7427 = vmatpush3.msra.mxu0 %v4153_v28  ;;  %v4332_v27 = vld [vmem:[%s11530_s3 + $0x1498] sm:$0xff] }
 0x38e   : > { %7393 = vmatprep.subr.mxu1 %v10526_v5  ;;  %7428 = vmatprep.subr.mxu0 %v10526_v5 }
 0x38f   : > { %7394 = vmatpush3.msra.mxu1 %v4059_v29  ;;  %7429 = vmatpush3.msra.mxu0 %v4152_v30 }
 0x390   : > { %7395 = vmatprep.subr.mxu1 %v10526_v5  ;;  %7430 = vmatprep.subr.mxu0 %v10526_v5 }
 0x391   : > { %7396 = vmatpush3.msra.mxu1 %v4058_v21  ;;  %7431 = vmatpush3.msra.mxu0 %v4151_v32  ;;  %v4238_v21 = vld [vmem:[%s11530_s3 + $0x1410] sm:$0xff] }
 0x392   : > { %7397 = vmatprep.subr.mxu1 %v10526_v5  ;;  %7432 = vmatprep.subr.mxu0 %v10526_v5  ;;  %v4331_v32 = vld [vmem:[%s11530_s3 + $0x1490] sm:$0xff] }
 0x393   : > { %7398 = vmatpush3.msra.mxu1 %v4057_v33  ;;  %7433 = vmatpush3.msra.mxu0 %v4150_v18  ;;  %v4253_v18 = vld [vmem:[#allocation2 + $0x9a] ss:$4 sm:$0x3] }
 0x394   : > { %7399 = vmatprep.subr.mxu1 %v10526_v5  ;;  %7434 = vmatprep.subr.mxu0 %v10526_v5 }
 0x395   : > { %7400 = vmatpush3.msra.mxu1 %v4056_v34  ;;  %7435 = vmatpush3.msra.mxu0 %v4149_v35  ;;  %v4346_v34 = vld [vmem:[#allocation2 + $0x9b] ss:$4 sm:$0x3]  ;;  %v4237_v35 = vld [vmem:[%s11530_s3 + $0x1408] sm:$0xff] }
 0x396   : > { %7401 = vmatprep.subr.mxu1 %v10526_v5  ;;  %7436 = vmatprep.subr.mxu0 %v10526_v5 }
 0x397   : > { %7402 = vmatpush3.msra.mxu1 %v4055_v36  ;;  %7437 = vmatpush3.msra.mxu0 %v4148_v37  ;;  %v3020_v40 = vpop.f32.mrf.mxu1  ;;  %v3115_v41 = vpop.f32.mrf.mxu0  ;;  %v4330_v36 = vld [vmem:[%s11530_s3 + $0x1488] sm:$0xff]  ;;  %v4236_v37 = vld [vmem:[%s11530_s3 + $0x1400] sm:$0xff] }
 0x398   : > { %7403 = vmatprep.subr.mxu1 %v10526_v5  ;;  %7438 = vmatprep.subr.mxu0 %v10526_v5  ;;  %v3024_v44 = vadd.f32 %v3020_v40, %v10706_v3  ;;  %v4249_v3 = vld [vmem:[%s11530_s3 + $0x1468] sm:$0xff]  ;;  %v4329_v40 = vld [vmem:[%s11530_s3 + $0x1480] sm:$0xff] }
 0x399   : > { %7404 = vmatpush3.msra.mxu1 %v4054_v38  ;;  %7439 = vmatpush3.msra.mxu0 %v4147_v39  ;;  %v6995_v45 = vpop.f32.mrf.mxu1  ;;  %v7030_v47 = vpop.f32.mrf.mxu0  ;;  %v4255_v38 = vrot.slane %v4253_v18, 6  ;;  %v4348_v39 = vrot.slane %v4346_v34, 6  ;;  %v4714_v18 = vld [vmem:[%s11530_s3 + $0x16e8] sm:$0xff]  ;;  %v4620_v34 = vld [vmem:[%s11530_s3 + $0x1660] sm:$0xff] }
 0x39a   : > { %7405 = vmatprep.subr.mxu1 %v10526_v5  ;;  %7440 = vmatprep.subr.mxu0 %v10526_v5  ;;  %v10843_v50 = vadd.f32 %v3115_v41, %v3024_v44  ;;  %v7839_v41 = vld [vmem:[#allocation2 + $0x5a] ss:$4 sm:$0x3] }
 0x39b   : > { %7406 = vmatpush3.msra.mxu1 %v4053_v42  ;;  %7441 = vmatpush3.msra.mxu0 %v4146_v43  ;;  %v4257_v42 = vsel %vm482_vm1, %v7839_v41, %v4255_v38  ;;  %v7840_v43 = vld [vmem:[#allocation2 + $0x5b] ss:$4 sm:$0x3]  ;;  %v4618_v38 = vld [vmem:[%s11530_s3 + $0x1650] sm:$0xff]  ;;  %v4710_v41 = vld [vmem:[%s11530_s3 + $0x16c8] sm:$0xff] }
 0x39c   : > { %7407 = vmatprep.subr.mxu1 %v10526_v5  ;;  %7442 = vmatprep.subr.mxu0 %v10526_v5  ;;  %v4350_v44 = vsel %vm482_vm1, %v7840_v43, %v4348_v39  ;;  %v4437_v45 = vld [vmem:[%s11530_s3 + $0x1578] sm:$0xff]  ;;  %v4711_v39 = vld [vmem:[%s11530_s3 + $0x16d0] sm:$0xff]  ;;  %v4709_v43 = vld [vmem:[%s11530_s3 + $0x16c0] sm:$0xff] }
 0x39d   : > { %7408 = vmatpush3.msra.mxu1 %v4052_v48  ;;  %7443 = vmatpush3.msra.mxu0 %v4145_v49  ;;  %v4530_v47 = vld [vmem:[%s11530_s3 + $0x15f8] sm:$0xff]  ;;  %v4436_v48 = vld [vmem:[%s11530_s3 + $0x1570] sm:$0xff] }
 0x39e   : > { %7409 = vmatprep.subr.mxu1 %v10526_v5  ;;  %7444 = vmatprep.subr.mxu0 %v10526_v5  ;;  %v4529_v49 = vld [vmem:[%s11530_s3 + $0x15f0] sm:$0xff] }
 0x39f   : > { %7410 = vmatpush3.msra.mxu1 %v4051_v53  ;;  %7445 = vmatpush3.msra.mxu0 %v4144_v54  ;;  %v4527_v53 = vld [vmem:[%s11530_s3 + $0x15e0] sm:$0xff]  ;;  %v4433_v54 = vld [vmem:[%s11530_s3 + $0x1558] sm:$0xff] }
 0x3a0   : > { %7411 = vmatprep.subr.mxu1 %v10526_v5  ;;  %7446 = vmatprep.subr.mxu0 %v10526_v5 }
 0x3a1   : > { %7412 = vmatpush3.msra.mxu1 %v4050_v55  ;;  %7413 = vmatprep.mubr.msk.f32.mxu1 %vm7912_vm0, %v10526_v5  ;;  %v4526_v55 = vld [vmem:[%s11530_s3 + $0x15d8] sm:$0xff] }
 0x3a2   : > { %7447 = vmatpush3.msra.mxu0 %v4143_v58  ;;  %7448 = vmatprep.mubr.msk.f32.mxu0 %vm7912_vm0, %v10526_v5  ;;  %v4431_v58 = vld [vmem:[%s11530_s3 + $0x1548] sm:$0xff] }
 0x3a3   : > { %7414 = vmatmul.mubr.f32.vlgmr.msra.gmra.mxu1 %v4071_v60  ;;  %7449 = vmatmul.mubr.f32.vlgmr.msra.gmra.mxu0 %v4164_v62  ;;  %v4430_v60 = vld [vmem:[%s11530_s3 + $0x1540] sm:$0xff]  ;;  %v4429_v62 = vld [vmem:[%s11530_s3 + $0x1538] sm:$0xff] }
 0x3a4   : > { %7451 = vmatprep.subr.mxu1 %v10526_v5  ;;  %7486 = vmatprep.subr.mxu0 %v10526_v5 }
 0x3a5   : > { %7452 = vmatpush3.msra.mxu1 %v4251_v63  ;;  %7487 = vmatpush3.msra.mxu0 %v4344_v0  ;;  %v4522_v63 = vld [vmem:[%s11530_s3 + $0x15b8] sm:$0xff]  ;;  %v4428_v0 = vld [vmem:[%s11530_s3 + $0x1530] sm:$0xff] }
 0x3a6   : > { %7453 = vmatprep.subr.mxu1 %v10526_v5  ;;  %7488 = vmatprep.subr.mxu0 %v10526_v5 }
 0x3a7   : > { %7454 = vmatpush3.msra.mxu1 %v4250_v1  ;;  %7489 = vmatpush3.msra.mxu0 %v4343_v2  ;;  %v4521_v1 = vld [vmem:[%s11530_s3 + $0x15b0] sm:$0xff]  ;;  %v4427_v2 = vld [vmem:[%s11530_s3 + $0x1528] sm:$0xff] }
 0x3a8   : > { %7455 = vmatprep.subr.mxu1 %v10526_v5  ;;  %7490 = vmatprep.subr.mxu0 %v10526_v5 }
 0x3a9   : > { %7456 = vmatpush3.msra.mxu1 %v4249_v3  ;;  %7491 = vmatpush3.msra.mxu0 %v4342_v4  ;;  %v4520_v3 = vld [vmem:[%s11530_s3 + $0x15a8] sm:$0xff]  ;;  %v4426_v4 = vld [vmem:[%s11530_s3 + $0x1520] sm:$0xff] }
 0x3aa   : > { %7457 = vmatprep.subr.mxu1 %v10526_v5  ;;  %7492 = vmatprep.subr.mxu0 %v10526_v5 }
 0x3ab   : > { %7458 = vmatpush3.msra.mxu1 %v4248_v52  ;;  %7493 = vmatpush3.msra.mxu0 %v4341_v6  ;;  %v4519_v52 = vld [vmem:[%s11530_s3 + $0x15a0] sm:$0xff] }
 0x3ac   : > { %7459 = vmatprep.subr.mxu1 %v10526_v5  ;;  %7494 = vmatprep.subr.mxu0 %v10526_v5 }
 0x3ad   : > { %7460 = vmatpush3.msra.mxu1 %v4247_v7  ;;  %7495 = vmatpush3.msra.mxu0 %v4340_v8  ;;  %v4425_v8 = vld [vmem:[%s11530_s3 + $0x1518] sm:$0xff] }
 0x3ae   : > { %7461 = vmatprep.subr.mxu1 %v10526_v5  ;;  %7496 = vmatprep.subr.mxu0 %v10526_v5 }
 0x3af   : > { %7462 = vmatpush3.msra.mxu1 %v4246_v9  ;;  %7497 = vmatpush3.msra.mxu0 %v4339_v10  ;;  %v4518_v9 = vld [vmem:[%s11530_s3 + $0x1598] sm:$0xff] }
 0x3b0   : > { %7463 = vmatprep.subr.mxu1 %v10526_v5  ;;  %7498 = vmatprep.subr.mxu0 %v10526_v5 }
 0x3b1   : > { %7464 = vmatpush3.msra.mxu1 %v4245_v11  ;;  %7499 = vmatpush3.msra.mxu0 %v4338_v12 }
 0x3b2   : > { %7465 = vmatprep.subr.mxu1 %v10526_v5  ;;  %7500 = vmatprep.subr.mxu0 %v10526_v5 }
 0x3b3   : > { %7466 = vmatpush3.msra.mxu1 %v4244_v13  ;;  %7501 = vmatpush3.msra.mxu0 %v4337_v14  ;;  %v4424_v13 = vld [vmem:[%s11530_s3 + $0x1510] sm:$0xff] }
 0x3b4   : > { %7467 = vmatprep.subr.mxu1 %v10526_v5  ;;  %7502 = vmatprep.subr.mxu0 %v10526_v5  ;;  %v4517_v14 = vld [vmem:[%s11530_s3 + $0x1590] sm:$0xff] }
 0x3b5   : > { %7468 = vmatpush3.msra.mxu1 %v4243_v15  ;;  %7503 = vmatpush3.msra.mxu0 %v4336_v16  ;;  %v4439_v16 = vld [vmem:[#allocation2 + $0xa5] ss:$4 sm:$0x3] }
 0x3b6   : > { %7469 = vmatprep.subr.mxu1 %v10526_v5  ;;  %7504 = vmatprep.subr.mxu0 %v10526_v5 }
 0x3b7   : > { %7470 = vmatpush3.msra.mxu1 %v4242_v17  ;;  %7505 = vmatpush3.msra.mxu0 %v4335_v19  ;;  %v4532_v17 = vld [vmem:[#allocation2 + $0xa6] ss:$4 sm:$0x3] }
 0x3b8   : > { %7471 = vmatprep.subr.mxu1 %v10526_v5  ;;  %7506 = vmatprep.subr.mxu0 %v10526_v5  ;;  %v4423_v19 = vld [vmem:[%s11530_s3 + $0x1508] sm:$0xff] }
 0x3b9   : > { %7472 = vmatpush3.msra.mxu1 %v4241_v20  ;;  %7507 = vmatpush3.msra.mxu0 %v4334_v22  ;;  %v3208_v24 = vpop.f32.mrf.mxu1  ;;  %v3301_v25 = vpop.f32.mrf.mxu0  ;;  %v4516_v20 = vld [vmem:[%s11530_s3 + $0x1588] sm:$0xff]  ;;  %v4422_v22 = vld [vmem:[%s11530_s3 + $0x1500] sm:$0xff] }
 0x3ba   : > { %7473 = vmatprep.subr.mxu1 %v10526_v5  ;;  %7508 = vmatprep.subr.mxu0 %v10526_v5  ;;  %v3212_v28 = vadd.f32 %v3208_v24, %v10843_v50  ;;  %v4435_v50 = vld [vmem:[%s11530_s3 + $0x1568] sm:$0xff]  ;;  %v4515_v24 = vld [vmem:[%s11530_s3 + $0x1580] sm:$0xff] }
 0x3bb   : > { %7474 = vmatpush3.msra.mxu1 %v4240_v23  ;;  %7509 = vmatpush3.msra.mxu0 %v4333_v46  ;;  %v7065_v29 = vpop.f32.mrf.mxu1  ;;  %v7100_v30 = vpop.f32.mrf.mxu0  ;;  %v4441_v23 = vrot.slane %v4439_v16, 6  ;;  %v4534_v46 = vrot.slane %v4532_v17, 6  ;;  %v4900_v16 = vld [vmem:[%s11530_s3 + $0x17e8] sm:$0xff]  ;;  %v4806_v17 = vld [vmem:[%s11530_s3 + $0x1760] sm:$0xff] }
 0x3bc   : > { %7475 = vmatprep.subr.mxu1 %v10526_v5  ;;  %7510 = vmatprep.subr.mxu0 %v10526_v5  ;;  %v10980_v33 = vadd.f32 %v3301_v25, %v3212_v28  ;;  %v7841_v25 = vld [vmem:[#allocation2 + $0x65] ss:$4 sm:$0x3]  ;;  %v4623_v29 = vld [vmem:[%s11530_s3 + $0x1678] sm:$0xff] }
 0x3bd   : > { %7476 = vmatpush3.msra.mxu1 %v4239_v26  ;;  %7511 = vmatpush3.msra.mxu0 %v4332_v27  ;;  %v4443_v26 = vsel %vm482_vm1, %v7841_v25, %v4441_v23  ;;  %v7842_v27 = vld [vmem:[#allocation2 + $0x66] ss:$4 sm:$0x3]  ;;  %v4716_v30 = vld [vmem:[%s11530_s3 + $0x16f8] sm:$0xff]  ;;  %v4804_v23 = vld [vmem:[%s11530_s3 + $0x1750] sm:$0xff] }
 0x3be   : > { %7477 = vmatprep.subr.mxu1 %v10526_v5  ;;  %7512 = vmatprep.subr.mxu0 %v10526_v5  ;;  %v4536_v28 = vsel %vm482_vm1, %v7842_v27, %v4534_v46  ;;  %v4897_v46 = vld [vmem:[%s11530_s3 + $0x17d0] sm:$0xff]  ;;  %v4896_v25 = vld [vmem:[%s11530_s3 + $0x17c8] sm:$0xff]  ;;  %v4895_v27 = vld [vmem:[%s11530_s3 + $0x17c0] sm:$0xff] }
 0x3bf   : > { %7478 = vmatpush3.msra.mxu1 %v4238_v21  ;;  %7513 = vmatpush3.msra.mxu0 %v4331_v32  ;;  %v11149_v21 = vld [vmem:[#allocation2] sm:$0xff]  ;;  %v4715_v32 = vld [vmem:[%s11530_s3 + $0x16f0] sm:$0xff] }
 0x3c0   : > { %7479 = vmatprep.subr.mxu1 %v10526_v5  ;;  %7514 = vmatprep.subr.mxu0 %v10526_v5 }
 0x3c1   : > { %7480 = vmatpush3.msra.mxu1 %v4237_v35  ;;  %7515 = vmatpush3.msra.mxu0 %v4330_v36  ;;  %v4713_v35 = vld [vmem:[%s11530_s3 + $0x16e0] sm:$0xff]  ;;  %v4619_v36 = vld [vmem:[%s11530_s3 + $0x1658] sm:$0xff] }
 0x3c2   : > { %7481 = vmatprep.subr.mxu1 %v10526_v5  ;;  %7516 = vmatprep.subr.mxu0 %v10526_v5 }
 0x3c3   : > { %7482 = vmatpush3.msra.mxu1 %v4236_v37  ;;  %7483 = vmatprep.mubr.msk.f32.mxu1 %vm7912_vm0, %v10526_v5  ;;  %v4712_v37 = vld [vmem:[%s11530_s3 + $0x16d8] sm:$0xff] }
 0x3c4   : > { %7517 = vmatpush3.msra.mxu0 %v4329_v40  ;;  %7518 = vmatprep.mubr.msk.f32.mxu0 %vm7912_vm0, %v10526_v5  ;;  %v4617_v40 = vld [vmem:[%s11530_s3 + $0x1648] sm:$0xff] }
 0x3c5   : > { %7484 = vmatmul.mubr.f32.vlgmr.msra.gmra.mxu1 %v4257_v42  ;;  %7519 = vmatmul.mubr.f32.vlgmr.msra.gmra.mxu0 %v4350_v44  ;;  %v4616_v42 = vld [vmem:[%s11530_s3 + $0x1640] sm:$0xff]  ;;  %v4615_v44 = vld [vmem:[%s11530_s3 + $0x1638] sm:$0xff] }
 0x3c6   : > { %7521 = vmatprep.subr.mxu1 %v10526_v5  ;;  %7556 = vmatprep.subr.mxu0 %v10526_v5 }
 0x3c7   : > { %7522 = vmatpush3.msra.mxu1 %v4437_v45  ;;  %7557 = vmatpush3.msra.mxu0 %v4530_v47  ;;  %v4708_v45 = vld [vmem:[%s11530_s3 + $0x16b8] sm:$0xff]  ;;  %v4614_v47 = vld [vmem:[%s11530_s3 + $0x1630] sm:$0xff] }
 0x3c8   : > { %7523 = vmatprep.subr.mxu1 %v10526_v5  ;;  %7558 = vmatprep.subr.mxu0 %v10526_v5 }
 0x3c9   : > { %7524 = vmatpush3.msra.mxu1 %v4436_v48  ;;  %7559 = vmatpush3.msra.mxu0 %v4529_v49  ;;  %v4707_v48 = vld [vmem:[%s11530_s3 + $0x16b0] sm:$0xff]  ;;  %v4613_v49 = vld [vmem:[%s11530_s3 + $0x1628] sm:$0xff] }
 0x3ca   : > { %7525 = vmatprep.subr.mxu1 %v10526_v5  ;;  %7560 = vmatprep.subr.mxu0 %v10526_v5 }
 0x3cb   : > { %7526 = vmatpush3.msra.mxu1 %v4435_v50  ;;  %7561 = vmatpush3.msra.mxu0 %v4528_v51  ;;  %v4706_v50 = vld [vmem:[%s11530_s3 + $0x16a8] sm:$0xff]  ;;  %v4612_v51 = vld [vmem:[%s11530_s3 + $0x1620] sm:$0xff] }
 0x3cc   : > { %7527 = vmatprep.subr.mxu1 %v10526_v5  ;;  %7562 = vmatprep.subr.mxu0 %v10526_v5 }
 0x3cd   : > { %7528 = vmatpush3.msra.mxu1 %v4434_v31  ;;  %7563 = vmatpush3.msra.mxu0 %v4527_v53  ;;  %v4705_v31 = vld [vmem:[%s11530_s3 + $0x16a0] sm:$0xff] }
 0x3ce   : > { %7529 = vmatprep.subr.mxu1 %v10526_v5  ;;  %7564 = vmatprep.subr.mxu0 %v10526_v5 }
 0x3cf   : > { %7530 = vmatpush3.msra.mxu1 %v4433_v54  ;;  %7565 = vmatpush3.msra.mxu0 %v4526_v55  ;;  %v4611_v55 = vld [vmem:[%s11530_s3 + $0x1618] sm:$0xff] }
 0x3d0   : > { %7531 = vmatprep.subr.mxu1 %v10526_v5  ;;  %7566 = vmatprep.subr.mxu0 %v10526_v5 }
 0x3d1   : > { %7532 = vmatpush3.msra.mxu1 %v4432_v56  ;;  %7567 = vmatpush3.msra.mxu0 %v4525_v57  ;;  %v4704_v56 = vld [vmem:[%s11530_s3 + $0x1698] sm:$0xff] }
 0x3d2   : > { %7533 = vmatprep.subr.mxu1 %v10526_v5  ;;  %7568 = vmatprep.subr.mxu0 %v10526_v5 }
 0x3d3   : > { %7534 = vmatpush3.msra.mxu1 %v4431_v58  ;;  %7569 = vmatpush3.msra.mxu0 %v4524_v59 }
 0x3d4   : > { %7535 = vmatprep.subr.mxu1 %v10526_v5  ;;  %7570 = vmatprep.subr.mxu0 %v10526_v5 }
 0x3d5   : > { %7536 = vmatpush3.msra.mxu1 %v4430_v60  ;;  %7571 = vmatpush3.msra.mxu0 %v4523_v61  ;;  %v4610_v60 = vld [vmem:[%s11530_s3 + $0x1610] sm:$0xff] }
 0x3d6   : > { %7537 = vmatprep.subr.mxu1 %v10526_v5  ;;  %7572 = vmatprep.subr.mxu0 %v10526_v5  ;;  %v4703_v61 = vld [vmem:[%s11530_s3 + $0x1690] sm:$0xff] }
 0x3d7   : > { %7538 = vmatpush3.msra.mxu1 %v4429_v62  ;;  %7573 = vmatpush3.msra.mxu0 %v4522_v63  ;;  %v4625_v63 = vld [vmem:[#allocation2 + $0xa7] ss:$4 sm:$0x3] }
 0x3d8   : > { %7539 = vmatprep.subr.mxu1 %v10526_v5  ;;  %7574 = vmatprep.subr.mxu0 %v10526_v5 }
 0x3d9   : > { %7540 = vmatpush3.msra.mxu1 %v4428_v0  ;;  %7575 = vmatpush3.msra.mxu0 %v4521_v1  ;;  %v4718_v0 = vld [vmem:[#allocation2 + $0xa8] ss:$4 sm:$0x3] }
 0x3da   : > { %7541 = vmatprep.subr.mxu1 %v10526_v5  ;;  %7576 = vmatprep.subr.mxu0 %v10526_v5  ;;  %v4609_v1 = vld [vmem:[%s11530_s3 + $0x1608] sm:$0xff] }
 0x3db   : > { %7542 = vmatpush3.msra.mxu1 %v4427_v2  ;;  %7577 = vmatpush3.msra.mxu0 %v4520_v3  ;;  %v3394_v6 = vpop.f32.mrf.mxu1  ;;  %v3487_v7 = vpop.f32.mrf.mxu0  ;;  %v4702_v2 = vld [vmem:[%s11530_s3 + $0x1688] sm:$0xff]  ;;  %v4608_v3 = vld [vmem:[%s11530_s3 + $0x1600] sm:$0xff] }
 0x3dc   : > { %7543 = vmatprep.subr.mxu1 %v10526_v5  ;;  %7578 = vmatprep.subr.mxu0 %v10526_v5  ;;  %v3398_v10 = vadd.f32 %v3394_v6, %v10980_v33  ;;  %v4621_v33 = vld [vmem:[%s11530_s3 + $0x1668] sm:$0xff]  ;;  %v4701_v6 = vld [vmem:[%s11530_s3 + $0x1680] sm:$0xff] }
 0x3dd   : > { %7544 = vmatpush3.msra.mxu1 %v4426_v4  ;;  %7579 = vmatpush3.msra.mxu0 %v4519_v52  ;;  %v7135_v11 = vpop.f32.mrf.mxu1  ;;  %v7170_v12 = vpop.f32.mrf.mxu0  ;;  %v4627_v4 = vrot.slane %v4625_v63, 6  ;;  %v4720_v52 = vrot.slane %v4718_v0, 6  ;;  %v4990_v63 = vld [vmem:[%s11530_s3 + $0x1850] sm:$0xff]  ;;  %v4989_v0 = vld [vmem:[%s11530_s3 + $0x1848] sm:$0xff] }
 0x3de   : > { %7545 = vmatprep.subr.mxu1 %v10526_v5  ;;  %7580 = vmatprep.subr.mxu0 %v10526_v5  ;;  %v11117_v15 = vadd.f32 %v3487_v7, %v3398_v10  ;;  %v7844_v7 = vld [vmem:[#allocation2 + $0x67] ss:$4 sm:$0x3]  ;;  %v4809_v11 = vld [vmem:[%s11530_s3 + $0x1778] sm:$0xff] }
 0x3df   : > { %7546 = vmatpush3.msra.mxu1 %v4425_v8  ;;  %7581 = vmatpush3.msra.mxu0 %v4518_v9  ;;  %v4629_v8 = vsel %vm482_vm1, %v7844_v7, %v4627_v4  ;;  %v7845_v9 = vld [vmem:[#allocation2 + $0x68] ss:$4 sm:$0x3]  ;;  %v4902_v12 = vld [vmem:[%s11530_s3 + $0x17f8] sm:$0xff] }
 0x3e0   : > { %7547 = vmatprep.subr.mxu1 %v10526_v5  ;;  %7582 = vmatprep.subr.mxu0 %v10526_v5  ;;  %v4722_v10 = vsel %vm482_vm1, %v7845_v9, %v4720_v52  ;;  %v4985_v4 = vld [vmem:[%s11530_s3 + $0x1828] sm:$0xff]  ;;  %v4984_v52 = vld [vmem:[%s11530_s3 + $0x1820] sm:$0xff] }
 0x3e1   : > { %7548 = vmatpush3.msra.mxu1 %v4424_v13  ;;  %7583 = vmatpush3.msra.mxu0 %v4517_v14  ;;  %v4808_v13 = vld [vmem:[%s11530_s3 + $0x1770] sm:$0xff] }
 0x3e2   : > { %7549 = vmatprep.subr.mxu1 %v10526_v5  ;;  %7584 = vmatprep.subr.mxu0 %v10526_v5  ;;  %v4901_v14 = vld [vmem:[%s11530_s3 + $0x17f0] sm:$0xff] }
 0x3e3   : > { %7550 = vmatpush3.msra.mxu1 %v4423_v19  ;;  %7585 = vmatpush3.msra.mxu0 %v4516_v20  ;;  %v4899_v19 = vld [vmem:[%s11530_s3 + $0x17e0] sm:$0xff]  ;;  %v4805_v20 = vld [vmem:[%s11530_s3 + $0x1758] sm:$0xff] }
 0x3e4   : > { %7551 = vmatprep.subr.mxu1 %v10526_v5  ;;  %7586 = vmatprep.subr.mxu0 %v10526_v5 }
 0x3e5   : > { %7552 = vmatpush3.msra.mxu1 %v4422_v22  ;;  %7553 = vmatprep.mubr.msk.f32.mxu1 %vm7912_vm0, %v10526_v5  ;;  %v4898_v22 = vld [vmem:[%s11530_s3 + $0x17d8] sm:$0xff] }
 0x3e6   : > { %7587 = vmatpush3.msra.mxu0 %v4515_v24  ;;  %7588 = vmatprep.mubr.msk.f32.mxu0 %vm7912_vm0, %v10526_v5  ;;  %v4622_v5 = vld [vmem:[%s11530_s3 + $0x1670] sm:$0xff]  ;;  %v4803_v24 = vld [vmem:[%s11530_s3 + $0x1748] sm:$0xff] }
 0x3e7   : > { %7554 = vmatmul.mubr.f32.vlgmr.msra.gmra.mxu1 %v4443_v26  ;;  %7589 = vmatmul.mubr.f32.vlgmr.msra.gmra.mxu0 %v4536_v28  ;;  %v4802_v26 = vld [vmem:[%s11530_s3 + $0x1740] sm:$0xff]  ;;  %v4801_v28 = vld [vmem:[%s11530_s3 + $0x1738] sm:$0xff] }
 0x3e8   : > { %7591 = vmatprep.subr.mxu1 %v11149_v21  ;;  %7626 = vmatprep.subr.mxu0 %v11149_v21 }
 0x3e9   : > { %7592 = vmatpush3.msra.mxu1 %v4623_v29  ;;  %7627 = vmatpush3.msra.mxu0 %v4716_v30  ;;  %v4894_v29 = vld [vmem:[%s11530_s3 + $0x17b8] sm:$0xff]  ;;  %v4800_v30 = vld [vmem:[%s11530_s3 + $0x1730] sm:$0xff] }
 0x3ea   : > { %7593 = vmatprep.subr.mxu1 %v11149_v21  ;;  %7628 = vmatprep.subr.mxu0 %v11149_v21 }
 0x3eb   : > { %7594 = vmatpush3.msra.mxu1 %v4622_v5  ;;  %7629 = vmatpush3.msra.mxu0 %v4715_v32  ;;  %v4893_v5 = vld [vmem:[%s11530_s3 + $0x17b0] sm:$0xff]  ;;  %v4799_v32 = vld [vmem:[%s11530_s3 + $0x1728] sm:$0xff] }
 0x3ec   : > { %7595 = vmatprep.subr.mxu1 %v11149_v21  ;;  %7630 = vmatprep.subr.mxu0 %v11149_v21 }
 0x3ed   : > { %7596 = vmatpush3.msra.mxu1 %v4621_v33  ;;  %7631 = vmatpush3.msra.mxu0 %v4714_v18  ;;  %v4892_v33 = vld [vmem:[%s11530_s3 + $0x17a8] sm:$0xff]  ;;  %v4798_v18 = vld [vmem:[%s11530_s3 + $0x1720] sm:$0xff] }
 0x3ee   : > { %7597 = vmatprep.subr.mxu1 %v11149_v21  ;;  %7632 = vmatprep.subr.mxu0 %v11149_v21 }
 0x3ef   : > { %7598 = vmatpush3.msra.mxu1 %v4620_v34  ;;  %7633 = vmatpush3.msra.mxu0 %v4713_v35  ;;  %v4891_v34 = vld [vmem:[%s11530_s3 + $0x17a0] sm:$0xff] }
 0x3f0   : > { %7599 = vmatprep.subr.mxu1 %v11149_v21  ;;  %7634 = vmatprep.subr.mxu0 %v11149_v21 }
 0x3f1   : > { %7600 = vmatpush3.msra.mxu1 %v4619_v36  ;;  %7635 = vmatpush3.msra.mxu0 %v4712_v37  ;;  %v4797_v37 = vld [vmem:[%s11530_s3 + $0x1718] sm:$0xff] }
 0x3f2   : > { %7601 = vmatprep.subr.mxu1 %v11149_v21  ;;  %7636 = vmatprep.subr.mxu0 %v11149_v21 }
 0x3f3   : > { %7602 = vmatpush3.msra.mxu1 %v4618_v38  ;;  %7637 = vmatpush3.msra.mxu0 %v4711_v39  ;;  %v4890_v38 = vld [vmem:[%s11530_s3 + $0x1798] sm:$0xff] }
 0x3f4   : > { %7603 = vmatprep.subr.mxu1 %v11149_v21  ;;  %7638 = vmatprep.subr.mxu0 %v11149_v21 }
 0x3f5   : > { %7604 = vmatpush3.msra.mxu1 %v4617_v40  ;;  %7639 = vmatpush3.msra.mxu0 %v4710_v41 }
 0x3f6   : > { %7605 = vmatprep.subr.mxu1 %v11149_v21  ;;  %7640 = vmatprep.subr.mxu0 %v11149_v21 }
 0x3f7   : > { %7606 = vmatpush3.msra.mxu1 %v4616_v42  ;;  %7641 = vmatpush3.msra.mxu0 %v4709_v43  ;;  %v4796_v42 = vld [vmem:[%s11530_s3 + $0x1710] sm:$0xff] }
 0x3f8   : > { %7607 = vmatprep.subr.mxu1 %v11149_v21  ;;  %7642 = vmatprep.subr.mxu0 %v11149_v21  ;;  %v4889_v43 = vld [vmem:[%s11530_s3 + $0x1790] sm:$0xff] }
 0x3f9   : > { %7608 = vmatpush3.msra.mxu1 %v4615_v44  ;;  %7643 = vmatpush3.msra.mxu0 %v4708_v45  ;;  %v4811_v45 = vld [vmem:[#allocation2 + $0xa9] ss:$4 sm:$0x3] }
 0x3fa   : > { %7609 = vmatprep.subr.mxu1 %v11149_v21  ;;  %7644 = vmatprep.subr.mxu0 %v11149_v21 }
 0x3fb   : > { %7610 = vmatpush3.msra.mxu1 %v4614_v47  ;;  %7645 = vmatpush3.msra.mxu0 %v4707_v48  ;;  %v4904_v47 = vld [vmem:[#allocation2 + $0xaa] ss:$4 sm:$0x3] }
 0x3fc   : > { %7611 = vmatprep.subr.mxu1 %v11149_v21  ;;  %7646 = vmatprep.subr.mxu0 %v11149_v21  ;;  %v4795_v48 = vld [vmem:[%s11530_s3 + $0x1708] sm:$0xff] }
 0x3fd   : > { %7612 = vmatpush3.msra.mxu1 %v4613_v49  ;;  %7647 = vmatpush3.msra.mxu0 %v4706_v50  ;;  %v3580_v53 = vpop.f32.mrf.mxu1  ;;  %v3673_v54 = vpop.f32.mrf.mxu0  ;;  %v4888_v49 = vld [vmem:[%s11530_s3 + $0x1788] sm:$0xff]  ;;  %v4794_v50 = vld [vmem:[%s11530_s3 + $0x1700] sm:$0xff] }
 0x3fe   : > { %7613 = vmatprep.subr.mxu1 %v11149_v21  ;;  %7648 = vmatprep.subr.mxu0 %v11149_v21  ;;  %v3584_v57 = vadd.f32 %v3580_v53, %v11117_v15  ;;  %v4807_v15 = vld [vmem:[%s11530_s3 + $0x1768] sm:$0xff]  ;;  %v4887_v53 = vld [vmem:[%s11530_s3 + $0x1780] sm:$0xff] }
 0x3ff   : > { %7614 = vmatpush3.msra.mxu1 %v4612_v51  ;;  %7649 = vmatpush3.msra.mxu0 %v4705_v31  ;;  %v7205_v58 = vpop.f32.mrf.mxu1  ;;  %v7240_v59 = vpop.f32.mrf.mxu0  ;;  %v4813_v51 = vrot.slane %v4811_v45, 6  ;;  %v4906_v31 = vrot.slane %v4904_v47, 6 }
 0x400   : > { %7615 = vmatprep.subr.mxu1 %v11149_v21  ;;  %7650 = vmatprep.subr.mxu0 %v11149_v21  ;;  %v11256_v62 = vadd.f32 %v3673_v54, %v3584_v57  ;;  %v7846_v54 = vld [vmem:[#allocation2 + $0x69] ss:$4 sm:$0x3]  ;;  %v4995_v58 = vld [vmem:[%s11530_s3 + $0x1878] sm:$0xff]  ;;  %v4994_v59 = vld [vmem:[%s11530_s3 + $0x1870] sm:$0xff] }
 0x401   : > { %7616 = vmatpush3.msra.mxu1 %v4611_v55  ;;  %7651 = vmatpush3.msra.mxu0 %v4704_v56  ;;  %v4815_v55 = vsel %vm482_vm1, %v7846_v54, %v4813_v51  ;;  %v7847_v56 = vld [vmem:[#allocation2 + $0x6a] ss:$4 sm:$0x3] }
 0x402   : > { %7617 = vmatprep.subr.mxu1 %v11149_v21  ;;  %7652 = vmatprep.subr.mxu0 %v11149_v21  ;;  %v4908_v57 = vsel %vm482_vm1, %v7847_v56, %v4906_v31 }
 0x403   : > { %7618 = vmatpush3.msra.mxu1 %v4610_v60  ;;  %7653 = vmatpush3.msra.mxu0 %v4703_v61  ;;  %v4993_v60 = vld [vmem:[%s11530_s3 + $0x1868] sm:$0xff]  ;;  %v4992_v61 = vld [vmem:[%s11530_s3 + $0x1860] sm:$0xff] }
 0x404   : > { %7619 = vmatprep.subr.mxu1 %v11149_v21  ;;  %7654 = vmatprep.subr.mxu0 %v11149_v21 }
 0x405   : > { %7620 = vmatpush3.msra.mxu1 %v4609_v1  ;;  %7655 = vmatpush3.msra.mxu0 %v4702_v2  ;;  %v4988_v1 = vld [vmem:[%s11530_s3 + $0x1840] sm:$0xff]  ;;  %v4987_v2 = vld [vmem:[%s11530_s3 + $0x1838] sm:$0xff] }
 0x406   : > { %7621 = vmatprep.subr.mxu1 %v11149_v21  ;;  %7656 = vmatprep.subr.mxu0 %v11149_v21 }
 0x407   : > { %7622 = vmatpush3.msra.mxu1 %v4608_v3  ;;  %7623 = vmatprep.mubr.msk.f32.mxu1 %vm7912_vm0, %v11149_v21  ;;  %v4986_v3 = vld [vmem:[%s11530_s3 + $0x1830] sm:$0xff] }
 0x408   : > { %7657 = vmatpush3.msra.mxu0 %v4701_v6  ;;  %7658 = vmatprep.mubr.msk.f32.mxu0 %vm7912_vm0, %v11149_v21 }
 0x409   : > { %7624 = vmatmul.mubr.f32.vlgmr.msra.gmra.mxu1 %v4629_v8  ;;  %7659 = vmatmul.mubr.f32.vlgmr.msra.gmra.mxu0 %v4722_v10  ;;  %v4983_v8 = vld [vmem:[%s11530_s3 + $0x1818] sm:$0xff] }
 0x40a   : > { %7661 = vmatprep.subr.mxu1 %v11149_v21  ;;  %7696 = vmatprep.subr.mxu0 %v11149_v21 }
 0x40b   : > { %7662 = vmatpush3.msra.mxu1 %v4809_v11  ;;  %7697 = vmatpush3.msra.mxu0 %v4902_v12  ;;  %v4982_v12 = vld [vmem:[%s11530_s3 + $0x1810] sm:$0xff] }
 0x40c   : > { %7663 = vmatprep.subr.mxu1 %v11149_v21  ;;  %7698 = vmatprep.subr.mxu0 %v11149_v21 }
 0x40d   : > { %7664 = vmatpush3.msra.mxu1 %v4808_v13  ;;  %7699 = vmatpush3.msra.mxu0 %v4901_v14  ;;  %v4997_v14 = vld [vmem:[#allocation2 + $0xab] ss:$4 sm:$0x3] }
 0x40e   : > { %7665 = vmatprep.subr.mxu1 %v11149_v21  ;;  %7700 = vmatprep.subr.mxu0 %v11149_v21 }
 0x40f   : > { %7666 = vmatpush3.msra.mxu1 %v4807_v15  ;;  %7701 = vmatpush3.msra.mxu0 %v4900_v16  ;;  %v4981_v15 = vld [vmem:[%s11530_s3 + $0x1808] sm:$0xff]  ;;  %v4999_v16 = vrot.slane %v4997_v14, 6 }
 0x410   : > { %7667 = vmatprep.subr.mxu1 %v11149_v21  ;;  %7702 = vmatprep.subr.mxu0 %v11149_v21 }
 0x411   : > { %7668 = vmatpush3.msra.mxu1 %v4806_v17  ;;  %7703 = vmatpush3.msra.mxu0 %v4899_v19  ;;  %v4980_v17 = vld [vmem:[%s11530_s3 + $0x1800] sm:$0xff]  ;;  %v7848_v19 = vld [vmem:[#allocation2 + $0x6b] ss:$4 sm:$0x3] }
 0x412   : > { %7669 = vmatprep.subr.mxu1 %v11149_v21  ;;  %7704 = vmatprep.subr.mxu0 %v11149_v21 }
 0x413   : > { %7670 = vmatpush3.msra.mxu1 %v4805_v20  ;;  %7705 = vmatpush3.msra.mxu0 %v4898_v22  ;;  %v5001_v20 = vsel %vm482_vm1, %v7848_v19, %v4999_v16 }
 0x414   : > { %7671 = vmatprep.subr.mxu1 %v11149_v21  ;;  %7706 = vmatprep.subr.mxu0 %v11149_v21 }
 0x415   : > { %7672 = vmatpush3.msra.mxu1 %v4804_v23  ;;  %7707 = vmatpush3.msra.mxu0 %v4897_v46 }
 0x416   : > { %7673 = vmatprep.subr.mxu1 %v11149_v21  ;;  %7708 = vmatprep.subr.mxu0 %v11149_v21 }
 0x417   : > { %7674 = vmatpush3.msra.mxu1 %v4803_v24  ;;  %7709 = vmatpush3.msra.mxu0 %v4896_v25 }
 0x418   : > { %7675 = vmatprep.subr.mxu1 %v11149_v21  ;;  %7710 = vmatprep.subr.mxu0 %v11149_v21 }
 0x419   : > { %7676 = vmatpush3.msra.mxu1 %v4802_v26  ;;  %7711 = vmatpush3.msra.mxu0 %v4895_v27 }
 0x41a   : > { %7677 = vmatprep.subr.mxu1 %v11149_v21  ;;  %7712 = vmatprep.subr.mxu0 %v11149_v21 }
 0x41b   : > { %7678 = vmatpush3.msra.mxu1 %v4801_v28  ;;  %7713 = vmatpush3.msra.mxu0 %v4894_v29 }
 0x41c   : > { %7679 = vmatprep.subr.mxu1 %v11149_v21  ;;  %7714 = vmatprep.subr.mxu0 %v11149_v21 }
 0x41d   : > { %7680 = vmatpush3.msra.mxu1 %v4800_v30  ;;  %7715 = vmatpush3.msra.mxu0 %v4893_v5 }
 0x41e   : > { %7681 = vmatprep.subr.mxu1 %v11149_v21  ;;  %7716 = vmatprep.subr.mxu0 %v11149_v21 }
 0x41f   : > { %7682 = vmatpush3.msra.mxu1 %v4799_v32  ;;  %7717 = vmatpush3.msra.mxu0 %v4892_v33  ;;  %v3766_v35 = vpop.f32.mrf.mxu1  ;;  %v3859_v36 = vpop.f32.mrf.mxu0 }
 0x420   : > { %7683 = vmatprep.subr.mxu1 %v11149_v21  ;;  %7718 = vmatprep.subr.mxu0 %v11149_v21  ;;  %v3770_v39 = vadd.f32 %v3766_v35, %v11256_v62  ;;  %v4991_v62 = vld [vmem:[%s11530_s3 + $0x1858] sm:$0xff] }
 0x421   : > { %7684 = vmatpush3.msra.mxu1 %v4798_v18  ;;  %7719 = vmatpush3.msra.mxu0 %v4891_v34  ;;  %v7275_v40 = vpop.f32.mrf.mxu1  ;;  %v7310_v41 = vpop.f32.mrf.mxu0 }
 0x422   : > { %7685 = vmatprep.subr.mxu1 %v11149_v21  ;;  %7720 = vmatprep.subr.mxu0 %v11149_v21  ;;  %v11393_v44 = vadd.f32 %v3859_v36, %v3770_v39 }
 0x423   : > { %7686 = vmatpush3.msra.mxu1 %v4797_v37  ;;  %7721 = vmatpush3.msra.mxu0 %v4890_v38 }
 0x424   : > { %7687 = vmatprep.subr.mxu1 %v11149_v21  ;;  %7722 = vmatprep.subr.mxu0 %v11149_v21 }
 0x425   : > { %7688 = vmatpush3.msra.mxu1 %v4796_v42  ;;  %7723 = vmatpush3.msra.mxu0 %v4889_v43 }
 0x426   : > { %7689 = vmatprep.subr.mxu1 %v11149_v21  ;;  %7724 = vmatprep.subr.mxu0 %v11149_v21 }
 0x427   : > { %7690 = vmatpush3.msra.mxu1 %v4795_v48  ;;  %7725 = vmatpush3.msra.mxu0 %v4888_v49 }
 0x428   : > { %7691 = vmatprep.subr.mxu1 %v11149_v21  ;;  %7726 = vmatprep.subr.mxu0 %v11149_v21 }
 0x429   : > { %7692 = vmatpush3.msra.mxu1 %v4794_v50  ;;  %7693 = vmatprep.mubr.msk.f32.mxu1 %vm7912_vm0, %v11149_v21 }
 0x42a   : > { %7727 = vmatpush3.msra.mxu0 %v4887_v53  ;;  %7728 = vmatprep.mubr.msk.f32.mxu0 %vm7912_vm0, %v11149_v21 }
 0x42b   : > { %7694 = vmatmul.mubr.f32.vlgmr.msra.gmra.mxu1 %v4815_v55  ;;  %7729 = vmatmul.mubr.f32.vlgmr.msra.gmra.mxu0 %v4908_v57 }
 0x42c   : > { %7731 = vmatprep.subr.mxu1 %v11149_v21  ;;  %7763 = vmatprep.mubr.msk.f32.mxu1 %vm7912_vm0, %v11149_v21 }
 0x42d   : > { %7732 = vmatpush3.msra.mxu1 %v4995_v58 }
 0x42e   : > { %7733 = vmatprep.subr.mxu1 %v11149_v21 }
 0x42f   : > { %7734 = vmatpush3.msra.mxu1 %v4994_v59 }
 0x430   : > { %7735 = vmatprep.subr.mxu1 %v11149_v21 }
 0x431   : > { %7736 = vmatpush3.msra.mxu1 %v4993_v60 }
 0x432   : > { %7737 = vmatprep.subr.mxu1 %v11149_v21 }
 0x433   : > { %7738 = vmatpush3.msra.mxu1 %v4992_v61 }
 0x434   : > { %7739 = vmatprep.subr.mxu1 %v11149_v21 }
 0x435   : > { %7740 = vmatpush3.msra.mxu1 %v4991_v62 }
 0x436   : > { %7741 = vmatprep.subr.mxu1 %v11149_v21 }
 0x437   : > { %7742 = vmatpush3.msra.mxu1 %v4990_v63 }
 0x438   : > { %7743 = vmatprep.subr.mxu1 %v11149_v21 }
 0x439   : > { %7744 = vmatpush3.msra.mxu1 %v4989_v0 }
 0x43a   : > { %7745 = vmatprep.subr.mxu1 %v11149_v21 }
 0x43b   : > { %7746 = vmatpush3.msra.mxu1 %v4988_v1 }
 0x43c   : > { %7747 = vmatprep.subr.mxu1 %v11149_v21 }
 0x43d   : > { %7748 = vmatpush3.msra.mxu1 %v4987_v2 }
 0x43e   : > { %7749 = vmatprep.subr.mxu1 %v11149_v21 }
 0x43f   : > { %7750 = vmatpush3.msra.mxu1 %v4986_v3 }
 0x440   : > { %7751 = vmatprep.subr.mxu1 %v11149_v21 }
 0x441   : > { %7752 = vmatpush3.msra.mxu1 %v4985_v4  ;;  %v3952_v6 = vpop.f32.mrf.mxu1  ;;  %v4045_v7 = vpop.f32.mrf.mxu0 }
 0x442   : > { %7753 = vmatprep.subr.mxu1 %v11149_v21  ;;  %v3956_v9 = vadd.f32 %v3952_v6, %v11393_v44 }
 0x443   : > { %7754 = vmatpush3.msra.mxu1 %v4984_v52  ;;  %v7345_v10 = vpop.f32.mrf.mxu1  ;;  %v7380_v11 = vpop.f32.mrf.mxu0 }
 0x444   : > { %7755 = vmatprep.subr.mxu1 %v11149_v21  ;;  %v4049_v13 = vadd.f32 %v4045_v7, %v3956_v9 }
 0x445   : > { %7756 = vmatpush3.msra.mxu1 %v4983_v8 }
 0x446   : > { %7757 = vmatprep.subr.mxu1 %v11149_v21 }
 0x447   : > { %7758 = vmatpush3.msra.mxu1 %v4982_v12 }
 0x448   : > { %7759 = vmatprep.subr.mxu1 %v11149_v21 }
 0x449   : > { %7760 = vmatpush3.msra.mxu1 %v4981_v15 }
 0x44a   : > { %7761 = vmatprep.subr.mxu1 %v11149_v21 }
 0x44b   : > { %7762 = vmatpush3.msra.mxu1 %v4980_v17 }
 0x44c   : > { %7764 = vmatmul.mubr.f32.vlgmr.msra.gmra.mxu1 %v5001_v20 }
 0x463   : > { %v4138_v22 = vpop.f32.mrf.mxu1  ;;  %v4231_v23 = vpop.f32.mrf.mxu0 }
 0x464   : > { %v4142_v46 = vadd.f32 %v4138_v22, %v4049_v13 }
 0x465   : > { %v7415_v24 = vpop.f32.mrf.mxu1  ;;  %v7450_v25 = vpop.f32.mrf.mxu0 }
 0x466   : > { %v4235_v26 = vadd.f32 %v4231_v23, %v4142_v46 }
 0x485   : > { %v4324_v27 = vpop.f32.mrf.mxu1  ;;  %v4417_v28 = vpop.f32.mrf.mxu0 }
 0x486   : > { %v4328_v29 = vadd.f32 %v4324_v27, %v4235_v26 }
 0x487   : > { %v7485_v30 = vpop.f32.mrf.mxu1  ;;  %v7520_v5 = vpop.f32.mrf.mxu0 }
 0x488   : > { %v4421_v32 = vadd.f32 %v4417_v28, %v4328_v29 }
 0x4a7   : > { %v4510_v33 = vpop.f32.mrf.mxu1  ;;  %v4603_v21 = vpop.f32.mrf.mxu0 }
 0x4a8   : > { %v4514_v18 = vadd.f32 %v4510_v33, %v4421_v32 }
 0x4a9   : > { %v7555_v34 = vpop.f32.mrf.mxu1  ;;  %v7590_v35 = vpop.f32.mrf.mxu0 }
 0x4aa   : > { %v4607_v36 = vadd.f32 %v4603_v21, %v4514_v18 }
 0x4c9   : > { %v4696_v37 = vpop.f32.mrf.mxu1  ;;  %v4789_v38 = vpop.f32.mrf.mxu0 }
 0x4ca   : > { %v4700_v45 = vadd.f32 %v4696_v37, %v4607_v36 }
 0x4cb   : > { %v7625_v39 = vpop.f32.mrf.mxu1  ;;  %v7660_v40 = vpop.f32.mrf.mxu0 }
 0x4cc   : > { %v4793_v47 = vadd.f32 %v4789_v38, %v4700_v45 }
 0x4eb   : > { %v4882_v41 = vpop.f32.mrf.mxu1  ;;  %v4975_v42 = vpop.f32.mrf.mxu0 }
 0x4ec   : > { %v4886_v48 = vadd.f32 %v4882_v41, %v4793_v47 }
 0x4ed   : > { %v7695_v43 = vpop.f32.mrf.mxu1  ;;  %v7730_v44 = vpop.f32.mrf.mxu0 }
 0x4ee   : > { %v4979_v49 = vadd.f32 %v4975_v42, %v4886_v48 }
 0x50c   : > { %v5068_v50 = vpop.f32.mrf.mxu1 }
 0x50d   : > { %v5072_v51 = vadd.f32 %v5068_v50, %v4979_v49 }
 0x50e   : > { %v7765_v31 = vpop.f32.mrf.mxu1 }
 0x50f   : > { %5073 = vst [vmem:[%s220_s26] sm:$0xf] %v5072_v51 }
 0x510   : > { %7862 = shalt.err (!%p7859_p3)
}
 0x511   : > { %s7863_s15 = scalar_lea.hbm %s11492_s8, 64  ;;  %s7867_s17 = scalar_lea.hbm %s11532_s5, 128 }
 0x512   : > { %p7864_p4 = scmp.ne.s32.totalorder %s11492_s8, %s7863_s15  ;;  %p7868_p9 = scmp.lt.s32.totalorder %s11492_s8, %s11532_s5 }
 0x513   : > { %p7869_p10 = scmp.lt.s32.totalorder %s7867_s17, %s7863_s15 }
 0x514   : > { %p7865_p7 = pnand %p7864_p4, %p7982_p5 }
 0x515   : > { %p7870_p11 = por %p7869_p10, %p7868_p9 }
 0x516   : > { %p7866_p8 = pneg %p7865_p7 }
 0x518   : > { %p7871_p12 = pnand %p7870_p11, %p7866_p8 }
 0x51a   : > { %7874 = shalt.err (!%p7871_p12)
}
 0x51b   : > { %7766 = dma.vmem_to_hbm [thread:$0]  (%p7982_p5), %s5089_s30, 64, %s11492_s8, %s5075_s9  }
 0x51c PF: > { %p7772_p13 = scmp.ge.s32.totalorder %s7909_s21, 2  ;;  %s5100_s25 = sand.u32 1, %s7897_s18  }
 0x51d   : > { %s5101_s26 = scalar_lea.sflag [#allocation4], %s5100_s25 }
 0x51e   : > { %p7769_p0 = pnand %p7772_p13, %p7986_p6 }
 0x520   : > { %p7770_p1 = pneg %p7769_p0 }
 0x522   : > { %7892 = dma.done.wait (%p7770_p1), %s5101_s26, 64  }
 0x523   : > { %7894 = vsyncadd (%p7770_p1), %s5101_s26, 4294967232  ;;  %p15_p2 = scmp.ge.s32.totalorder %s7969_s24, 4   ;;  %s11535_s18 = smov %s7901_s19 }
 0x524   : > { %s11536_s19 = smov %s7905_s20  ;;  %s11537_s20 = smov %s7980_s27 }
 0x525   : > { %s11538_s21 = smov %s7969_s24  ;;  %17 = sbr.rel (!%p15_p2) target bundleno = 3 (0x3), region = 152 }
 0x52a   :  { %5106 = vsyncpa [#allocation4], 1 }
 0x52b   :  { %5108 = vsyncpa [#allocation4 + $0x1], 1 }

</bundles_post_ra>
